<compile_context>
chip_gen: v7x
topology: tpu7x:2x2x1
jax: 0.10.0
libtpu: 0.0.40
codegen_flags: <defaults>
</compile_context>

<pallas_src>
import math
from functools import partial

import numpy as np
import jax
import jax.numpy as jnp
from jax import lax
from jax.experimental import pallas as pl
from jax.experimental.pallas import tpu as pltpu

LN_EPS = 1e-5


# ----------------------------- helpers (in-kernel) -----------------------------

def _layernorm(x, gamma, beta):
  mu = jnp.mean(x, axis=-1, keepdims=True)
  var = jnp.mean(jnp.square(x - mu), axis=-1, keepdims=True)
  return (x - mu) * lax.rsqrt(var + LN_EPS) * gamma + beta


def _gelu_tanh(x):
  # tanh-form GELU (EUP); |diff| vs exact erf GELU << test tolerance.
  c = 0.7978845608028654  # sqrt(2/pi)
  return 0.5 * x * (1.0 + jnp.tanh(c * (x + 0.044715 * (x * x * x))))


# ----------------------------- fused block kernel -------------------------------

def block_kernel(x_ref, yy_ref, xx_ref,
                 g1_ref, b1_ref, wq_ref, wk_ref, wv_ref, wp_ref, bp_ref,
                 g2_ref, b2_ref, w1_ref, fb1_ref, dww_ref, dwb_ref,
                 w2_ref, fb2_ref, o_ref, *, num_heads, scale, H, W):
  f32 = jnp.float32
  bf16 = jnp.bfloat16

  x = x_ref[...]                                   # (N, C) f32 — one image
  N, C = x.shape
  hd = C // num_heads

  # ------------------- attention branch (pre-norm) -------------------
  xn = _layernorm(x, g1_ref[...], b1_ref[...]).astype(bf16)
  q = jnp.dot(xn, wq_ref[...], preferred_element_type=f32) * scale  # scale folded into q
  k = jnp.dot(xn, wk_ref[...], preferred_element_type=f32)
  v = jnp.dot(xn, wv_ref[...], preferred_element_type=f32)
  # Hoisted bf16 casts: the head loop only does a cheap bf16 lane-select.
  q_bf = q.astype(bf16)
  k_bf = k.astype(bf16)
  v_bf = v.astype(bf16)

  lane = lax.broadcasted_iota(jnp.int32, (1, C), 1)
  attn = jnp.zeros((N, C), f32)
  # TODO(synk): when C exceeds the MXU contraction depth (128 v5e / 256 v6e,v7x)
  # switch to hd-wide per-head contractions, and at real PVT sizes (N ~ 3136)
  # flash-tile the KV loop so (N, N) f32 scores never fully materialize.
  for h in range(num_heads):
    # lane-mask the head's channels; full-width (K=C) MXU matmuls, no relayouts.
    in_head = (lane >= h * hd) & (lane < (h + 1) * hd)               # (1, C)
    qh = jnp.where(in_head, q_bf, jnp.zeros_like(q_bf))
    s = lax.dot_general(qh, k_bf, (((1,), (1,)), ((), ())),
                        preferred_element_type=f32)                  # (N, N)
    m = jnp.max(s, axis=-1, keepdims=True)
    e = jnp.exp(s - m)
    p = e * pl.reciprocal(jnp.sum(e, axis=-1, keepdims=True), approx=True)
    vh = jnp.where(in_head, v_bf, jnp.zeros_like(v_bf))
    attn = attn + jnp.dot(p.astype(bf16), vh, preferred_element_type=f32)

  x = x + jnp.dot(attn.astype(bf16), wp_ref[...],
                  preferred_element_type=f32) + bp_ref[...]

  # ------------------- MLP branch: fc1 -> DWConv3x3 -> GELU -> fc2 -------------------
  xn2 = _layernorm(x, g2_ref[...], b2_ref[...]).astype(bf16)
  h1 = jnp.dot(xn2, w1_ref[...], preferred_element_type=f32) + fb1_ref[...]   # (N, hid)

  yy = yy_ref[...]                                 # (N, 1) image row of each token
  xx = xx_ref[...]                                 # (N, 1) image col of each token
  # Hoist the 3 row and 3 col validity masks out of the 9-tap loop.
  row_ok = {dy: (yy + dy >= 0) & (yy + dy < H) for dy in (-1, 0, 1)}
  col_ok = {dx: (xx + dx >= 0) & (xx + dx < W) for dx in (-1, 0, 1)}
  wdw = dww_ref[...]                               # (9, hid)
  acc = jnp.zeros_like(h1)
  for dy in (-1, 0, 1):
    for dx in (-1, 0, 1):
      off = dy * W + dx
      # src[r] = h1[r + off] (circular); boundary mask kills wrapped / out-of-image taps.
      src = h1 if off == 0 else pltpu.roll(h1, shift=(-off) % N, axis=0)
      ok = row_ok[dy] & col_ok[dx]
      t = (dy + 1) * 3 + (dx + 1)
      acc = acc + jnp.where(ok, src, 0.0) * wdw[t:t + 1, :]
  acc = acc + dwb_ref[...]

  act = _gelu_tanh(acc)
  h2 = jnp.dot(act.astype(bf16), w2_ref[...],
               preferred_element_type=f32) + fb2_ref[...]
  o_ref[...] = (x + h2).astype(o_ref.dtype)


# ----------------------------- wrapper ------------------------------------------

def block_forward(x, p, H, W, num_heads):
  B, N, C = x.shape
  hid = p["w1"].shape[1]
  hd = C // num_heads
  scale = hd ** -0.5

  x2 = x.reshape(B * N, C)
  bf16 = jnp.bfloat16
  wq = p["wq"].astype(bf16)
  wk = p["wkv"][:, :C].astype(bf16)
  wv = p["wkv"][:, C:].astype(bf16)
  wp = p["wproj"].astype(bf16)
  w1 = p["w1"].astype(bf16)
  w2 = p["w2"].astype(bf16)
  dww9 = p["dww"].reshape(9, hid)

  # Trace-time per-image row/col index vectors (O(N), no integer div in-kernel,
  # no O(BN^2) mask anywhere).
  idx = np.arange(N)
  yy = jnp.asarray((idx // W)[:, None], jnp.int32)
  xx = jnp.asarray((idx % W)[:, None], jnp.int32)

  # Per-image streamed blocks vs resident (constant index_map) weights.
  img = lambda shape: pl.BlockSpec(shape, lambda b: (b, 0))
  res = lambda shape: pl.BlockSpec(shape, lambda b: (0,) * len(shape))

  flops = B * (4 * 2 * N * C * C                       # q, k, v, proj matmuls
               + num_heads * 2 * 2 * N * N * C         # QK^T + PV (full-width K)
               + 2 * 2 * N * C * hid                   # fc1 + fc2
               + 9 * 2 * N * hid)                      # depthwise conv taps
  transcendentals = B * (num_heads * N * N + N * hid)  # softmax exp + gelu tanh
  bytes_accessed = (2 * B * N * C * 4                  # x in + out
                    + (4 * C * C + 2 * C * hid) * 2    # bf16 weights
                    + (9 + 2) * hid * 4 + 6 * C * 4)   # dwconv + biases + LN params

  out2 = pl.pallas_call(
      partial(block_kernel, num_heads=num_heads, scale=scale, H=H, W=W),
      grid=(B,),
      in_specs=[img((N, C)), res((N, 1)), res((N, 1)),
                res((1, C)), res((1, C)),                       # ln1 gamma/beta
                res((C, C)), res((C, C)), res((C, C)),          # wq, wk, wv
                res((C, C)), res((1, C)),                       # wproj, bproj
                res((1, C)), res((1, C)),                       # ln2 gamma/beta
                res((C, hid)), res((1, hid)),                   # fc1
                res((9, hid)), res((1, hid)),                   # dwconv
                res((hid, C)), res((1, C))],                    # fc2
      out_specs=img((N, C)),
      out_shape=jax.ShapeDtypeStruct((B * N, C), x.dtype),
      input_output_aliases={0: 0},
      compiler_params=pltpu.CompilerParams(
          dimension_semantics=("parallel",),
          vmem_limit_bytes=64 * 1024 * 1024),
      cost_estimate=pl.CostEstimate(flops=flops,
                                    transcendentals=transcendentals,
                                    bytes_accessed=bytes_accessed),
  )(x2, yy, xx,
    p["ln1_g"], p["ln1_b"], wq, wk, wv, wp, p["bproj"],
    p["ln2_g"], p["ln2_b"], w1, p["b1"], dww9, p["dwb"], w2, p["b2"])
  return out2.reshape(B, N, C)


# ----------------------------- pure-JAX reference --------------------------------

def block_reference(x, p, H, W, num_heads):
  with jax.default_matmul_precision("highest"):
    B, N, C = x.shape
    hd = C // num_heads
    scale = hd ** -0.5

    def ln(v, g, b):
      mu = v.mean(-1, keepdims=True)
      var = ((v - mu) ** 2).mean(-1, keepdims=True)
      return (v - mu) / jnp.sqrt(var + LN_EPS) * g + b

    xn = ln(x, p["ln1_g"][0], p["ln1_b"][0])
    q = xn @ p["wq"]
    kv = xn @ p["wkv"]
    k, v = kv[..., :C], kv[..., C:]
    sh = lambda t: t.reshape(B, N, num_heads, hd).transpose(0, 2, 1, 3)
    qh, kh, vh = sh(q), sh(k), sh(v)
    s = jnp.einsum("bhnd,bhmd->bhnm", qh, kh) * scale
    a = jax.nn.softmax(s, axis=-1)
    o = jnp.einsum("bhnm,bhmd->bhnd", a, vh).transpose(0, 2, 1, 3).reshape(B, N, C)
    x = x + (o @ p["wproj"] + p["bproj"][0])

    yn = ln(x, p["ln2_g"][0], p["ln2_b"][0])
    h1 = yn @ p["w1"] + p["b1"][0]
    hid = h1.shape[-1]
    img = h1.reshape(B, H, W, hid)
    conv = lax.conv_general_dilated(
        img, p["dww"].reshape(3, 3, 1, hid), (1, 1), "SAME",
        dimension_numbers=("NHWC", "HWIO", "NHWC"),
        feature_group_count=hid) + p["dwb"][0]
    act = jax.nn.gelu(conv, approximate=False)
    h2 = act.reshape(B, N, hid) @ p["w2"] + p["b2"][0]
    return x + h2


# ----------------------------- parameter init -------------------------------------

def init_params(key, dim, hidden):
  ks = jax.random.split(key, 14)
  n = lambda k, s, std: std * jax.random.normal(k, s, jnp.float32)
  return {
      "ln1_g": 1.0 + n(ks[0], (1, dim), 0.02),
      "ln1_b": n(ks[1], (1, dim), 0.02),
      "wq":    n(ks[2], (dim, dim), 0.02),
      "wkv":   n(ks[3], (dim, 2 * dim), 0.02),
      "wproj": n(ks[4], (dim, dim), 0.02),
      "bproj": n(ks[5], (1, dim), 0.02),
      "ln2_g": 1.0 + n(ks[6], (1, dim), 0.02),
      "ln2_b": n(ks[7], (1, dim), 0.02),
      "w1":    n(ks[8], (dim, hidden), 0.02),
      "b1":    n(ks[9], (1, hidden), 0.02),
      "dww":   n(ks[10], (3, 3, hidden), math.sqrt(2.0 / 9.0)),
      "dwb":   n(ks[11], (1, hidden), 0.02),
      "w2":    n(ks[12], (hidden, dim), 0.02),
      "b2":    n(ks[13], (1, dim), 0.02),
  }


# ----------------------------- main -----------------------------------------------

if __name__ == "__main__":
  B, H, W = 2, 8, 8
  dim, num_heads, mlp_ratio = 32, 4, 4.0
  N = H * W
  hidden = int(dim * mlp_ratio)

  key = jax.random.PRNGKey(0)
  kx, kp = jax.random.split(key)
  x = jax.random.normal(kx, (B, N, dim), jnp.float32)
  params = init_params(kp, dim, hidden)

  fwd = jax.jit(partial(block_forward, H=H, W=W, num_heads=num_heads))
  out = jax.block_until_ready(fwd(x, params))

  ref = block_reference(x, params, H, W, num_heads)
  err = float(jnp.max(jnp.abs(out - ref)))
  assert out.shape == (B, N, dim)
  assert err < 1e-2, f"mismatch vs reference: max abs err = {err}"

  print("KERNEL_OK")
</pallas_src>

<mosaic_0001>
module attributes {stable_mosaic.version = 11 : i64} {
  func.func @block_kernel(%arg0: i32, %arg1: memref<64x32xf32, #tpu.memory_space<vmem>>, %arg2: memref<64x1xi32, #tpu.memory_space<vmem>>, %arg3: memref<64x1xi32, #tpu.memory_space<vmem>>, %arg4: memref<1x32xf32, #tpu.memory_space<vmem>>, %arg5: memref<1x32xf32, #tpu.memory_space<vmem>>, %arg6: memref<32x32xbf16, #tpu.memory_space<vmem>>, %arg7: memref<32x32xbf16, #tpu.memory_space<vmem>>, %arg8: memref<32x32xbf16, #tpu.memory_space<vmem>>, %arg9: memref<32x32xbf16, #tpu.memory_space<vmem>>, %arg10: memref<1x32xf32, #tpu.memory_space<vmem>>, %arg11: memref<1x32xf32, #tpu.memory_space<vmem>>, %arg12: memref<1x32xf32, #tpu.memory_space<vmem>>, %arg13: memref<32x128xbf16, #tpu.memory_space<vmem>>, %arg14: memref<1x128xf32, #tpu.memory_space<vmem>>, %arg15: memref<9x128xf32, #tpu.memory_space<vmem>>, %arg16: memref<1x128xf32, #tpu.memory_space<vmem>>, %arg17: memref<128x32xbf16, #tpu.memory_space<vmem>>, %arg18: memref<1x32xf32, #tpu.memory_space<vmem>>, %arg19: memref<64x32xf32, #tpu.memory_space<vmem>>) attributes {dimension_semantics = [#tpu.dimension_semantics<parallel>], iteration_bounds = array<i64: 2>, scalar_prefetch = 0 : i64, scratch_operands = 0 : i64, tpu.core_type = #tpu.core_type<tc>, window_params = [{transform_indices = @transform_0, window_bounds = array<i64: 64, 32>}, {pipeline_mode = #tpu.pipeline_mode<synchronous>, transform_indices = @transform_1, window_bounds = array<i64: 64, 1>}, {pipeline_mode = #tpu.pipeline_mode<synchronous>, transform_indices = @transform_2, window_bounds = array<i64: 64, 1>}, {pipeline_mode = #tpu.pipeline_mode<synchronous>, transform_indices = @transform_3, window_bounds = array<i64: 1, 32>}, {pipeline_mode = #tpu.pipeline_mode<synchronous>, transform_indices = @transform_4, window_bounds = array<i64: 1, 32>}, {pipeline_mode = #tpu.pipeline_mode<synchronous>, transform_indices = @transform_5, window_bounds = array<i64: 32, 32>}, {pipeline_mode = #tpu.pipeline_mode<synchronous>, transform_indices = @transform_6, window_bounds = array<i64: 32, 32>}, {pipeline_mode = #tpu.pipeline_mode<synchronous>, transform_indices = @transform_7, window_bounds = array<i64: 32, 32>}, {pipeline_mode = #tpu.pipeline_mode<synchronous>, transform_indices = @transform_8, window_bounds = array<i64: 32, 32>}, {pipeline_mode = #tpu.pipeline_mode<synchronous>, transform_indices = @transform_9, window_bounds = array<i64: 1, 32>}, {pipeline_mode = #tpu.pipeline_mode<synchronous>, transform_indices = @transform_10, window_bounds = array<i64: 1, 32>}, {pipeline_mode = #tpu.pipeline_mode<synchronous>, transform_indices = @transform_11, window_bounds = array<i64: 1, 32>}, {pipeline_mode = #tpu.pipeline_mode<synchronous>, transform_indices = @transform_12, window_bounds = array<i64: 32, 128>}, {pipeline_mode = #tpu.pipeline_mode<synchronous>, transform_indices = @transform_13, window_bounds = array<i64: 1, 128>}, {pipeline_mode = #tpu.pipeline_mode<synchronous>, transform_indices = @transform_14, window_bounds = array<i64: 9, 128>}, {pipeline_mode = #tpu.pipeline_mode<synchronous>, transform_indices = @transform_15, window_bounds = array<i64: 1, 128>}, {pipeline_mode = #tpu.pipeline_mode<synchronous>, transform_indices = @transform_16, window_bounds = array<i64: 128, 32>}, {pipeline_mode = #tpu.pipeline_mode<synchronous>, transform_indices = @transform_17, window_bounds = array<i64: 1, 32>}, {transform_indices = @transform_18, window_bounds = array<i64: 64, 32>}]} {
    %c0 = arith.constant 0 : index
    %c0_0 = arith.constant 0 : index
    %0 = vector.load %arg1[%c0, %c0_0] : memref<64x32xf32, #tpu.memory_space<vmem>>, vector<64x32xf32>
    %c0_1 = arith.constant 0 : index
    %c0_2 = arith.constant 0 : index
    %1 = vector.load %arg4[%c0_1, %c0_2] : memref<1x32xf32, #tpu.memory_space<vmem>>, vector<1x32xf32>
    %c0_3 = arith.constant 0 : index
    %c0_4 = arith.constant 0 : index
    %2 = vector.load %arg5[%c0_3, %c0_4] : memref<1x32xf32, #tpu.memory_space<vmem>>, vector<1x32xf32>
    %cst = arith.constant dense<0.000000e+00> : vector<64xf32>
    %3 = vector.multi_reduction <add>, %0, %cst [1] : vector<64x32xf32> to vector<64xf32>
    %4 = vector.shape_cast %3 : vector<64xf32> to vector<64x1xf32>
    %cst_5 = arith.constant 3.200000e+01 : f32
    %5 = vector.broadcast %cst_5 : f32 to vector<64x1xf32>
    %6 = arith.divf %4, %5 : vector<64x1xf32>
    %7 = vector.broadcast %6 : vector<64x1xf32> to vector<64x32xf32>
    %8 = arith.subf %0, %7 : vector<64x32xf32>
    %9 = arith.mulf %8, %8 : vector<64x32xf32>
    %cst_6 = arith.constant dense<0.000000e+00> : vector<64xf32>
    %10 = vector.multi_reduction <add>, %9, %cst_6 [1] : vector<64x32xf32> to vector<64xf32>
    %11 = vector.shape_cast %10 : vector<64xf32> to vector<64x1xf32>
    %cst_7 = arith.constant 3.200000e+01 : f32
    %12 = vector.broadcast %cst_7 : f32 to vector<64x1xf32>
    %13 = arith.divf %11, %12 : vector<64x1xf32>
    %14 = vector.broadcast %6 : vector<64x1xf32> to vector<64x32xf32>
    %15 = arith.subf %0, %14 : vector<64x32xf32>
    %cst_8 = arith.constant 9.99999974E-6 : f32
    %16 = vector.broadcast %cst_8 : f32 to vector<64x1xf32>
    %17 = arith.addf %13, %16 : vector<64x1xf32>
    %18 = math.rsqrt %17 : vector<64x1xf32>
    %19 = vector.broadcast %18 : vector<64x1xf32> to vector<64x32xf32>
    %20 = arith.mulf %15, %19 : vector<64x32xf32>
    %21 = vector.broadcast %1 : vector<1x32xf32> to vector<64x32xf32>
    %22 = arith.mulf %20, %21 : vector<64x32xf32>
    %23 = vector.broadcast %2 : vector<1x32xf32> to vector<64x32xf32>
    %24 = arith.addf %22, %23 : vector<64x32xf32>
    %25 = arith.truncf %24 : vector<64x32xf32> to vector<64x32xbf16>
    %c0_9 = arith.constant 0 : index
    %c0_10 = arith.constant 0 : index
    %26 = vector.load %arg6[%c0_9, %c0_10] : memref<32x32xbf16, #tpu.memory_space<vmem>>, vector<32x32xbf16>
    %cst_11 = arith.constant dense<0.000000e+00> : vector<64x32xf32>
    %27 = tpu.matmul %25, %26, %cst_11 {dimension_numbers = #tpu.dot_dimension_numbers<[1], [0], [0], [1], [0, 0, 1, 1], [], []>} : vector<64x32xbf16>, vector<32x32xbf16>, vector<64x32xf32> -> vector<64x32xf32>
    %cst_12 = arith.constant 0.353553385 : f32
    %28 = vector.broadcast %cst_12 : f32 to vector<64x32xf32>
    %29 = arith.mulf %27, %28 : vector<64x32xf32>
    %c0_13 = arith.constant 0 : index
    %c0_14 = arith.constant 0 : index
    %30 = vector.load %arg7[%c0_13, %c0_14] : memref<32x32xbf16, #tpu.memory_space<vmem>>, vector<32x32xbf16>
    %cst_15 = arith.constant dense<0.000000e+00> : vector<64x32xf32>
    %31 = tpu.matmul %25, %30, %cst_15 {dimension_numbers = #tpu.dot_dimension_numbers<[1], [0], [0], [1], [0, 0, 1, 1], [], []>} : vector<64x32xbf16>, vector<32x32xbf16>, vector<64x32xf32> -> vector<64x32xf32>
    %c0_16 = arith.constant 0 : index
    %c0_17 = arith.constant 0 : index
    %32 = vector.load %arg8[%c0_16, %c0_17] : memref<32x32xbf16, #tpu.memory_space<vmem>>, vector<32x32xbf16>
    %cst_18 = arith.constant dense<0.000000e+00> : vector<64x32xf32>
    %33 = tpu.matmul %25, %32, %cst_18 {dimension_numbers = #tpu.dot_dimension_numbers<[1], [0], [0], [1], [0, 0, 1, 1], [], []>} : vector<64x32xbf16>, vector<32x32xbf16>, vector<64x32xf32> -> vector<64x32xf32>
    %34 = arith.truncf %29 : vector<64x32xf32> to vector<64x32xbf16>
    %35 = arith.truncf %31 : vector<64x32xf32> to vector<64x32xbf16>
    %36 = arith.truncf %33 : vector<64x32xf32> to vector<64x32xbf16>
    %37 = tpu.iota {dimensions = array<i32: 1>} : vector<1x32xi32>
    %cst_19 = arith.constant 0.000000e+00 : f32
    %38 = vector.broadcast %cst_19 : f32 to vector<64x32xf32>
    %c0_i32 = arith.constant 0 : i32
    %39 = vector.broadcast %c0_i32 : i32 to vector<1x32xi32>
    %40 = arith.cmpi sge, %37, %39 : vector<1x32xi32>
    %c8_i32 = arith.constant 8 : i32
    %41 = vector.broadcast %c8_i32 : i32 to vector<1x32xi32>
    %42 = arith.cmpi slt, %37, %41 : vector<1x32xi32>
    %43 = arith.andi %40, %42 : vector<1x32xi1>
    %cst_20 = arith.constant 0.000000e+00 : bf16
    %44 = vector.broadcast %cst_20 : bf16 to vector<64x32xbf16>
    %45 = vector.shape_cast %43 : vector<1x32xi1> to vector<1x32xi1>
    %46 = vector.broadcast %45 : vector<1x32xi1> to vector<64x32xi1>
    %47 = arith.select %46, %34, %44 : vector<64x32xi1>, vector<64x32xbf16>
    %cst_21 = arith.constant dense<0.000000e+00> : vector<64x64xf32>
    %48 = tpu.matmul %47, %35, %cst_21 {dimension_numbers = #tpu.dot_dimension_numbers<[1], [1], [0], [0], [0, 0, 1, 0], [], []>} : vector<64x32xbf16>, vector<64x32xbf16>, vector<64x64xf32> -> vector<64x64xf32>
    %cst_22 = arith.constant dense<0xFF800000> : vector<64xf32>
    %49 = vector.multi_reduction <maximumf>, %48, %cst_22 [1] : vector<64x64xf32> to vector<64xf32>
    %50 = vector.shape_cast %49 : vector<64xf32> to vector<64x1xf32>
    %51 = vector.broadcast %50 : vector<64x1xf32> to vector<64x64xf32>
    %52 = arith.subf %48, %51 : vector<64x64xf32>
    %53 = math.exp %52 : vector<64x64xf32>
    %cst_23 = arith.constant dense<0.000000e+00> : vector<64xf32>
    %54 = vector.multi_reduction <add>, %53, %cst_23 [1] : vector<64x64xf32> to vector<64xf32>
    %55 = vector.shape_cast %54 : vector<64xf32> to vector<64x1xf32>
    %56 = tpu.reciprocal %55 {approx = true} : vector<64x1xf32> -> vector<64x1xf32>
    %57 = vector.broadcast %56 : vector<64x1xf32> to vector<64x64xf32>
    %58 = arith.mulf %53, %57 : vector<64x64xf32>
    %cst_24 = arith.constant 0.000000e+00 : bf16
    %59 = vector.broadcast %cst_24 : bf16 to vector<64x32xbf16>
    %60 = vector.shape_cast %43 : vector<1x32xi1> to vector<1x32xi1>
    %61 = vector.broadcast %60 : vector<1x32xi1> to vector<64x32xi1>
    %62 = arith.select %61, %36, %59 : vector<64x32xi1>, vector<64x32xbf16>
    %63 = arith.truncf %58 : vector<64x64xf32> to vector<64x64xbf16>
    %cst_25 = arith.constant dense<0.000000e+00> : vector<64x32xf32>
    %64 = tpu.matmul %63, %62, %cst_25 {dimension_numbers = #tpu.dot_dimension_numbers<[1], [0], [0], [1], [0, 0, 1, 1], [], []>} : vector<64x64xbf16>, vector<64x32xbf16>, vector<64x32xf32> -> vector<64x32xf32>
    %65 = arith.addf %38, %64 : vector<64x32xf32>
    %c8_i32_26 = arith.constant 8 : i32
    %66 = vector.broadcast %c8_i32_26 : i32 to vector<1x32xi32>
    %67 = arith.cmpi sge, %37, %66 : vector<1x32xi32>
    %c16_i32 = arith.constant 16 : i32
    %68 = vector.broadcast %c16_i32 : i32 to vector<1x32xi32>
    %69 = arith.cmpi slt, %37, %68 : vector<1x32xi32>
    %70 = arith.andi %67, %69 : vector<1x32xi1>
    %cst_27 = arith.constant 0.000000e+00 : bf16
    %71 = vector.broadcast %cst_27 : bf16 to vector<64x32xbf16>
    %72 = vector.shape_cast %70 : vector<1x32xi1> to vector<1x32xi1>
    %73 = vector.broadcast %72 : vector<1x32xi1> to vector<64x32xi1>
    %74 = arith.select %73, %34, %71 : vector<64x32xi1>, vector<64x32xbf16>
    %cst_28 = arith.constant dense<0.000000e+00> : vector<64x64xf32>
    %75 = tpu.matmul %74, %35, %cst_28 {dimension_numbers = #tpu.dot_dimension_numbers<[1], [1], [0], [0], [0, 0, 1, 0], [], []>} : vector<64x32xbf16>, vector<64x32xbf16>, vector<64x64xf32> -> vector<64x64xf32>
    %cst_29 = arith.constant dense<0xFF800000> : vector<64xf32>
    %76 = vector.multi_reduction <maximumf>, %75, %cst_29 [1] : vector<64x64xf32> to vector<64xf32>
    %77 = vector.shape_cast %76 : vector<64xf32> to vector<64x1xf32>
    %78 = vector.broadcast %77 : vector<64x1xf32> to vector<64x64xf32>
    %79 = arith.subf %75, %78 : vector<64x64xf32>
    %80 = math.exp %79 : vector<64x64xf32>
    %cst_30 = arith.constant dense<0.000000e+00> : vector<64xf32>
    %81 = vector.multi_reduction <add>, %80, %cst_30 [1] : vector<64x64xf32> to vector<64xf32>
    %82 = vector.shape_cast %81 : vector<64xf32> to vector<64x1xf32>
    %83 = tpu.reciprocal %82 {approx = true} : vector<64x1xf32> -> vector<64x1xf32>
    %84 = vector.broadcast %83 : vector<64x1xf32> to vector<64x64xf32>
    %85 = arith.mulf %80, %84 : vector<64x64xf32>
    %cst_31 = arith.constant 0.000000e+00 : bf16
    %86 = vector.broadcast %cst_31 : bf16 to vector<64x32xbf16>
    %87 = vector.shape_cast %70 : vector<1x32xi1> to vector<1x32xi1>
    %88 = vector.broadcast %87 : vector<1x32xi1> to vector<64x32xi1>
    %89 = arith.select %88, %36, %86 : vector<64x32xi1>, vector<64x32xbf16>
    %90 = arith.truncf %85 : vector<64x64xf32> to vector<64x64xbf16>
    %cst_32 = arith.constant dense<0.000000e+00> : vector<64x32xf32>
    %91 = tpu.matmul %90, %89, %cst_32 {dimension_numbers = #tpu.dot_dimension_numbers<[1], [0], [0], [1], [0, 0, 1, 1], [], []>} : vector<64x64xbf16>, vector<64x32xbf16>, vector<64x32xf32> -> vector<64x32xf32>
    %92 = arith.addf %65, %91 : vector<64x32xf32>
    %c16_i32_33 = arith.constant 16 : i32
    %93 = vector.broadcast %c16_i32_33 : i32 to vector<1x32xi32>
    %94 = arith.cmpi sge, %37, %93 : vector<1x32xi32>
    %c24_i32 = arith.constant 24 : i32
    %95 = vector.broadcast %c24_i32 : i32 to vector<1x32xi32>
    %96 = arith.cmpi slt, %37, %95 : vector<1x32xi32>
    %97 = arith.andi %94, %96 : vector<1x32xi1>
    %cst_34 = arith.constant 0.000000e+00 : bf16
    %98 = vector.broadcast %cst_34 : bf16 to vector<64x32xbf16>
    %99 = vector.shape_cast %97 : vector<1x32xi1> to vector<1x32xi1>
    %100 = vector.broadcast %99 : vector<1x32xi1> to vector<64x32xi1>
    %101 = arith.select %100, %34, %98 : vector<64x32xi1>, vector<64x32xbf16>
    %cst_35 = arith.constant dense<0.000000e+00> : vector<64x64xf32>
    %102 = tpu.matmul %101, %35, %cst_35 {dimension_numbers = #tpu.dot_dimension_numbers<[1], [1], [0], [0], [0, 0, 1, 0], [], []>} : vector<64x32xbf16>, vector<64x32xbf16>, vector<64x64xf32> -> vector<64x64xf32>
    %cst_36 = arith.constant dense<0xFF800000> : vector<64xf32>
    %103 = vector.multi_reduction <maximumf>, %102, %cst_36 [1] : vector<64x64xf32> to vector<64xf32>
    %104 = vector.shape_cast %103 : vector<64xf32> to vector<64x1xf32>
    %105 = vector.broadcast %104 : vector<64x1xf32> to vector<64x64xf32>
    %106 = arith.subf %102, %105 : vector<64x64xf32>
    %107 = math.exp %106 : vector<64x64xf32>
    %cst_37 = arith.constant dense<0.000000e+00> : vector<64xf32>
    %108 = vector.multi_reduction <add>, %107, %cst_37 [1] : vector<64x64xf32> to vector<64xf32>
    %109 = vector.shape_cast %108 : vector<64xf32> to vector<64x1xf32>
    %110 = tpu.reciprocal %109 {approx = true} : vector<64x1xf32> -> vector<64x1xf32>
    %111 = vector.broadcast %110 : vector<64x1xf32> to vector<64x64xf32>
    %112 = arith.mulf %107, %111 : vector<64x64xf32>
    %cst_38 = arith.constant 0.000000e+00 : bf16
    %113 = vector.broadcast %cst_38 : bf16 to vector<64x32xbf16>
    %114 = vector.shape_cast %97 : vector<1x32xi1> to vector<1x32xi1>
    %115 = vector.broadcast %114 : vector<1x32xi1> to vector<64x32xi1>
    %116 = arith.select %115, %36, %113 : vector<64x32xi1>, vector<64x32xbf16>
    %117 = arith.truncf %112 : vector<64x64xf32> to vector<64x64xbf16>
    %cst_39 = arith.constant dense<0.000000e+00> : vector<64x32xf32>
    %118 = tpu.matmul %117, %116, %cst_39 {dimension_numbers = #tpu.dot_dimension_numbers<[1], [0], [0], [1], [0, 0, 1, 1], [], []>} : vector<64x64xbf16>, vector<64x32xbf16>, vector<64x32xf32> -> vector<64x32xf32>
    %119 = arith.addf %92, %118 : vector<64x32xf32>
    %c24_i32_40 = arith.constant 24 : i32
    %120 = vector.broadcast %c24_i32_40 : i32 to vector<1x32xi32>
    %121 = arith.cmpi sge, %37, %120 : vector<1x32xi32>
    %c32_i32 = arith.constant 32 : i32
    %122 = vector.broadcast %c32_i32 : i32 to vector<1x32xi32>
    %123 = arith.cmpi slt, %37, %122 : vector<1x32xi32>
    %124 = arith.andi %121, %123 : vector<1x32xi1>
    %cst_41 = arith.constant 0.000000e+00 : bf16
    %125 = vector.broadcast %cst_41 : bf16 to vector<64x32xbf16>
    %126 = vector.shape_cast %124 : vector<1x32xi1> to vector<1x32xi1>
    %127 = vector.broadcast %126 : vector<1x32xi1> to vector<64x32xi1>
    %128 = arith.select %127, %34, %125 : vector<64x32xi1>, vector<64x32xbf16>
    %cst_42 = arith.constant dense<0.000000e+00> : vector<64x64xf32>
    %129 = tpu.matmul %128, %35, %cst_42 {dimension_numbers = #tpu.dot_dimension_numbers<[1], [1], [0], [0], [0, 0, 1, 0], [], []>} : vector<64x32xbf16>, vector<64x32xbf16>, vector<64x64xf32> -> vector<64x64xf32>
    %cst_43 = arith.constant dense<0xFF800000> : vector<64xf32>
    %130 = vector.multi_reduction <maximumf>, %129, %cst_43 [1] : vector<64x64xf32> to vector<64xf32>
    %131 = vector.shape_cast %130 : vector<64xf32> to vector<64x1xf32>
    %132 = vector.broadcast %131 : vector<64x1xf32> to vector<64x64xf32>
    %133 = arith.subf %129, %132 : vector<64x64xf32>
    %134 = math.exp %133 : vector<64x64xf32>
    %cst_44 = arith.constant dense<0.000000e+00> : vector<64xf32>
    %135 = vector.multi_reduction <add>, %134, %cst_44 [1] : vector<64x64xf32> to vector<64xf32>
    %136 = vector.shape_cast %135 : vector<64xf32> to vector<64x1xf32>
    %137 = tpu.reciprocal %136 {approx = true} : vector<64x1xf32> -> vector<64x1xf32>
    %138 = vector.broadcast %137 : vector<64x1xf32> to vector<64x64xf32>
    %139 = arith.mulf %134, %138 : vector<64x64xf32>
    %cst_45 = arith.constant 0.000000e+00 : bf16
    %140 = vector.broadcast %cst_45 : bf16 to vector<64x32xbf16>
    %141 = vector.shape_cast %124 : vector<1x32xi1> to vector<1x32xi1>
    %142 = vector.broadcast %141 : vector<1x32xi1> to vector<64x32xi1>
    %143 = arith.select %142, %36, %140 : vector<64x32xi1>, vector<64x32xbf16>
    %144 = arith.truncf %139 : vector<64x64xf32> to vector<64x64xbf16>
    %cst_46 = arith.constant dense<0.000000e+00> : vector<64x32xf32>
    %145 = tpu.matmul %144, %143, %cst_46 {dimension_numbers = #tpu.dot_dimension_numbers<[1], [0], [0], [1], [0, 0, 1, 1], [], []>} : vector<64x64xbf16>, vector<64x32xbf16>, vector<64x32xf32> -> vector<64x32xf32>
    %146 = arith.addf %119, %145 : vector<64x32xf32>
    %147 = arith.truncf %146 : vector<64x32xf32> to vector<64x32xbf16>
    %c0_47 = arith.constant 0 : index
    %c0_48 = arith.constant 0 : index
    %148 = vector.load %arg9[%c0_47, %c0_48] : memref<32x32xbf16, #tpu.memory_space<vmem>>, vector<32x32xbf16>
    %cst_49 = arith.constant dense<0.000000e+00> : vector<64x32xf32>
    %149 = tpu.matmul %147, %148, %cst_49 {dimension_numbers = #tpu.dot_dimension_numbers<[1], [0], [0], [1], [0, 0, 1, 1], [], []>} : vector<64x32xbf16>, vector<32x32xbf16>, vector<64x32xf32> -> vector<64x32xf32>
    %150 = arith.addf %0, %149 : vector<64x32xf32>
    %c0_50 = arith.constant 0 : index
    %c0_51 = arith.constant 0 : index
    %151 = vector.load %arg10[%c0_50, %c0_51] : memref<1x32xf32, #tpu.memory_space<vmem>>, vector<1x32xf32>
    %152 = vector.broadcast %151 : vector<1x32xf32> to vector<64x32xf32>
    %153 = arith.addf %150, %152 : vector<64x32xf32>
    %c0_52 = arith.constant 0 : index
    %c0_53 = arith.constant 0 : index
    %154 = vector.load %arg11[%c0_52, %c0_53] : memref<1x32xf32, #tpu.memory_space<vmem>>, vector<1x32xf32>
    %c0_54 = arith.constant 0 : index
    %c0_55 = arith.constant 0 : index
    %155 = vector.load %arg12[%c0_54, %c0_55] : memref<1x32xf32, #tpu.memory_space<vmem>>, vector<1x32xf32>
    %cst_56 = arith.constant dense<0.000000e+00> : vector<64xf32>
    %156 = vector.multi_reduction <add>, %153, %cst_56 [1] : vector<64x32xf32> to vector<64xf32>
    %157 = vector.shape_cast %156 : vector<64xf32> to vector<64x1xf32>
    %cst_57 = arith.constant 3.200000e+01 : f32
    %158 = vector.broadcast %cst_57 : f32 to vector<64x1xf32>
    %159 = arith.divf %157, %158 : vector<64x1xf32>
    %160 = vector.broadcast %159 : vector<64x1xf32> to vector<64x32xf32>
    %161 = arith.subf %153, %160 : vector<64x32xf32>
    %162 = arith.mulf %161, %161 : vector<64x32xf32>
    %cst_58 = arith.constant dense<0.000000e+00> : vector<64xf32>
    %163 = vector.multi_reduction <add>, %162, %cst_58 [1] : vector<64x32xf32> to vector<64xf32>
    %164 = vector.shape_cast %163 : vector<64xf32> to vector<64x1xf32>
    %cst_59 = arith.constant 3.200000e+01 : f32
    %165 = vector.broadcast %cst_59 : f32 to vector<64x1xf32>
    %166 = arith.divf %164, %165 : vector<64x1xf32>
    %167 = vector.broadcast %159 : vector<64x1xf32> to vector<64x32xf32>
    %168 = arith.subf %153, %167 : vector<64x32xf32>
    %cst_60 = arith.constant 9.99999974E-6 : f32
    %169 = vector.broadcast %cst_60 : f32 to vector<64x1xf32>
    %170 = arith.addf %166, %169 : vector<64x1xf32>
    %171 = math.rsqrt %170 : vector<64x1xf32>
    %172 = vector.broadcast %171 : vector<64x1xf32> to vector<64x32xf32>
    %173 = arith.mulf %168, %172 : vector<64x32xf32>
    %174 = vector.broadcast %154 : vector<1x32xf32> to vector<64x32xf32>
    %175 = arith.mulf %173, %174 : vector<64x32xf32>
    %176 = vector.broadcast %155 : vector<1x32xf32> to vector<64x32xf32>
    %177 = arith.addf %175, %176 : vector<64x32xf32>
    %178 = arith.truncf %177 : vector<64x32xf32> to vector<64x32xbf16>
    %c0_61 = arith.constant 0 : index
    %c0_62 = arith.constant 0 : index
    %179 = vector.load %arg13[%c0_61, %c0_62] : memref<32x128xbf16, #tpu.memory_space<vmem>>, vector<32x128xbf16>
    %cst_63 = arith.constant dense<0.000000e+00> : vector<64x128xf32>
    %180 = tpu.matmul %178, %179, %cst_63 {dimension_numbers = #tpu.dot_dimension_numbers<[1], [0], [0], [1], [0, 0, 1, 1], [], []>} : vector<64x32xbf16>, vector<32x128xbf16>, vector<64x128xf32> -> vector<64x128xf32>
    %c0_64 = arith.constant 0 : index
    %c0_65 = arith.constant 0 : index
    %181 = vector.load %arg14[%c0_64, %c0_65] : memref<1x128xf32, #tpu.memory_space<vmem>>, vector<1x128xf32>
    %182 = vector.broadcast %181 : vector<1x128xf32> to vector<64x128xf32>
    %183 = arith.addf %180, %182 : vector<64x128xf32>
    %c0_66 = arith.constant 0 : index
    %c0_67 = arith.constant 0 : index
    %184 = vector.load %arg2[%c0_66, %c0_67] : memref<64x1xi32, #tpu.memory_space<vmem>>, vector<64x1xi32>
    %c0_68 = arith.constant 0 : index
    %c0_69 = arith.constant 0 : index
    %185 = vector.load %arg3[%c0_68, %c0_69] : memref<64x1xi32, #tpu.memory_space<vmem>>, vector<64x1xi32>
    %c-1_i32 = arith.constant -1 : i32
    %186 = vector.broadcast %c-1_i32 : i32 to vector<64x1xi32>
    %187 = arith.addi %184, %186 : vector<64x1xi32>
    %c0_i32_70 = arith.constant 0 : i32
    %188 = vector.broadcast %c0_i32_70 : i32 to vector<64x1xi32>
    %189 = arith.cmpi sge, %187, %188 : vector<64x1xi32>
    %c-1_i32_71 = arith.constant -1 : i32
    %190 = vector.broadcast %c-1_i32_71 : i32 to vector<64x1xi32>
    %191 = arith.addi %184, %190 : vector<64x1xi32>
    %c8_i32_72 = arith.constant 8 : i32
    %192 = vector.broadcast %c8_i32_72 : i32 to vector<64x1xi32>
    %193 = arith.cmpi slt, %191, %192 : vector<64x1xi32>
    %194 = arith.andi %189, %193 : vector<64x1xi1>
    %c0_i32_73 = arith.constant 0 : i32
    %195 = vector.broadcast %c0_i32_73 : i32 to vector<64x1xi32>
    %196 = arith.addi %184, %195 : vector<64x1xi32>
    %c0_i32_74 = arith.constant 0 : i32
    %197 = vector.broadcast %c0_i32_74 : i32 to vector<64x1xi32>
    %198 = arith.cmpi sge, %196, %197 : vector<64x1xi32>
    %c0_i32_75 = arith.constant 0 : i32
    %199 = vector.broadcast %c0_i32_75 : i32 to vector<64x1xi32>
    %200 = arith.addi %184, %199 : vector<64x1xi32>
    %c8_i32_76 = arith.constant 8 : i32
    %201 = vector.broadcast %c8_i32_76 : i32 to vector<64x1xi32>
    %202 = arith.cmpi slt, %200, %201 : vector<64x1xi32>
    %203 = arith.andi %198, %202 : vector<64x1xi1>
    %c1_i32 = arith.constant 1 : i32
    %204 = vector.broadcast %c1_i32 : i32 to vector<64x1xi32>
    %205 = arith.addi %184, %204 : vector<64x1xi32>
    %c0_i32_77 = arith.constant 0 : i32
    %206 = vector.broadcast %c0_i32_77 : i32 to vector<64x1xi32>
    %207 = arith.cmpi sge, %205, %206 : vector<64x1xi32>
    %c1_i32_78 = arith.constant 1 : i32
    %208 = vector.broadcast %c1_i32_78 : i32 to vector<64x1xi32>
    %209 = arith.addi %184, %208 : vector<64x1xi32>
    %c8_i32_79 = arith.constant 8 : i32
    %210 = vector.broadcast %c8_i32_79 : i32 to vector<64x1xi32>
    %211 = arith.cmpi slt, %209, %210 : vector<64x1xi32>
    %212 = arith.andi %207, %211 : vector<64x1xi1>
    %c-1_i32_80 = arith.constant -1 : i32
    %213 = vector.broadcast %c-1_i32_80 : i32 to vector<64x1xi32>
    %214 = arith.addi %185, %213 : vector<64x1xi32>
    %c0_i32_81 = arith.constant 0 : i32
    %215 = vector.broadcast %c0_i32_81 : i32 to vector<64x1xi32>
    %216 = arith.cmpi sge, %214, %215 : vector<64x1xi32>
    %c-1_i32_82 = arith.constant -1 : i32
    %217 = vector.broadcast %c-1_i32_82 : i32 to vector<64x1xi32>
    %218 = arith.addi %185, %217 : vector<64x1xi32>
    %c8_i32_83 = arith.constant 8 : i32
    %219 = vector.broadcast %c8_i32_83 : i32 to vector<64x1xi32>
    %220 = arith.cmpi slt, %218, %219 : vector<64x1xi32>
    %221 = arith.andi %216, %220 : vector<64x1xi1>
    %c0_i32_84 = arith.constant 0 : i32
    %222 = vector.broadcast %c0_i32_84 : i32 to vector<64x1xi32>
    %223 = arith.addi %185, %222 : vector<64x1xi32>
    %c0_i32_85 = arith.constant 0 : i32
    %224 = vector.broadcast %c0_i32_85 : i32 to vector<64x1xi32>
    %225 = arith.cmpi sge, %223, %224 : vector<64x1xi32>
    %c0_i32_86 = arith.constant 0 : i32
    %226 = vector.broadcast %c0_i32_86 : i32 to vector<64x1xi32>
    %227 = arith.addi %185, %226 : vector<64x1xi32>
    %c8_i32_87 = arith.constant 8 : i32
    %228 = vector.broadcast %c8_i32_87 : i32 to vector<64x1xi32>
    %229 = arith.cmpi slt, %227, %228 : vector<64x1xi32>
    %230 = arith.andi %225, %229 : vector<64x1xi1>
    %c1_i32_88 = arith.constant 1 : i32
    %231 = vector.broadcast %c1_i32_88 : i32 to vector<64x1xi32>
    %232 = arith.addi %185, %231 : vector<64x1xi32>
    %c0_i32_89 = arith.constant 0 : i32
    %233 = vector.broadcast %c0_i32_89 : i32 to vector<64x1xi32>
    %234 = arith.cmpi sge, %232, %233 : vector<64x1xi32>
    %c1_i32_90 = arith.constant 1 : i32
    %235 = vector.broadcast %c1_i32_90 : i32 to vector<64x1xi32>
    %236 = arith.addi %185, %235 : vector<64x1xi32>
    %c8_i32_91 = arith.constant 8 : i32
    %237 = vector.broadcast %c8_i32_91 : i32 to vector<64x1xi32>
    %238 = arith.cmpi slt, %236, %237 : vector<64x1xi32>
    %239 = arith.andi %234, %238 : vector<64x1xi1>
    %c0_92 = arith.constant 0 : index
    %c0_93 = arith.constant 0 : index
    %240 = vector.load %arg15[%c0_92, %c0_93] : memref<9x128xf32, #tpu.memory_space<vmem>>, vector<9x128xf32>
    %cst_94 = arith.constant 0.000000e+00 : f32
    %241 = vector.broadcast %cst_94 : f32 to vector<64x128xf32>
    %c9_i32 = arith.constant 9 : i32
    %242 = tpu.dynamic_rotate %183 by %c9_i32 dim 0 : vector<64x128xf32>, i32 -> vector<64x128xf32>
    %243 = arith.andi %194, %221 : vector<64x1xi1>
    %cst_95 = arith.constant 0.000000e+00 : f32
    %244 = vector.shape_cast %243 : vector<64x1xi1> to vector<64x1xi1>
    %245 = vector.broadcast %244 : vector<64x1xi1> to vector<64x128xi1>
    %246 = vector.broadcast %cst_95 : f32 to vector<64x128xf32>
    %247 = arith.select %245, %242, %246 : vector<64x128xi1>, vector<64x128xf32>
    %248 = vector.extract_strided_slice %240 {offsets = [0, 0], sizes = [1, 128], strides = [1, 1]} : vector<9x128xf32> to vector<1x128xf32>
    %249 = vector.broadcast %248 : vector<1x128xf32> to vector<64x128xf32>
    %250 = arith.mulf %247, %249 : vector<64x128xf32>
    %251 = arith.addf %241, %250 : vector<64x128xf32>
    %c8_i32_96 = arith.constant 8 : i32
    %252 = tpu.dynamic_rotate %183 by %c8_i32_96 dim 0 : vector<64x128xf32>, i32 -> vector<64x128xf32>
    %253 = arith.andi %194, %230 : vector<64x1xi1>
    %cst_97 = arith.constant 0.000000e+00 : f32
    %254 = vector.shape_cast %253 : vector<64x1xi1> to vector<64x1xi1>
    %255 = vector.broadcast %254 : vector<64x1xi1> to vector<64x128xi1>
    %256 = vector.broadcast %cst_97 : f32 to vector<64x128xf32>
    %257 = arith.select %255, %252, %256 : vector<64x128xi1>, vector<64x128xf32>
    %258 = vector.extract_strided_slice %240 {offsets = [1, 0], sizes = [1, 128], strides = [1, 1]} : vector<9x128xf32> to vector<1x128xf32>
    %259 = vector.broadcast %258 : vector<1x128xf32> to vector<64x128xf32>
    %260 = arith.mulf %257, %259 : vector<64x128xf32>
    %261 = arith.addf %251, %260 : vector<64x128xf32>
    %c7_i32 = arith.constant 7 : i32
    %262 = tpu.dynamic_rotate %183 by %c7_i32 dim 0 : vector<64x128xf32>, i32 -> vector<64x128xf32>
    %263 = arith.andi %194, %239 : vector<64x1xi1>
    %cst_98 = arith.constant 0.000000e+00 : f32
    %264 = vector.shape_cast %263 : vector<64x1xi1> to vector<64x1xi1>
    %265 = vector.broadcast %264 : vector<64x1xi1> to vector<64x128xi1>
    %266 = vector.broadcast %cst_98 : f32 to vector<64x128xf32>
    %267 = arith.select %265, %262, %266 : vector<64x128xi1>, vector<64x128xf32>
    %268 = vector.extract_strided_slice %240 {offsets = [2, 0], sizes = [1, 128], strides = [1, 1]} : vector<9x128xf32> to vector<1x128xf32>
    %269 = vector.broadcast %268 : vector<1x128xf32> to vector<64x128xf32>
    %270 = arith.mulf %267, %269 : vector<64x128xf32>
    %271 = arith.addf %261, %270 : vector<64x128xf32>
    %c1_i32_99 = arith.constant 1 : i32
    %272 = tpu.dynamic_rotate %183 by %c1_i32_99 dim 0 : vector<64x128xf32>, i32 -> vector<64x128xf32>
    %273 = arith.andi %203, %221 : vector<64x1xi1>
    %cst_100 = arith.constant 0.000000e+00 : f32
    %274 = vector.shape_cast %273 : vector<64x1xi1> to vector<64x1xi1>
    %275 = vector.broadcast %274 : vector<64x1xi1> to vector<64x128xi1>
    %276 = vector.broadcast %cst_100 : f32 to vector<64x128xf32>
    %277 = arith.select %275, %272, %276 : vector<64x128xi1>, vector<64x128xf32>
    %278 = vector.extract_strided_slice %240 {offsets = [3, 0], sizes = [1, 128], strides = [1, 1]} : vector<9x128xf32> to vector<1x128xf32>
    %279 = vector.broadcast %278 : vector<1x128xf32> to vector<64x128xf32>
    %280 = arith.mulf %277, %279 : vector<64x128xf32>
    %281 = arith.addf %271, %280 : vector<64x128xf32>
    %282 = arith.andi %203, %230 : vector<64x1xi1>
    %cst_101 = arith.constant 0.000000e+00 : f32
    %283 = vector.shape_cast %282 : vector<64x1xi1> to vector<64x1xi1>
    %284 = vector.broadcast %283 : vector<64x1xi1> to vector<64x128xi1>
    %285 = vector.broadcast %cst_101 : f32 to vector<64x128xf32>
    %286 = arith.select %284, %183, %285 : vector<64x128xi1>, vector<64x128xf32>
    %287 = vector.extract_strided_slice %240 {offsets = [4, 0], sizes = [1, 128], strides = [1, 1]} : vector<9x128xf32> to vector<1x128xf32>
    %288 = vector.broadcast %287 : vector<1x128xf32> to vector<64x128xf32>
    %289 = arith.mulf %286, %288 : vector<64x128xf32>
    %290 = arith.addf %281, %289 : vector<64x128xf32>
    %c63_i32 = arith.constant 63 : i32
    %291 = tpu.dynamic_rotate %183 by %c63_i32 dim 0 : vector<64x128xf32>, i32 -> vector<64x128xf32>
    %292 = arith.andi %203, %239 : vector<64x1xi1>
    %cst_102 = arith.constant 0.000000e+00 : f32
    %293 = vector.shape_cast %292 : vector<64x1xi1> to vector<64x1xi1>
    %294 = vector.broadcast %293 : vector<64x1xi1> to vector<64x128xi1>
    %295 = vector.broadcast %cst_102 : f32 to vector<64x128xf32>
    %296 = arith.select %294, %291, %295 : vector<64x128xi1>, vector<64x128xf32>
    %297 = vector.extract_strided_slice %240 {offsets = [5, 0], sizes = [1, 128], strides = [1, 1]} : vector<9x128xf32> to vector<1x128xf32>
    %298 = vector.broadcast %297 : vector<1x128xf32> to vector<64x128xf32>
    %299 = arith.mulf %296, %298 : vector<64x128xf32>
    %300 = arith.addf %290, %299 : vector<64x128xf32>
    %c57_i32 = arith.constant 57 : i32
    %301 = tpu.dynamic_rotate %183 by %c57_i32 dim 0 : vector<64x128xf32>, i32 -> vector<64x128xf32>
    %302 = arith.andi %212, %221 : vector<64x1xi1>
    %cst_103 = arith.constant 0.000000e+00 : f32
    %303 = vector.shape_cast %302 : vector<64x1xi1> to vector<64x1xi1>
    %304 = vector.broadcast %303 : vector<64x1xi1> to vector<64x128xi1>
    %305 = vector.broadcast %cst_103 : f32 to vector<64x128xf32>
    %306 = arith.select %304, %301, %305 : vector<64x128xi1>, vector<64x128xf32>
    %307 = vector.extract_strided_slice %240 {offsets = [6, 0], sizes = [1, 128], strides = [1, 1]} : vector<9x128xf32> to vector<1x128xf32>
    %308 = vector.broadcast %307 : vector<1x128xf32> to vector<64x128xf32>
    %309 = arith.mulf %306, %308 : vector<64x128xf32>
    %310 = arith.addf %300, %309 : vector<64x128xf32>
    %c56_i32 = arith.constant 56 : i32
    %311 = tpu.dynamic_rotate %183 by %c56_i32 dim 0 : vector<64x128xf32>, i32 -> vector<64x128xf32>
    %312 = arith.andi %212, %230 : vector<64x1xi1>
    %cst_104 = arith.constant 0.000000e+00 : f32
    %313 = vector.shape_cast %312 : vector<64x1xi1> to vector<64x1xi1>
    %314 = vector.broadcast %313 : vector<64x1xi1> to vector<64x128xi1>
    %315 = vector.broadcast %cst_104 : f32 to vector<64x128xf32>
    %316 = arith.select %314, %311, %315 : vector<64x128xi1>, vector<64x128xf32>
    %317 = vector.extract_strided_slice %240 {offsets = [7, 0], sizes = [1, 128], strides = [1, 1]} : vector<9x128xf32> to vector<1x128xf32>
    %318 = vector.broadcast %317 : vector<1x128xf32> to vector<64x128xf32>
    %319 = arith.mulf %316, %318 : vector<64x128xf32>
    %320 = arith.addf %310, %319 : vector<64x128xf32>
    %c55_i32 = arith.constant 55 : i32
    %321 = tpu.dynamic_rotate %183 by %c55_i32 dim 0 : vector<64x128xf32>, i32 -> vector<64x128xf32>
    %322 = arith.andi %212, %239 : vector<64x1xi1>
    %cst_105 = arith.constant 0.000000e+00 : f32
    %323 = vector.shape_cast %322 : vector<64x1xi1> to vector<64x1xi1>
    %324 = vector.broadcast %323 : vector<64x1xi1> to vector<64x128xi1>
    %325 = vector.broadcast %cst_105 : f32 to vector<64x128xf32>
    %326 = arith.select %324, %321, %325 : vector<64x128xi1>, vector<64x128xf32>
    %327 = vector.extract_strided_slice %240 {offsets = [8, 0], sizes = [1, 128], strides = [1, 1]} : vector<9x128xf32> to vector<1x128xf32>
    %328 = vector.broadcast %327 : vector<1x128xf32> to vector<64x128xf32>
    %329 = arith.mulf %326, %328 : vector<64x128xf32>
    %330 = arith.addf %320, %329 : vector<64x128xf32>
    %c0_106 = arith.constant 0 : index
    %c0_107 = arith.constant 0 : index
    %331 = vector.load %arg16[%c0_106, %c0_107] : memref<1x128xf32, #tpu.memory_space<vmem>>, vector<1x128xf32>
    %332 = vector.broadcast %331 : vector<1x128xf32> to vector<64x128xf32>
    %333 = arith.addf %330, %332 : vector<64x128xf32>
    %cst_108 = arith.constant 5.000000e-01 : f32
    %334 = vector.broadcast %cst_108 : f32 to vector<64x128xf32>
    %335 = arith.mulf %334, %333 : vector<64x128xf32>
    %336 = arith.mulf %333, %333 : vector<64x128xf32>
    %337 = arith.mulf %336, %333 : vector<64x128xf32>
    %cst_109 = arith.constant 4.471500e-02 : f32
    %338 = vector.broadcast %cst_109 : f32 to vector<64x128xf32>
    %339 = arith.mulf %338, %337 : vector<64x128xf32>
    %340 = arith.addf %333, %339 : vector<64x128xf32>
    %cst_110 = arith.constant 0.797884583 : f32
    %341 = vector.broadcast %cst_110 : f32 to vector<64x128xf32>
    %342 = arith.mulf %341, %340 : vector<64x128xf32>
    %343 = math.tanh %342 : vector<64x128xf32>
    %cst_111 = arith.constant 1.000000e+00 : f32
    %344 = vector.broadcast %cst_111 : f32 to vector<64x128xf32>
    %345 = arith.addf %344, %343 : vector<64x128xf32>
    %346 = arith.mulf %335, %345 : vector<64x128xf32>
    %347 = arith.truncf %346 : vector<64x128xf32> to vector<64x128xbf16>
    %c0_112 = arith.constant 0 : index
    %c0_113 = arith.constant 0 : index
    %348 = vector.load %arg17[%c0_112, %c0_113] : memref<128x32xbf16, #tpu.memory_space<vmem>>, vector<128x32xbf16>
    %cst_114 = arith.constant dense<0.000000e+00> : vector<64x32xf32>
    %349 = tpu.matmul %347, %348, %cst_114 {dimension_numbers = #tpu.dot_dimension_numbers<[1], [0], [0], [1], [0, 0, 1, 1], [], []>} : vector<64x128xbf16>, vector<128x32xbf16>, vector<64x32xf32> -> vector<64x32xf32>
    %c0_115 = arith.constant 0 : index
    %c0_116 = arith.constant 0 : index
    %350 = vector.load %arg18[%c0_115, %c0_116] : memref<1x32xf32, #tpu.memory_space<vmem>>, vector<1x32xf32>
    %351 = vector.broadcast %350 : vector<1x32xf32> to vector<64x32xf32>
    %352 = arith.addf %349, %351 : vector<64x32xf32>
    %353 = arith.addf %153, %352 : vector<64x32xf32>
    %c0_117 = arith.constant 0 : index
    %c0_118 = arith.constant 0 : index
    %354 = vector.load %arg19[%c0_117, %c0_118] : memref<64x32xf32, #tpu.memory_space<vmem>>, vector<64x32xf32>
    tpu.vector_store %arg19[%c0_117, %c0_118], %353 {strides = array<i32>} : memref<64x32xf32, #tpu.memory_space<vmem>>, vector<64x32xf32>,
    return
  }
  func.func @transform_0(%arg0: i32) -> (i32, i32) {
    %c0_i32 = arith.constant 0 : i32
    %c0_i32_0 = arith.constant 0 : i32
    return %arg0, %c0_i32 : i32, i32
  }
  func.func @transform_1(%arg0: i32) -> (i32, i32) {
    %c0_i32 = arith.constant 0 : i32
    %c0_i32_0 = arith.constant 0 : i32
    %c0_i32_1 = arith.constant 0 : i32
    return %c0_i32, %c0_i32_0 : i32, i32
  }
  func.func @transform_2(%arg0: i32) -> (i32, i32) {
    %c0_i32 = arith.constant 0 : i32
    %c0_i32_0 = arith.constant 0 : i32
    %c0_i32_1 = arith.constant 0 : i32
    return %c0_i32, %c0_i32_0 : i32, i32
  }
  func.func @transform_3(%arg0: i32) -> (i32, i32) {
    %c0_i32 = arith.constant 0 : i32
    %c0_i32_0 = arith.constant 0 : i32
    %c0_i32_1 = arith.constant 0 : i32
    return %c0_i32, %c0_i32_0 : i32, i32
  }
  func.func @transform_4(%arg0: i32) -> (i32, i32) {
    %c0_i32 = arith.constant 0 : i32
    %c0_i32_0 = arith.constant 0 : i32
    %c0_i32_1 = arith.constant 0 : i32
    return %c0_i32, %c0_i32_0 : i32, i32
  }
  func.func @transform_5(%arg0: i32) -> (i32, i32) {
    %c0_i32 = arith.constant 0 : i32
    %c0_i32_0 = arith.constant 0 : i32
    %c0_i32_1 = arith.constant 0 : i32
    return %c0_i32, %c0_i32_0 : i32, i32
  }
  func.func @transform_6(%arg0: i32) -> (i32, i32) {
    %c0_i32 = arith.constant 0 : i32
    %c0_i32_0 = arith.constant 0 : i32
    %c0_i32_1 = arith.constant 0 : i32
    return %c0_i32, %c0_i32_0 : i32, i32
  }
  func.func @transform_7(%arg0: i32) -> (i32, i32) {
    %c0_i32 = arith.constant 0 : i32
    %c0_i32_0 = arith.constant 0 : i32
    %c0_i32_1 = arith.constant 0 : i32
    return %c0_i32, %c0_i32_0 : i32, i32
  }
  func.func @transform_8(%arg0: i32) -> (i32, i32) {
    %c0_i32 = arith.constant 0 : i32
    %c0_i32_0 = arith.constant 0 : i32
    %c0_i32_1 = arith.constant 0 : i32
    return %c0_i32, %c0_i32_0 : i32, i32
  }
  func.func @transform_9(%arg0: i32) -> (i32, i32) {
    %c0_i32 = arith.constant 0 : i32
    %c0_i32_0 = arith.constant 0 : i32
    %c0_i32_1 = arith.constant 0 : i32
    return %c0_i32, %c0_i32_0 : i32, i32
  }
  func.func @transform_10(%arg0: i32) -> (i32, i32) {
    %c0_i32 = arith.constant 0 : i32
    %c0_i32_0 = arith.constant 0 : i32
    %c0_i32_1 = arith.constant 0 : i32
    return %c0_i32, %c0_i32_0 : i32, i32
  }
  func.func @transform_11(%arg0: i32) -> (i32, i32) {
    %c0_i32 = arith.constant 0 : i32
    %c0_i32_0 = arith.constant 0 : i32
    %c0_i32_1 = arith.constant 0 : i32
    return %c0_i32, %c0_i32_0 : i32, i32
  }
  func.func @transform_12(%arg0: i32) -> (i32, i32) {
    %c0_i32 = arith.constant 0 : i32
    %c0_i32_0 = arith.constant 0 : i32
    %c0_i32_1 = arith.constant 0 : i32
    return %c0_i32, %c0_i32_0 : i32, i32
  }
  func.func @transform_13(%arg0: i32) -> (i32, i32) {
    %c0_i32 = arith.constant 0 : i32
    %c0_i32_0 = arith.constant 0 : i32
    %c0_i32_1 = arith.constant 0 : i32
    return %c0_i32, %c0_i32_0 : i32, i32
  }
  func.func @transform_14(%arg0: i32) -> (i32, i32) {
    %c0_i32 = arith.constant 0 : i32
    %c0_i32_0 = arith.constant 0 : i32
    %c0_i32_1 = arith.constant 0 : i32
    return %c0_i32, %c0_i32_0 : i32, i32
  }
  func.func @transform_15(%arg0: i32) -> (i32, i32) {
    %c0_i32 = arith.constant 0 : i32
    %c0_i32_0 = arith.constant 0 : i32
    %c0_i32_1 = arith.constant 0 : i32
    return %c0_i32, %c0_i32_0 : i32, i32
  }
  func.func @transform_16(%arg0: i32) -> (i32, i32) {
    %c0_i32 = arith.constant 0 : i32
    %c0_i32_0 = arith.constant 0 : i32
    %c0_i32_1 = arith.constant 0 : i32
    return %c0_i32, %c0_i32_0 : i32, i32
  }
  func.func @transform_17(%arg0: i32) -> (i32, i32) {
    %c0_i32 = arith.constant 0 : i32
    %c0_i32_0 = arith.constant 0 : i32
    %c0_i32_1 = arith.constant 0 : i32
    return %c0_i32, %c0_i32_0 : i32, i32
  }
  func.func @transform_18(%arg0: i32) -> (i32, i32) {
    %c0_i32 = arith.constant 0 : i32
    %c0_i32_0 = arith.constant 0 : i32
    return %arg0, %c0_i32 : i32, i32
  }
}

</mosaic_0001>

<bundles_post_ra>
// kernel: block_forward.1
= control target key start
LH: loop header
LB: loop body
LE: loop exit
PB: predicated region body
PF: predicated region fallthrough
CT: control target
= control target key end

     0   :  { %s8658_s0 = inlined_call_operand.hbm [shape: f32[128,32], index: 0, kind: input, shape index: {}, may-alias: {0,18}]   ;;  %s8659_s1 = inlined_call_operand.hbm [shape: s32[64,1], index: 1, kind: input, shape index: {}]   ;;  %s8660_s2 = inlined_call_operand.hbm [shape: s32[64,1], index: 2, kind: input, shape index: {}]   ;;  %s8661_s3 = inlined_call_operand.hbm [shape: f32[1,32], index: 3, kind: input, shape index: {}]   ;;  %s8662_s4 = inlined_call_operand.hbm [shape: f32[1,32], index: 4, kind: input, shape index: {}]   ;;  %s8663_s5 = inlined_call_operand.hbm [shape: bf16[32,32], index: 5, kind: input, shape index: {}]   ;;  %s8664_s6 = inlined_call_operand.hbm [shape: bf16[32,32], index: 6, kind: input, shape index: {}]   ;;  %s8665_s7 = inlined_call_operand.hbm [shape: bf16[32,32], index: 7, kind: input, shape index: {}]   ;;  %s8666_s8 = inlined_call_operand.hbm [shape: bf16[32,32], index: 8, kind: input, shape index: {}]   ;;  %s8667_s9 = inlined_call_operand.hbm [shape: f32[1,32], index: 9, kind: input, shape index: {}]   ;;  %s8668_s10 = inlined_call_operand.hbm [shape: f32[1,32], index: 10, kind: input, shape index: {}]   ;;  %s8669_s11 = inlined_call_operand.hbm [shape: f32[1,32], index: 11, kind: input, shape index: {}]   ;;  %s8670_s12 = inlined_call_operand.hbm [shape: bf16[32,128], index: 12, kind: input, shape index: {}]   ;;  %s8671_s13 = inlined_call_operand.hbm [shape: f32[1,128], index: 13, kind: input, shape index: {}]   ;;  %s8672_s14 = inlined_call_operand.hbm [shape: f32[9,128], index: 14, kind: input, shape index: {}]   ;;  %s8673_s15 = inlined_call_operand.hbm [shape: f32[1,128], index: 15, kind: input, shape index: {}]   ;;  %s8674_s16 = inlined_call_operand.hbm [shape: bf16[128,32], index: 16, kind: input, shape index: {}]   ;;  %s8675_s17 = inlined_call_operand.hbm [shape: f32[1,32], index: 17, kind: input, shape index: {}]   ;;  %s8676_s18 = inlined_call_operand.hbm [shape: f32[128,32], index: 18, kind: output, shape index: {}, may-alias: {0,18}]  }
   0x1   :  { %8806 = sst [smem:[#allocation91_spill]] %s8658_s0 }
   0x2   :  { %8807 = sst [smem:[#allocation92_spill]] %s8659_s1 }
   0x3   :  { %8808 = sst [smem:[#allocation93_spill]] %s8660_s2 }
   0x4   :  { %8809 = sst [smem:[#allocation94_spill]] %s8661_s3 }
   0x5   :  { %8810 = sst [smem:[#allocation95_spill]] %s8662_s4 }
   0x6   :  { %8811 = sst [smem:[#allocation96_spill]] %s8663_s5 }
   0x7   :  { %8812 = sst [smem:[#allocation97_spill]] %s8675_s17 }
   0x8   :  { %8813 = sst [smem:[#allocation98_spill]] %s8676_s18 }
   0x9   :  { %23 = vsyncpa [#allocation3], 0 }
   0xa   :  { %25 = vsyncpa [#allocation3 + $0x1], 0 }
   0xb   :  { %26 = vsyncpa [#allocation6], 0 }
   0xc   :  { %27 = vsyncpa [#allocation9], 0 }
   0xd   :  { %28 = vsyncpa [#allocation12], 0 }
   0xe   :  { %29 = vsyncpa [#allocation15], 0 }
   0xf   :  { %30 = vsyncpa [#allocation18], 0 }
  0x10   :  { %31 = vsyncpa [#allocation21], 0 }
  0x11   :  { %32 = vsyncpa [#allocation24], 0 }
  0x12   :  { %33 = vsyncpa [#allocation27], 0 }
  0x13   :  { %34 = vsyncpa [#allocation30], 0 }
  0x14   :  { %35 = vsyncpa [#allocation4], 0 }
  0x15   :  { %37 = vsyncpa [#allocation4 + $0x1], 0  ;;  %s5786_s27 = smov 0   ;;  %s5788_s28 = smov 0  }
  0x16   :  { %s5790_s29 = smov 0   ;;  %s5792_s30 = smov 0  }
  0x17 LB: > { %8814 = sst [smem:[#allocation43_spill]] %s5651_s27  ;;  %s5665_s0 = smov [#allocation5]   ;;  %s5663_s30 = sphi %s5792_s30, %s6188_s30   ;;  %s5659_s29 = sphi %s5790_s29, %s9174_s29   ;;  %s5655_s28 = sphi %s5788_s28, %s9173_s28   ;;  %s5651_s27 = sphi %s5786_s27, %s9172_s27  }
  0x18   : > { %8815 = sst [smem:[#allocation44_spill]] %s5655_s28  ;;  %s469_s19 = sshll.u32 %s5665_s0, 4  ;;  %s5812_s19 = int_to_ptr.vmem [resolvable:$true] %s469_s19 }
  0x19   : > { %8816 = sst [smem:[#allocation45_spill]] %s5659_s29  ;;  %s5807_s1 = sadd.s32 4294967295, %s5663_s30  }
  0x1a   : > { %8817 = sst [smem:[#allocation46_spill]] %s5663_s30  ;;  %p4113_p0 = scmp.ge.s32.totalorder %s5663_s30, 1 }
  0x1b   : > { %8818 = sst [smem:[#allocation47_spill]] %s5807_s1  ;;  %p8695_p1 = scmp.eq.s32.totalorder %s5807_s1, 0 }
  0x1c   : > { %p457_p2 = scmp.lt.s32.totalorder %s5663_s30, 3  ;;  %s5666_s21 = smov [#allocation8]  }
  0x1d   : > { %s496_s22 = sshll.u32 %s5666_s21, 4  ;;  %s5667_s23 = smov [#allocation11]   ;;  %s5827_s22 = int_to_ptr.vmem [resolvable:$true] %s496_s22 }
  0x1e   : > { %p5814_p3 = pnand %p4113_p0, %p457_p2  ;;  %s517_s24 = sshll.u32 %s5667_s23, 4  ;;  %s5829_s24 = int_to_ptr.vmem [resolvable:$true] %s517_s24 }
  0x1f   : > { %s8822_s0 = sld [smem:[#allocation92_spill]] }
  0x20   : > { %s8819_s20 = scalar_select %p5814_p3, 1, 0 }
  0x21   : > { %p4699_p5 = pneg %p5814_p3 }
  0x22   : > { %8820 = sst [smem:[#allocation48_spill]] %s8819_s20 }
  0x23   : > { %p5823_p6 = pnand %p4699_p5, %p8695_p1 }
  0x25   : > { %s5055_s18 = scalar_lea.hbm %s8822_s0, 1024  ;;  %p5839_p8 = pneg %p5823_p6 }
  0x26   : > { %p5056_p7 = scmp.ne.s32.totalorder %s8822_s0, %s5055_s18  ;;  %p5062_p11 = scmp.lt.u32.totalorder %s5055_s18, %s8822_s0 }
  0x28   : > { %p5058_p9 = pnand %p5839_p8, %p5056_p7 }
  0x2a   : > { %p5059_p10 = pneg %p5058_p9 }
  0x2c   : > { %p5064_p12 = pnand %p5062_p11, %p5059_p10 }
  0x2e   : > { %5067 = shalt.err (!%p5064_p12)
}
  0x2f   : > { %s5068_s27 = scalar_lea.vmem %s5812_s19, 1024  ;;  %p5076_p5 = scmp.lt.s32.totalorder %s5812_s19, %s5812_s19 }
  0x30   : > { %p5069_p13 = scmp.ne.s32.totalorder %s5812_s19, %s5068_s27  ;;  %p5077_p4 = scmp.lt.s32.totalorder %s5068_s27, %s5068_s27 }
  0x32   : > { %p5071_p0 = pnand %p5069_p13, %p5839_p8  ;;  %p5078_p7 = por %p5077_p4, %p5076_p5 }
  0x34   : > { %p5072_p2 = pneg %p5071_p0 }
  0x36   : > { %p5079_p9 = pnand %p5078_p7, %p5072_p2 }
  0x38   : > { %5082 = shalt.err (!%p5079_p9)
}
  0x39   : > { %s8690_s20 = smov 128   ;;  %s8692_s18 = smov 8  }
  0x3a   : > { %4702 = dma.hbm_to_vmem [thread:$0]  (!%p5823_p6), %s8822_s0, 1024, %s5812_s19, [#allocation6], %s8690_s20, %s8690_s20, %s8692_s18  }
  0x3b   : > { %s8824_s3 = sld [smem:[#allocation94_spill]] }
  0x41   : > { %s5083_s27 = scalar_lea.hbm %s8824_s3, 16 }
  0x42   : > { %p5084_p4 = scmp.ne.s32.totalorder %s8824_s3, %s5083_s27  ;;  %p5090_p12 = scmp.lt.u32.totalorder %s5083_s27, %s8824_s3 }
  0x44   : > { %p5086_p10 = pnand %p5084_p4, %p5839_p8 }
  0x46   : > { %p5087_p11 = pneg %p5086_p10 }
  0x48   : > { %p5092_p13 = pnand %p5090_p12, %p5087_p11 }
  0x4a   : > { %5095 = shalt.err (!%p5092_p13)
}
  0x4b   : > { %s5096_s19 = scalar_lea.vmem %s5827_s22, 16  ;;  %s5103_s28 = scalar_lea.vmem %s5827_s22, 32 }
  0x4c   : > { %p5097_p0 = scmp.ne.s32.totalorder %s5827_s22, %s5096_s19  ;;  %p5104_p7 = scmp.lt.s32.totalorder %s5827_s22, %s5827_s22 }
  0x4d   : > { %p5105_p9 = scmp.lt.s32.totalorder %s5103_s28, %s5096_s19 }
  0x4e   : > { %p5099_p2 = pnand %p5097_p0, %p5839_p8 }
  0x4f   : > { %p5106_p4 = por %p5105_p9, %p5104_p7 }
  0x50   : > { %p5100_p5 = pneg %p5099_p2 }
  0x52   : > { %p5107_p10 = pnand %p5106_p4, %p5100_p5 }
  0x54   : > { %5110 = shalt.err (!%p5107_p10)
}
  0x55   : > { %4708 = dma.hbm_to_vmem [thread:$0]  (!%p5823_p6), %s8824_s3, 16, %s5827_s22, [#allocation9]  }
  0x56   : > { %s8825_s5 = sld [smem:[#allocation96_spill]] }
  0x5c   : > { %s5111_s25 = scalar_lea.hbm %s8825_s5, 256 }
  0x5d   : > { %p5112_p11 = scmp.ne.s32.totalorder %s8825_s5, %s5111_s25  ;;  %p5118_p0 = scmp.lt.u32.totalorder %s5111_s25, %s8825_s5 }
  0x5f   : > { %p5114_p12 = pnand %p5112_p11, %p5839_p8 }
  0x61   : > { %p5115_p13 = pneg %p5114_p12 }
  0x63   : > { %p5120_p2 = pnand %p5118_p0, %p5115_p13 }
  0x65   : > { %5123 = shalt.err (!%p5120_p2)
}
  0x66   : > { %s5124_s22 = scalar_lea.vmem %s5829_s24, 256  ;;  %p5132_p4 = scmp.lt.s32.totalorder %s5829_s24, %s5829_s24 }
  0x67   : > { %p5125_p5 = scmp.ne.s32.totalorder %s5829_s24, %s5124_s22  ;;  %p5133_p10 = scmp.lt.s32.totalorder %s5124_s22, %s5124_s22 }
  0x69   : > { %p5127_p7 = pnand %p5125_p5, %p5839_p8  ;;  %p5134_p11 = por %p5133_p10, %p5132_p4 }
  0x6b   : > { %p5128_p9 = pneg %p5127_p7 }
  0x6d   : > { %p5135_p12 = pnand %p5134_p11, %p5128_p9 }
  0x6f   : > { %5138 = shalt.err (!%p5135_p12)
}
  0x70   : > { %s8697_s28 = smov 64   ;;  %s8699_s17 = smov 4  }
  0x71   : > { %4714 = dma.hbm_to_vmem [thread:$0]  (!%p5823_p6), %s8825_s5, 256, %s5829_s24, [#allocation12], %s8697_s28, %s8697_s28, %s8699_s17  }
  0x72   : > { %s5672_s1 = smov [#allocation14]   ;;  %s5673_s26 = smov [#allocation17]  }
  0x73   : > { %s543_s25 = sshll.u32 %s5672_s1, 4  ;;  %s570_s23 = sshll.u32 %s5673_s26, 4  ;;  %s544_s25 = int_to_ptr.vmem [resolvable:$true] %s543_s25  ;;  %s571_s23 = int_to_ptr.vmem [resolvable:$true] %s570_s23 }
  0x74   : > { %s5139_s22 = scalar_lea.hbm %s8665_s7, 256 }
  0x75   : > { %p5140_p13 = scmp.ne.s32.totalorder %s8665_s7, %s5139_s22  ;;  %p5146_p5 = scmp.lt.u32.totalorder %s5139_s22, %s8665_s7 }
  0x77   : > { %p5142_p0 = pnand %p5140_p13, %p5839_p8 }
  0x79   : > { %p5143_p2 = pneg %p5142_p0 }
  0x7b   : > { %p5148_p7 = pnand %p5146_p5, %p5143_p2 }
  0x7d   : > { %5151 = shalt.err (!%p5148_p7)
}
  0x7e   : > { %s5152_s24 = scalar_lea.vmem %s544_s25, 256  ;;  %p5160_p11 = scmp.lt.s32.totalorder %s544_s25, %s544_s25 }
  0x7f   : > { %p5153_p9 = scmp.ne.s32.totalorder %s544_s25, %s5152_s24  ;;  %p5161_p12 = scmp.lt.s32.totalorder %s5152_s24, %s5152_s24 }
  0x81   : > { %p5155_p4 = pnand %p5153_p9, %p5839_p8  ;;  %p5162_p1 = por %p5161_p12, %p5160_p11 }
  0x83   : > { %p5156_p10 = pneg %p5155_p4 }
  0x85   : > { %p5163_p3 = pnand %p5162_p1, %p5156_p10 }
  0x87   : > { %5166 = shalt.err (!%p5163_p3)
}
  0x88   : > { %4720 = dma.hbm_to_vmem [thread:$0]  (!%p5823_p6), %s8665_s7, 256, %s544_s25, [#allocation15], %s8697_s28, %s8697_s28, %s8699_s17  }
  0x89   : > { %s5167_s29 = scalar_lea.hbm %s8667_s9, 16 }
  0x8a   : > { %p5168_p1 = scmp.ne.s32.totalorder %s8667_s9, %s5167_s29  ;;  %p5174_p0 = scmp.lt.u32.totalorder %s5167_s29, %s8667_s9 }
  0x8c   : > { %p5170_p3 = pnand %p5168_p1, %p5839_p8 }
  0x8e   : > { %p5171_p13 = pneg %p5170_p3 }
  0x90   : > { %p5176_p2 = pnand %p5174_p0, %p5171_p13 }
  0x92   : > { %5179 = shalt.err (!%p5176_p2)
}
  0x93   : > { %s5180_s19 = scalar_lea.vmem %s571_s23, 16  ;;  %s5187_s25 = scalar_lea.vmem %s571_s23, 32 }
  0x94   : > { %p5181_p5 = scmp.ne.s32.totalorder %s571_s23, %s5180_s19  ;;  %p5188_p4 = scmp.lt.s32.totalorder %s571_s23, %s571_s23 }
  0x95   : > { %p5189_p10 = scmp.lt.s32.totalorder %s5187_s25, %s5180_s19 }
  0x96   : > { %p5183_p7 = pnand %p5181_p5, %p5839_p8 }
  0x97   : > { %p5190_p11 = por %p5189_p10, %p5188_p4 }
  0x98   : > { %p5184_p9 = pneg %p5183_p7 }
  0x9a   : > { %p5191_p12 = pnand %p5190_p11, %p5184_p9 }
  0x9c   : > { %5194 = shalt.err (!%p5191_p12)
}
  0x9d   : > { %4726 = dma.hbm_to_vmem [thread:$0]  (!%p5823_p6), %s8667_s9, 16, %s571_s23, [#allocation18]  }
  0x9e   : > { %s5674_s3 = smov [#allocation20]   ;;  %s5675_s20 = smov [#allocation23]  }
  0x9f   : > { %s592_s0 = sshll.u32 %s5674_s3, 4  ;;  %s616_s18 = sshll.u32 %s5675_s20, 4  ;;  %s593_s0 = int_to_ptr.vmem [resolvable:$true] %s592_s0  ;;  %s617_s18 = int_to_ptr.vmem [resolvable:$true] %s616_s18 }
  0xa0   : > { %s5195_s1 = scalar_lea.hbm %s8669_s11, 16 }
  0xa1   : > { %p5196_p1 = scmp.ne.s32.totalorder %s8669_s11, %s5195_s1  ;;  %p5202_p0 = scmp.lt.u32.totalorder %s5195_s1, %s8669_s11 }
  0xa3   : > { %p5198_p3 = pnand %p5196_p1, %p5839_p8 }
  0xa5   : > { %p5199_p13 = pneg %p5198_p3 }
  0xa7   : > { %p5204_p2 = pnand %p5202_p0, %p5199_p13 }
  0xa9   : > { %5207 = shalt.err (!%p5204_p2)
}
  0xaa   : > { %s5208_s23 = scalar_lea.vmem %s593_s0, 16  ;;  %s5215_s22 = scalar_lea.vmem %s593_s0, 32 }
  0xab   : > { %p5209_p5 = scmp.ne.s32.totalorder %s593_s0, %s5208_s23  ;;  %p5216_p4 = scmp.lt.s32.totalorder %s593_s0, %s593_s0 }
  0xac   : > { %p5217_p10 = scmp.lt.s32.totalorder %s5215_s22, %s5208_s23 }
  0xad   : > { %p5211_p7 = pnand %p5209_p5, %p5839_p8 }
  0xae   : > { %p5218_p11 = por %p5217_p10, %p5216_p4 }
  0xaf   : > { %p5212_p9 = pneg %p5211_p7 }
  0xb1   : > { %p5219_p12 = pnand %p5218_p11, %p5212_p9 }
  0xb3   : > { %5222 = shalt.err (!%p5219_p12)
}
  0xb4   : > { %4732 = dma.hbm_to_vmem [thread:$0]  (!%p5823_p6), %s8669_s11, 16, %s593_s0, [#allocation21]  }
  0xb5   : > { %s5223_s30 = scalar_lea.hbm %s8671_s13, 16 }
  0xb6   : > { %p5224_p1 = scmp.ne.s32.totalorder %s8671_s13, %s5223_s30  ;;  %p5230_p0 = scmp.lt.u32.totalorder %s5223_s30, %s8671_s13 }
  0xb8   : > { %p5226_p3 = pnand %p5224_p1, %p5839_p8 }
  0xba   : > { %p5227_p13 = pneg %p5226_p3 }
  0xbc   : > { %p5232_p2 = pnand %p5230_p0, %p5227_p13 }
  0xbe   : > { %5235 = shalt.err (!%p5232_p2)
}
  0xbf   : > { %s5236_s25 = scalar_lea.vmem %s617_s18, 16  ;;  %s5243_s0 = scalar_lea.vmem %s617_s18, 32 }
  0xc0   : > { %p5237_p5 = scmp.ne.s32.totalorder %s617_s18, %s5236_s25  ;;  %p5244_p4 = scmp.lt.s32.totalorder %s617_s18, %s617_s18 }
  0xc1   : > { %p5245_p10 = scmp.lt.s32.totalorder %s5243_s0, %s5236_s25 }
  0xc2   : > { %p5239_p7 = pnand %p5237_p5, %p5839_p8 }
  0xc3   : > { %p5246_p11 = por %p5245_p10, %p5244_p4 }
  0xc4   : > { %p5240_p9 = pneg %p5239_p7 }
  0xc6   : > { %p5247_p12 = pnand %p5246_p11, %p5240_p9 }
  0xc8   : > { %5250 = shalt.err (!%p5247_p12)
}
  0xc9   : > { %4738 = dma.hbm_to_vmem [thread:$0]  (!%p5823_p6), %s8671_s13, 16, %s617_s18, [#allocation24]  }
  0xca   : > { %s5676_s24 = smov [#allocation26]   ;;  %s5677_s20 = smov [#allocation7]  }
  0xcb   : > { %s640_s3 = sshll.u32 %s5676_s24, 4  ;;  %s482_s29 = sshll.u32 %s5677_s20, 4  ;;  %s641_s3 = int_to_ptr.vmem [resolvable:$true] %s640_s3  ;;  %s483_s29 = int_to_ptr.vmem [resolvable:$true] %s482_s29 }
  0xcc   : > { %s5251_s26 = scalar_lea.hbm %s8673_s15, 16 }
  0xcd   : > { %p5252_p1 = scmp.ne.s32.totalorder %s8673_s15, %s5251_s26  ;;  %p5258_p0 = scmp.lt.u32.totalorder %s5251_s26, %s8673_s15 }
  0xcf   : > { %p5254_p3 = pnand %p5252_p1, %p5839_p8 }
  0xd1   : > { %p5255_p13 = pneg %p5254_p3 }
  0xd3   : > { %p5260_p2 = pnand %p5258_p0, %p5255_p13 }
  0xd5   : > { %5263 = shalt.err (!%p5260_p2)
}
  0xd6   : > { %s5264_s18 = scalar_lea.vmem %s641_s3, 16  ;;  %s5271_s23 = scalar_lea.vmem %s641_s3, 32 }
  0xd7   : > { %p5265_p5 = scmp.ne.s32.totalorder %s641_s3, %s5264_s18  ;;  %p5272_p4 = scmp.lt.s32.totalorder %s641_s3, %s641_s3 }
  0xd8   : > { %p5273_p10 = scmp.lt.s32.totalorder %s5271_s23, %s5264_s18 }
  0xd9   : > { %p5267_p7 = pnand %p5265_p5, %p5839_p8 }
  0xda   : > { %p5274_p11 = por %p5273_p10, %p5272_p4 }
  0xdb   : > { %p5268_p9 = pneg %p5267_p7 }
  0xdd   : > { %p5275_p12 = pnand %p5274_p11, %p5268_p9 }
  0xdf   : > { %5278 = shalt.err (!%p5275_p12)
}
  0xe0   : > { %4744 = dma.hbm_to_vmem [thread:$0]  (!%p5823_p6), %s8673_s15, 16, %s641_s3, [#allocation27]  }
  0xe1   : > { %s8826_s1 = sld [smem:[#allocation93_spill]] }
  0xe7   : > { %s5279_s26 = scalar_lea.hbm %s8826_s1, 1024 }
  0xe8   : > { %p5280_p1 = scmp.ne.s32.totalorder %s8826_s1, %s5279_s26  ;;  %p5286_p0 = scmp.lt.u32.totalorder %s5279_s26, %s8826_s1 }
  0xea   : > { %p5282_p3 = pnand %p5280_p1, %p5839_p8 }
  0xec   : > { %p5283_p13 = pneg %p5282_p3 }
  0xee   : > { %p5288_p2 = pnand %p5286_p0, %p5283_p13 }
  0xf0   : > { %5291 = shalt.err (!%p5288_p2)
}
  0xf1   : > { %s5292_s18 = scalar_lea.vmem %s483_s29, 1024  ;;  %p5300_p4 = scmp.lt.s32.totalorder %s483_s29, %s483_s29 }
  0xf2   : > { %p5293_p5 = scmp.ne.s32.totalorder %s483_s29, %s5292_s18  ;;  %p5301_p10 = scmp.lt.s32.totalorder %s5292_s18, %s5292_s18 }
  0xf4   : > { %p5295_p7 = pnand %p5293_p5, %p5839_p8  ;;  %p5302_p11 = por %p5301_p10, %p5300_p4 }
  0xf6   : > { %p5296_p9 = pneg %p5295_p7 }
  0xf8   : > { %p5303_p12 = pnand %p5302_p11, %p5296_p9 }
  0xfa   : > { %5306 = shalt.err (!%p5303_p12)
}
  0xfb   : > { %s8827_s3 = smov 8   ;;  %s8828_s23 = smov 128  }
  0xfc   : > { %4705 = dma.hbm_to_vmem [thread:$0]  (!%p5823_p6), %s8826_s1, 1024, %s483_s29, [#allocation6], %s8828_s23, %s8828_s23, %s8827_s3  }
  0xfd   : > { %s5678_s20 = smov [#allocation10]   ;;  %s5679_s26 = smov [#allocation13]  }
  0xfe   : > { %s507_s30 = sshll.u32 %s5678_s20, 4  ;;  %s530_s27 = sshll.u32 %s5679_s26, 4  ;;  %s508_s30 = int_to_ptr.vmem [resolvable:$true] %s507_s30  ;;  %s531_s27 = int_to_ptr.vmem [resolvable:$true] %s530_s27 }
  0xff   : > { %s8829_s4 = sld [smem:[#allocation95_spill]] }
 0x105   : > { %s5307_s0 = scalar_lea.hbm %s8829_s4, 16 }
 0x106   : > { %p5308_p1 = scmp.ne.s32.totalorder %s8829_s4, %s5307_s0  ;;  %p5314_p0 = scmp.lt.u32.totalorder %s5307_s0, %s8829_s4 }
 0x108   : > { %p5310_p3 = pnand %p5308_p1, %p5839_p8 }
 0x10a   : > { %p5311_p13 = pneg %p5310_p3 }
 0x10c   : > { %p5316_p2 = pnand %p5314_p0, %p5311_p13 }
 0x10e   : > { %5319 = shalt.err (!%p5316_p2)
}
 0x10f   : > { %s5320_s29 = scalar_lea.vmem %s508_s30, 16  ;;  %s5327_s24 = scalar_lea.vmem %s508_s30, 32 }
 0x110   : > { %p5321_p5 = scmp.ne.s32.totalorder %s508_s30, %s5320_s29  ;;  %p5328_p4 = scmp.lt.s32.totalorder %s508_s30, %s508_s30 }
 0x111   : > { %p5329_p10 = scmp.lt.s32.totalorder %s5327_s24, %s5320_s29 }
 0x112   : > { %p5323_p7 = pnand %p5321_p5, %p5839_p8 }
 0x113   : > { %p5330_p11 = por %p5329_p10, %p5328_p4 }
 0x114   : > { %p5324_p9 = pneg %p5323_p7 }
 0x116   : > { %p5331_p12 = pnand %p5330_p11, %p5324_p9 }
 0x118   : > { %5334 = shalt.err (!%p5331_p12)
}
 0x119   : > { %4711 = dma.hbm_to_vmem [thread:$0]  (!%p5823_p6), %s8829_s4, 16, %s508_s30, [#allocation9]  }
 0x11a   : > { %s5335_s19 = scalar_lea.hbm %s8664_s6, 256 }
 0x11b   : > { %p5336_p1 = scmp.ne.s32.totalorder %s8664_s6, %s5335_s19  ;;  %p5342_p0 = scmp.lt.u32.totalorder %s5335_s19, %s8664_s6 }
 0x11d   : > { %p5338_p3 = pnand %p5336_p1, %p5839_p8 }
 0x11f   : > { %p5339_p13 = pneg %p5338_p3 }
 0x121   : > { %p5344_p2 = pnand %p5342_p0, %p5339_p13 }
 0x123   : > { %5347 = shalt.err (!%p5344_p2)
}
 0x124   : > { %s5348_s29 = scalar_lea.vmem %s531_s27, 256  ;;  %p5356_p4 = scmp.lt.s32.totalorder %s531_s27, %s531_s27 }
 0x125   : > { %p5349_p5 = scmp.ne.s32.totalorder %s531_s27, %s5348_s29  ;;  %p5357_p10 = scmp.lt.s32.totalorder %s5348_s29, %s5348_s29 }
 0x127   : > { %p5351_p7 = pnand %p5349_p5, %p5839_p8  ;;  %p5358_p11 = por %p5357_p10, %p5356_p4 }
 0x129   : > { %p5352_p9 = pneg %p5351_p7 }
 0x12b   : > { %p5359_p12 = pnand %p5358_p11, %p5352_p9 }
 0x12d   : > { %5362 = shalt.err (!%p5359_p12)
}
 0x12e   : > { %s8830_s30 = smov 4   ;;  %s8831_s24 = smov 64  }
 0x12f   : > { %4717 = dma.hbm_to_vmem [thread:$0]  (!%p5823_p6), %s8664_s6, 256, %s531_s27, [#allocation12], %s8831_s24, %s8831_s24, %s8830_s30  }
 0x130   : > { %s5680_s17 = smov [#allocation16]   ;;  %s5681_s19 = smov [#allocation19]  }
 0x131   : > { %s556_s26 = sshll.u32 %s5680_s17, 4  ;;  %s581_s25 = sshll.u32 %s5681_s19, 4  ;;  %s557_s26 = int_to_ptr.vmem [resolvable:$true] %s556_s26  ;;  %s582_s25 = int_to_ptr.vmem [resolvable:$true] %s581_s25 }
 0x132   : > { %s5363_s22 = scalar_lea.hbm %s8666_s8, 256 }
 0x133   : > { %p5364_p1 = scmp.ne.s32.totalorder %s8666_s8, %s5363_s22  ;;  %p5370_p0 = scmp.lt.u32.totalorder %s5363_s22, %s8666_s8 }
 0x135   : > { %p5366_p3 = pnand %p5364_p1, %p5839_p8 }
 0x137   : > { %p5367_p13 = pneg %p5366_p3 }
 0x139   : > { %p5372_p2 = pnand %p5370_p0, %p5367_p13 }
 0x13b   : > { %5375 = shalt.err (!%p5372_p2)
}
 0x13c   : > { %s5376_s27 = scalar_lea.vmem %s557_s26, 256  ;;  %p5384_p4 = scmp.lt.s32.totalorder %s557_s26, %s557_s26 }
 0x13d   : > { %p5377_p5 = scmp.ne.s32.totalorder %s557_s26, %s5376_s27  ;;  %p5385_p10 = scmp.lt.s32.totalorder %s5376_s27, %s5376_s27 }
 0x13f   : > { %p5379_p7 = pnand %p5377_p5, %p5839_p8  ;;  %p5386_p11 = por %p5385_p10, %p5384_p4 }
 0x141   : > { %p5380_p9 = pneg %p5379_p7 }
 0x143   : > { %p5387_p12 = pnand %p5386_p11, %p5380_p9 }
 0x145   : > { %5390 = shalt.err (!%p5387_p12)
}
 0x146   : > { %4723 = dma.hbm_to_vmem [thread:$0]  (!%p5823_p6), %s8666_s8, 256, %s557_s26, [#allocation15], %s8831_s24, %s8831_s24, %s8830_s30  }
 0x147   : > { %s5391_s19 = scalar_lea.hbm %s8668_s10, 16 }
 0x148   : > { %p5392_p1 = scmp.ne.s32.totalorder %s8668_s10, %s5391_s19  ;;  %p5398_p0 = scmp.lt.u32.totalorder %s5391_s19, %s8668_s10 }
 0x14a   : > { %p5394_p3 = pnand %p5392_p1, %p5839_p8 }
 0x14c   : > { %p5395_p13 = pneg %p5394_p3 }
 0x14e   : > { %p5400_p2 = pnand %p5398_p0, %p5395_p13 }
 0x150   : > { %5403 = shalt.err (!%p5400_p2)
}
 0x151   : > { %s5404_s28 = scalar_lea.vmem %s582_s25, 16  ;;  %s5411_s26 = scalar_lea.vmem %s582_s25, 32 }
 0x152   : > { %p5405_p5 = scmp.ne.s32.totalorder %s582_s25, %s5404_s28  ;;  %p5412_p4 = scmp.lt.s32.totalorder %s582_s25, %s582_s25 }
 0x153   : > { %p5413_p10 = scmp.lt.s32.totalorder %s5411_s26, %s5404_s28 }
 0x154   : > { %p5407_p7 = pnand %p5405_p5, %p5839_p8 }
 0x155   : > { %p5414_p11 = por %p5413_p10, %p5412_p4 }
 0x156   : > { %p5408_p9 = pneg %p5407_p7 }
 0x158   : > { %p5415_p12 = pnand %p5414_p11, %p5408_p9 }
 0x15a   : > { %5418 = shalt.err (!%p5415_p12)
}
 0x15b   : > { %4729 = dma.hbm_to_vmem [thread:$0]  (!%p5823_p6), %s8668_s10, 16, %s582_s25, [#allocation18]  }
 0x15c   : > { %s5682_s1 = smov [#allocation22]   ;;  %s5683_s17 = smov [#allocation25]  }
 0x15d   : > { %s602_s20 = sshll.u32 %s5682_s1, 4  ;;  %s626_s19 = sshll.u32 %s5683_s17, 4  ;;  %s603_s20 = int_to_ptr.vmem [resolvable:$true] %s602_s20  ;;  %s627_s19 = int_to_ptr.vmem [resolvable:$true] %s626_s19 }
 0x15e   : > { %s5419_s22 = scalar_lea.hbm %s8670_s12, 256 }
 0x15f   : > { %p5420_p1 = scmp.ne.s32.totalorder %s8670_s12, %s5419_s22  ;;  %p5426_p0 = scmp.lt.u32.totalorder %s5419_s22, %s8670_s12 }
 0x161   : > { %p5422_p3 = pnand %p5420_p1, %p5839_p8 }
 0x163   : > { %p5423_p13 = pneg %p5422_p3 }
 0x165   : > { %p5428_p2 = pnand %p5426_p0, %p5423_p13 }
 0x167   : > { %5431 = shalt.err (!%p5428_p2)
}
 0x168   : > { %s5432_s25 = scalar_lea.vmem %s603_s20, 256  ;;  %p5440_p4 = scmp.lt.s32.totalorder %s603_s20, %s603_s20 }
 0x169   : > { %p5433_p5 = scmp.ne.s32.totalorder %s603_s20, %s5432_s25  ;;  %p5441_p10 = scmp.lt.s32.totalorder %s5432_s25, %s5432_s25 }
 0x16b   : > { %p5435_p7 = pnand %p5433_p5, %p5839_p8  ;;  %p5442_p11 = por %p5441_p10, %p5440_p4 }
 0x16d   : > { %p5436_p9 = pneg %p5435_p7 }
 0x16f   : > { %p5443_p12 = pnand %p5442_p11, %p5436_p9 }
 0x171   : > { %5446 = shalt.err (!%p5443_p12)
}
 0x172   : > { %4735 = dma.hbm_to_vmem [thread:$0]  (!%p5823_p6), %s8670_s12, 256, %s603_s20, [#allocation21], %s8831_s24, %s8831_s24, %s8830_s30  }
 0x173   : > { %s5447_s18 = scalar_lea.hbm %s8672_s14, 256 }
 0x174   : > { %p5448_p1 = scmp.ne.s32.totalorder %s8672_s14, %s5447_s18  ;;  %p5454_p0 = scmp.lt.u32.totalorder %s5447_s18, %s8672_s14 }
 0x176   : > { %p5450_p3 = pnand %p5448_p1, %p5839_p8 }
 0x178   : > { %p5451_p13 = pneg %p5450_p3 }
 0x17a   : > { %p5456_p2 = pnand %p5454_p0, %p5451_p13 }
 0x17c   : > { %5459 = shalt.err (!%p5456_p2)
}
 0x17d   : > { %s5460_s27 = scalar_lea.vmem %s627_s19, 256  ;;  %p5468_p4 = scmp.lt.s32.totalorder %s627_s19, %s627_s19 }
 0x17e   : > { %p5461_p5 = scmp.ne.s32.totalorder %s627_s19, %s5460_s27  ;;  %p5469_p10 = scmp.lt.s32.totalorder %s5460_s27, %s5460_s27 }
 0x180   : > { %p5463_p7 = pnand %p5461_p5, %p5839_p8  ;;  %p5470_p11 = por %p5469_p10, %p5468_p4 }
 0x182   : > { %p5464_p9 = pneg %p5463_p7 }
 0x184   : > { %p5471_p12 = pnand %p5470_p11, %p5464_p9 }
 0x186   : > { %5474 = shalt.err (!%p5471_p12)
}
 0x187   : > { %4741 = dma.hbm_to_vmem [thread:$0]  (!%p5823_p6), %s8672_s14, 256, %s627_s19, [#allocation24], %s8828_s23, %s8828_s23, %s8827_s3  }
 0x188   : > { %s5684_s4 = smov [#allocation28]   ;;  %s5685_s17 = smov [#allocation29]  }
 0x189   : > { %s650_s1 = sshll.u32 %s5684_s4, 4  ;;  %s664_s0 = sshll.u32 %s5685_s17, 4  ;;  %s651_s1 = int_to_ptr.vmem [resolvable:$true] %s650_s1  ;;  %s665_s0 = int_to_ptr.vmem [resolvable:$true] %s664_s0 }
 0x18a   : > { %s5475_s29 = scalar_lea.hbm %s8674_s16, 1024 }
 0x18b   : > { %p5476_p1 = scmp.ne.s32.totalorder %s8674_s16, %s5475_s29  ;;  %p5482_p0 = scmp.lt.u32.totalorder %s5475_s29, %s8674_s16 }
 0x18d   : > { %p5478_p3 = pnand %p5476_p1, %p5839_p8 }
 0x18f   : > { %p5479_p13 = pneg %p5478_p3 }
 0x191   : > { %p5484_p2 = pnand %p5482_p0, %p5479_p13 }
 0x193   : > { %5487 = shalt.err (!%p5484_p2)
}
 0x194   : > { %s5488_s19 = scalar_lea.vmem %s651_s1, 1024  ;;  %p5496_p4 = scmp.lt.s32.totalorder %s651_s1, %s651_s1 }
 0x195   : > { %p5489_p5 = scmp.ne.s32.totalorder %s651_s1, %s5488_s19  ;;  %p5497_p10 = scmp.lt.s32.totalorder %s5488_s19, %s5488_s19 }
 0x197   : > { %p5491_p7 = pnand %p5489_p5, %p5839_p8  ;;  %p5498_p11 = por %p5497_p10, %p5496_p4 }
 0x199   : > { %p5492_p9 = pneg %p5491_p7 }
 0x19b   : > { %p5499_p12 = pnand %p5498_p11, %p5492_p9 }
 0x19d   : > { %5502 = shalt.err (!%p5499_p12)
}
 0x19e   : > { %4747 = dma.hbm_to_vmem [thread:$0]  (!%p5823_p6), %s8674_s16, 1024, %s651_s1, [#allocation27], %s8831_s24, %s8831_s24, %s8830_s30  }
 0x19f   : > { %s8832_s22 = sld [smem:[#allocation97_spill]] }
 0x1a5   : > { %s5503_s29 = scalar_lea.hbm %s8832_s22, 16 }
 0x1a6   : > { %p5504_p1 = scmp.ne.s32.totalorder %s8832_s22, %s5503_s29  ;;  %p5510_p0 = scmp.lt.u32.totalorder %s5503_s29, %s8832_s22 }
 0x1a8   : > { %p5506_p3 = pnand %p5504_p1, %p5839_p8 }
 0x1aa   : > { %p5507_p13 = pneg %p5506_p3 }
 0x1ac   : > { %p5512_p2 = pnand %p5510_p0, %p5507_p13 }
 0x1ae   : > { %5515 = shalt.err (!%p5512_p2)
}
 0x1af   : > { %s5516_s19 = scalar_lea.vmem %s665_s0, 16  ;;  %s5523_s30 = scalar_lea.vmem %s665_s0, 32 }
 0x1b0   : > { %p5517_p5 = scmp.ne.s32.totalorder %s665_s0, %s5516_s19  ;;  %p5524_p4 = scmp.lt.s32.totalorder %s665_s0, %s665_s0 }
 0x1b1   : > { %p5525_p10 = scmp.lt.s32.totalorder %s5523_s30, %s5516_s19 }
 0x1b2   : > { %p5519_p7 = pnand %p5517_p5, %p5839_p8 }
 0x1b3   : > { %p5526_p11 = por %p5525_p10, %p5524_p4 }
 0x1b4   : > { %p5520_p9 = pneg %p5519_p7 }
 0x1b6   : > { %p5527_p12 = pnand %p5526_p11, %p5520_p9 }
 0x1b8   : > { %5530 = shalt.err (!%p5527_p12)
}
 0x1b9   : > { %s8833_s25 = sld [smem:[#allocation46_spill]]  ;;  %s8834_s4 = sld [smem:[#allocation45_spill]] }
 0x1ba   : > { %s8835_s17 = sld [smem:[#allocation44_spill]]  ;;  %s8836_s21 = sld [smem:[#allocation43_spill]] }
 0x1bb   : > { %s8837_s18 = sld [smem:[#allocation47_spill]] }
 0x1bc   : > { %4750 = dma.hbm_to_vmem [thread:$0]  (!%p5823_p6), %s8832_s22, 16, %s665_s0, [#allocation30]  }
 0x1bf   : > { %s4112_s29 = sadd.s32 4294967294, %s8833_s25   ;;  %s6188_s30 = sadd.s32 1, %s8833_s25  }
 0x1c0   : > { %s50_s2 = sadd.s32 1, %s8834_s4  ;;  %s47_s28 = ssub.s32 %s8833_s25, %s6188_s30 }
 0x1c1   : > { %p57_p8 = scmp.ne.s32.totalorder %s8834_s4, %s8835_s17  ;;  %p48_p1 = scmp.eq.s32.totalorder %s47_s28, 0 }
 0x1c2   : > { %p58_p3 = scmp.eq.s32.totalorder %s8833_s25, 0  ;;  %p63_p13 = scmp.ne.s32.totalorder %s8835_s17, %s8836_s21 }
 0x1c3   : > { %p444_p0 = scmp.eq.s32.totalorder %s8837_s18, 1  ;;  %p8838_p5 = scmp.eq.s32.totalorder %s8837_s18, 0 }
 0x1c4   : > { %s6200_s26 = scalar_select %p48_p1, %s8834_s4, %s50_s2  }
 0x1c5   : > { %p59_p2 = por %p58_p3, %p57_p8  ;;  %p6204_p7 = por %p8838_p5, %p63_p13 }
 0x1c6   : > { %p6208_p6 = por %p444_p0, %p57_p8  ;;  %p450_p9 = scmp.eq.s32.totalorder %s4112_s29, 1 }
 0x1c7   : > { %p4776_p4 = scmp.lt.s32.totalorder %s8833_s25, 2  ;;  %s675_s20 = sand.u32 1, %s8834_s4  }
 0x1c8   : > { %s8840_s0 = scalar_select %p6208_p6, 1, 0 }
 0x1c9   : > { %p6214_p10 = por %p450_p9, %p63_p13  ;;  %s4132_s24 = sshll.u32 %s675_s20, 6 }
 0x1ca   : > { %s4239_s1 = sshll.u32 %s8833_s25, 10  ;;  %s8842_s18 = sld [smem:[#allocation91_spill]] }
 0x1cb   : > { %s8841_s19 = scalar_select %p6214_p10, 1, 0 }
 0x1cc   : > { %s679_s28 = scalar_lea.vmem [#allocation2], %s4132_s24  ;;  %p6224_p11 = pnand %p4776_p4, %p59_p2 }
 0x1cd   : > { %s686_s5 = sshll.u32 %s679_s28, 4  ;;  %s6230_s25 = scalar_lea.sflag [#allocation3], %s675_s20  ;;  %s6228_s5 = int_to_ptr.vmem [resolvable:$true] %s686_s5 }
 0x1ce   : > { %p5533_p8 = pneg %p6224_p11 }
 0x1d0   : > { %s6222_s2 = scalar_lea.hbm %s8842_s18, %s4239_s1  ;;  %s5536_s17 = scalar_lea.hbm %s8842_s18, 2048 }
 0x1d1   : > { %s5531_s4 = scalar_lea.hbm %s6222_s2, 1024  ;;  %p5537_p13 = scmp.lt.u32.totalorder %s6222_s2, %s8842_s18 }
 0x1d2   : > { %p5532_p12 = scmp.ne.s32.totalorder %s6222_s2, %s5531_s4  ;;  %p5538_p0 = scmp.lt.u32.totalorder %s5536_s17, %s5531_s4 }
 0x1d3   : > { %p5540_p5 = scmp.lt.u32.totalorder %s5531_s4, %s6222_s2 }
 0x1d4   : > { %p5534_p1 = pnand %p5533_p8, %p5532_p12  ;;  %p5539_p2 = por %p5538_p0, %p5537_p13 }
 0x1d6   : > { %p5535_p3 = pneg %p5534_p1  ;;  %p5541_p9 = por %p5540_p5, %p5539_p2 }
 0x1d8   : > { %p5542_p4 = pnand %p5541_p9, %p5535_p3 }
 0x1da   : > { %5545 = shalt.err (!%p5542_p4)
}
 0x1db   : > { %s5546_s20 = scalar_lea.vmem %s6228_s5, 1024  ;;  %s5686_s24 = smov [#allocation2]  }
 0x1dc   : > { %p5547_p12 = scmp.ne.s32.totalorder %s6228_s5, %s5546_s20  ;;  %s5551_s1 = sshll.u32 %s5686_s24, 4  ;;  %s5552_s1 = int_to_ptr.vmem [resolvable:$false] %s5551_s1 }
 0x1dd   : > { %s5553_s21 = scalar_lea.vmem %s5552_s1, 2048  ;;  %p5554_p6 = scmp.lt.s32.totalorder %s6228_s5, %s5552_s1 }
 0x1de   : > { %p5549_p1 = pnand %p5547_p12, %p5533_p8  ;;  %p5555_p13 = scmp.lt.s32.totalorder %s5553_s21, %s5546_s20 }
 0x1e0   : > { %p5550_p10 = pneg %p5549_p1  ;;  %p5556_p0 = por %p5555_p13, %p5554_p6 }
 0x1e2   : > { %p5557_p2 = pnand %p5556_p0, %p5550_p10 }
 0x1e4   : > { %5560 = shalt.err (!%p5557_p2)
}
 0x1e5   : > { %4754 = dma.hbm_to_vmem [thread:$0]  (!%p6224_p11), %s6222_s2, 1024, %s6228_s5, %s6230_s25, %s8828_s23, %s8828_s23, %s8827_s3  }
 0x1e6   : > { %s8844_s4 = sld [smem:[#allocation48_spill]] }
 0x1ec   : > { %p8845_p8 = scmp.ne.s32.totalorder %s8844_s4, 0 }
 0x1ee   : > { %698 = sbr.rel (%p8845_p8) target bundleno = 3044 (0xbe4), region = 92 }
 0x1f5   : > { %s8846_s17 = sld [smem:[#allocation44_spill]] }
 0x1fb   : > { %s6264_s28 = sand.u32 1, %s8846_s17  }
 0x1fc   : > { %s4136_s20 = sshll.u32 %s6264_s28, 6  ;;  %s701_s24 = scalar_lea.sflag [#allocation3], %s6264_s28 }
 0x1fd   : > { %s6270_s29 = scalar_lea.vmem [#allocation2], %s4136_s20 }
 0x1fe   : > { %5606 = dma.done.wait (%p6204_p7), %s701_s24, 1024  }
 0x1ff   : > { %5608 = vsyncadd (%p6204_p7), %s701_s24, 4294966272  ;;  %s8847_s5 = sld [smem:[#allocation47_spill]] }
 0x205   : > { %p8848_p6 = scmp.eq.s32.totalorder %s8847_s5, 0 }
 0x207   : > { %5610 = dma.done.wait (%p8848_p6), [#allocation6], 2048   ;;  %p8849_p10 = pmov %p8848_p6 }
 0x208   : > { %p8850_p11 = pmov %p8848_p6 }
 0x209   : > { %5612 = vsyncadd (%p8849_p10), [#allocation6], 4294965248 }
 0x20a   : > { %5614 = dma.done.wait (%p8850_p11), [#allocation9], 32   ;;  %p8851_p3 = pmov %p8848_p6 }
 0x20c   : > { %5616 = vsyncadd (%p8851_p3), [#allocation9], 4294967264  ;;  %p8852_p5 = pmov %p8851_p3 }
 0x20d   : > { %p8853_p9 = pmov %p8851_p3 }
 0x20e   : > { %5618 = dma.done.wait (%p8852_p5), [#allocation12], 512  }
 0x20f   : > { %5620 = vsyncadd (%p8853_p9), [#allocation12], 4294966784  ;;  %p8854_p7 = pmov %p8851_p3 }
 0x210   : > { %p8855_p4 = pmov %p8851_p3 }
 0x211   : > { %5622 = dma.done.wait (%p8854_p7), [#allocation15], 512  }
 0x212   : > { %5624 = vsyncadd (%p8855_p4), [#allocation15], 4294966784  ;;  %p8856_p12 = pmov %p8851_p3 }
 0x213   : > { %p8857_p1 = pmov %p8851_p3 }
 0x214   : > { %5626 = dma.done.wait (%p8856_p12), [#allocation18], 32  }
 0x215   : > { %5628 = vsyncadd (%p8857_p1), [#allocation18], 4294967264  ;;  %p8858_p13 = pmov %p8857_p1 }
 0x216   : > { %p8859_p0 = pmov %p8857_p1 }
 0x217   : > { %5630 = dma.done.wait (%p8858_p13), [#allocation21], 272  }
 0x218   : > { %5632 = vsyncadd (%p8859_p0), [#allocation21], 4294967024  ;;  %p8860_p2 = pmov %p8859_p0 }
 0x219   : > { %p8861_p8 = pmov %p8859_p0 }
 0x21a   : > { %5634 = dma.done.wait (%p8860_p2), [#allocation24], 272  }
 0x21b   : > { %5636 = vsyncadd (%p8861_p8), [#allocation24], 4294967024  ;;  %p8862_p6 = pmov %p8859_p0 }
 0x21c   : > { %p8863_p10 = pmov %p8859_p0 }
 0x21d   : > { %5638 = dma.done.wait (%p8862_p6), [#allocation27], 1040  }
 0x21e   : > { %5640 = vsyncadd (%p8863_p10), [#allocation27], 4294966256  ;;  %p8864_p11 = pmov %p8859_p0 }
 0x21f   : > { %p8865_p3 = pmov %p8859_p0 }
 0x220   : > { %5642 = dma.done.wait (%p8864_p11), [#allocation30], 16  }
 0x221   : > { %5644 = vsyncadd (%p8865_p3), [#allocation30], 4294967280  ;;  %vm8703_vm0 = vcmask 261120   ;;  %v830_v0 = vld [vmem:[%s6270_s29] sm:$0xff]  ;;  %v832_v1 = vld [vmem:[%s6270_s29 + $0x10] sm:$0xff]  ;;  %s824_s3 = scalar_lea.vmem [#allocation31], %s4136_s20 }
 0x222   : > { %v831_v2 = vld [vmem:[%s6270_s29 + $0x8] sm:$0xff]  ;;  %v841_v3 = vsel %vm8703_vm0, %v830_v0, 0.0  ;;  %v847_v4 = vsel %vm8703_vm0, %v832_v1, 0.0  ;;  %v833_v5 = vld [vmem:[%s6270_s29 + $0x18] sm:$0xff]  ;;  %v834_v6 = vld [vmem:[%s6270_s29 + $0x20] sm:$0xff]  ;;  %s4240_s23 = sshll.u32 %s8847_s5, 10 }
 0x223   : > { %v835_v7 = vld [vmem:[%s6270_s29 + $0x28] sm:$0xff]  ;;  %842 = vadd.xlane.f32.xlu0 %v841_v3  ;;  %848 = vadd.xlane.f32.xlu1 %v847_v4  ;;  %v844_v8 = vsel %vm8703_vm0, %v831_v2, 0.0  ;;  %v850_v9 = vsel %vm8703_vm0, %v833_v5, 0.0  ;;  %v853_v10 = vsel %vm8703_vm0, %v834_v6, 0.0  ;;  %v836_v12 = vld [vmem:[%s6270_s29 + $0x30] sm:$0xff]  ;;  %v837_v13 = vld [vmem:[%s6270_s29 + $0x38] sm:$0xff] }
 0x224   : > { %v856_v11 = vsel %vm8703_vm0, %v835_v7, 0.0  ;;  %v859_v14 = vsel %vm8703_vm0, %v836_v12, 0.0  ;;  %v862_v15 = vsel %vm8703_vm0, %v837_v13, 0.0  ;;  %v4853_v56 = vld [vmem:[#allocation11] sm:$0xff]   ;;  %v4854_v57 = vld [vmem:[#allocation13] sm:$0xff]   ;;  %v4855_v58 = vld [vmem:[#allocation11 + $0x8] sm:$0xff]  }
 0x225   : > { %4347 = vmatprep.subr.bf16.mxu0 %v4853_v56  ;;  %4359 = vmatprep.subr.bf16.mxu1 %v4854_v57  ;;  %v4856_v59 = vld [vmem:[#allocation13 + $0x8] sm:$0xff]   ;;  %v6368_v60 = vld [vmem:[#allocation14] sm:$0xff]   ;;  %s3877_s27 = sshll.u32 %s824_s3, 4  ;;  %s9162_s1 = sld [smem:[#allocation98_spill]]  ;;  %s8610_s27 = int_to_ptr.vmem [resolvable:$true] %s3877_s27 }
 0x226   : > { %4348 = vmatpush3.bf16.msra.mxu0 %v4853_v56  ;;  %4360 = vmatpush3.bf16.msra.mxu1 %v4854_v57  ;;  %s3864_s4 = scalar_lea.sflag [#allocation4], %s6264_s28  ;;  %s5561_s17 = scalar_lea.vmem %s8610_s27, 1024 }
 0x227   : > { %845 = vadd.xlane.f32.xlu0 %v844_v8  ;;  %851 = vadd.xlane.f32.xlu1 %v850_v9  ;;  %p5562_p5 = scmp.ne.s32.totalorder %s8610_s27, %s5561_s17  ;;  %p9167_p9 = scmp.ne.s32.totalorder %s8840_s0, 0 }
 0x228   : > { %4349 = vmatprep.subr.bf16.mxu0 %v4855_v58  ;;  %4361 = vmatprep.subr.bf16.mxu1 %v4856_v59  ;;  %s5688_s20 = smov [#allocation31]  }
 0x229   : > { %p5563_p7 = pnand %p5562_p5, %p9167_p9  ;;  %s5565_s24 = sshll.u32 %s5688_s20, 4  ;;  %s5566_s24 = int_to_ptr.vmem [resolvable:$false] %s5565_s24 }
 0x22a   : > { %4350 = vmatpush3.bf16.msra.mxu0 %v4855_v58  ;;  %4362 = vmatpush3.bf16.msra.mxu1 %v4856_v59  ;;  %p5568_p12 = scmp.lt.s32.totalorder %s8610_s27, %s5566_s24 }
 0x22b   : > { %854 = vadd.xlane.f32.xlu0 %v853_v10  ;;  %857 = vadd.xlane.f32.xlu1 %v856_v11  ;;  %s8608_s21 = scalar_lea.hbm %s9162_s1, %s4240_s23  ;;  %p5564_p4 = pneg %p5563_p7 }
 0x22c   : > { %4371 = vmatprep.subr.bf16.mxu0 %v6368_v60 }
 0x22f   : > { %860 = vadd.xlane.f32.xlu0 %v859_v14  ;;  %863 = vadd.xlane.f32.xlu1 %v862_v15 }
 0x2b0   : > { %v843_v16 = vpop.xlane.xlu0 %842  ;;  %v849_v17 = vpop.xlane.xlu1 %848 }
 0x2b1   : > { %v866_v18 = vmul.f32 0.03125, %v843_v16  ;;  %v868_v19 = vmul.f32 0.03125, %v849_v17 }
 0x2b3   : > { %v6328_v20 = vsub.f32 %v830_v0, %v866_v18  ;;  %v6330_v21 = vsub.f32 %v832_v1, %v868_v19 }
 0x2b4   : > { %v846_v22 = vpop.xlane.xlu0 %845  ;;  %v852_v23 = vpop.xlane.xlu1 %851 }
 0x2b5   : > { %v867_v24 = vmul.f32 0.03125, %v846_v22  ;;  %v869_v25 = vmul.f32 0.03125, %v852_v23  ;;  %v882_v26 = vmul.f32 %v6328_v20, %v6328_v20  ;;  %v884_v27 = vmul.f32 %v6330_v21, %v6330_v21 }
 0x2b7   : > { %v6336_v28 = vsub.f32 %v831_v2, %v867_v24  ;;  %v6338_v29 = vsub.f32 %v833_v5, %v869_v25  ;;  %v890_v30 = vsel %vm8703_vm0, %v882_v26, 0.0  ;;  %v896_v33 = vsel %vm8703_vm0, %v884_v27, 0.0  ;;  %v4155_v24 = vld [vmem:[#allocation8] ss:$0 sm:$0xff] }
 0x2b8   : > { %891 = vadd.xlane.f32.xlu0 %v890_v30  ;;  %v855_v31 = vpop.xlane.xlu0 %854  ;;  %v858_v32 = vpop.xlane.xlu1 %857 }
 0x2b9   : > { %v870_v34 = vmul.f32 0.03125, %v855_v31  ;;  %v871_v35 = vmul.f32 0.03125, %v858_v32  ;;  %v883_v36 = vmul.f32 %v6336_v28, %v6336_v28  ;;  %v885_v37 = vmul.f32 %v6338_v29, %v6338_v29  ;;  %v4156_v32 = vld [vmem:[#allocation10] ss:$0 sm:$0xff] }
 0x2bb   : > { %v6346_v38 = vsub.f32 %v834_v6, %v870_v34  ;;  %v6348_v39 = vsub.f32 %v835_v7, %v871_v35  ;;  %v893_v40 = vsel %vm8703_vm0, %v883_v36, 0.0  ;;  %v899_v43 = vsel %vm8703_vm0, %v885_v37, 0.0 }
 0x2bc   : > { %897 = vadd.xlane.f32.xlu0 %v896_v33  ;;  %894 = vadd.xlane.f32.xlu1 %v893_v40  ;;  %v861_v41 = vpop.xlane.xlu0 %860  ;;  %v864_v42 = vpop.xlane.xlu1 %863 }
 0x2bd   : > { %v872_v44 = vmul.f32 0.03125, %v861_v41  ;;  %v873_v45 = vmul.f32 0.03125, %v864_v42  ;;  %v886_v46 = vmul.f32 %v6346_v38, %v6346_v38  ;;  %v887_v47 = vmul.f32 %v6348_v39, %v6348_v39 }
 0x2bf   : > { %v6356_v48 = vsub.f32 %v836_v12, %v872_v44  ;;  %v6358_v49 = vsub.f32 %v837_v13, %v873_v45  ;;  %v902_v50 = vsel %vm8703_vm0, %v886_v46, 0.0  ;;  %v905_v51 = vsel %vm8703_vm0, %v887_v47, 0.0 }
 0x2c0   : > { %900 = vadd.xlane.f32.xlu1 %v899_v43  ;;  %903 = vadd.xlane.f32.xlu0 %v902_v50 }
 0x2c1   : > { %v888_v52 = vmul.f32 %v6356_v48, %v6356_v48  ;;  %v889_v53 = vmul.f32 %v6358_v49, %v6358_v49 }
 0x2c3   : > { %v908_v54 = vsel %vm8703_vm0, %v888_v52, 0.0  ;;  %v911_v55 = vsel %vm8703_vm0, %v889_v53, 0.0  ;;  %v4858_v53 = vld [vmem:[#allocation14 + $0x8] sm:$0xff]  }
 0x2c4   : > { %906 = vadd.xlane.f32.xlu1 %v905_v51  ;;  %909 = vadd.xlane.f32.xlu0 %v908_v54 }
 0x2c8   : > { %912 = vadd.xlane.f32.xlu1 %v911_v55 }
 0x345   : > { %v892_v61 = vpop.xlane.xlu0 %891 }
 0x346   : > { %v914_v62 = vmul.f32 0.03125, %v892_v61 }
 0x348   : > { %v922_v63 = vadd.f32 1e-05, %v914_v62 }
 0x349   : > { %v895_v0 = vpop.xlane.xlu1 %894  ;;  %v898_v1 = vpop.xlane.xlu0 %897 }
 0x34a   : > { %4871 = vrsqrt.f32 %v922_v63  ;;  %v915_v2 = vmul.f32 0.03125, %v895_v0  ;;  %v916_v3 = vmul.f32 0.03125, %v898_v1 }
 0x34c   : > { %v923_v4 = vadd.f32 1e-05, %v915_v2  ;;  %v924_v5 = vadd.f32 1e-05, %v916_v3 }
 0x34d   : > { %v901_v6 = vpop.xlane.xlu1 %900  ;;  %v904_v7 = vpop.xlane.xlu0 %903 }
 0x34e   : > { %4873 = vrsqrt.f32 %v923_v4  ;;  %v917_v8 = vmul.f32 0.03125, %v901_v6  ;;  %v918_v9 = vmul.f32 0.03125, %v904_v7 }
 0x34f   : > { %4875 = vrsqrt.f32 %v924_v5 }
 0x350   : > { %v925_v10 = vadd.f32 1e-05, %v917_v8  ;;  %v926_v11 = vadd.f32 1e-05, %v918_v9 }
 0x351   : > { %v907_v12 = vpop.xlane.xlu1 %906  ;;  %v910_v13 = vpop.xlane.xlu0 %909 }
 0x352   : > { %4877 = vrsqrt.f32 %v925_v10  ;;  %v919_v14 = vmul.f32 0.03125, %v907_v12  ;;  %v920_v15 = vmul.f32 0.03125, %v910_v13 }
 0x353   : > { %4879 = vrsqrt.f32 %v926_v11 }
 0x354   : > { %v4872_v16 = vpop.eup %4871  ;;  %v927_v17 = vadd.f32 1e-05, %v919_v14  ;;  %v928_v18 = vadd.f32 1e-05, %v920_v15 }
 0x355   : > { %v913_v19 = vpop.xlane.xlu1 %912  ;;  %v938_v22 = vmul.f32 %v4872_v16, %v6328_v20 }
 0x356   : > { %4881 = vrsqrt.f32 %v927_v17  ;;  %v921_v23 = vmul.f32 0.03125, %v913_v19 }
 0x357   : > { %4883 = vrsqrt.f32 %v928_v18  ;;  %v952_v31 = vmul.f32 %v4155_v24, %v938_v22 }
 0x358   : > { %v4874_v25 = vpop.eup %4873  ;;  %v929_v26 = vadd.f32 1e-05, %v921_v23 }
 0x359   : > { %v4876_v27 = vpop.eup %4875  ;;  %v939_v30 = vmul.f32 %v4874_v25, %v6336_v28  ;;  %v966_v37 = vadd.f32 %v4156_v32, %v952_v31 }
 0x35a   : > { %4885 = vrsqrt.f32 %v929_v26  ;;  %v940_v33 = vmul.f32 %v4876_v27, %v6330_v21 }
 0x35b   : > { %v953_v34 = vmul.f32 %v4155_v24, %v939_v30 }
 0x35c   : > { %v4878_v35 = vpop.eup %4877  ;;  %v954_v41 = vmul.f32 %v4155_v24, %v940_v33 }
 0x35d   : > { %v4880_v36 = vpop.eup %4879  ;;  %v967_v40 = vadd.f32 %v4156_v32, %v953_v34  ;;  %v941_v20 = vmul.f32 %v4878_v35, %v6338_v29 }
 0x35e   : > { %v942_v42 = vmul.f32 %v4880_v36, %v6346_v38  ;;  %v968_v21 = vadd.f32 %v4156_v32, %v954_v41 }
 0x35f   : > { %v974_v43 = vpack.c.bf16 %v967_v40, %v966_v37  ;;  %v955_v44 = vmul.f32 %v4155_v24, %v941_v20 }
 0x360   : > { %v4882_v45 = vpop.eup %4881  ;;  %v956_v46 = vmul.f32 %v4155_v24, %v942_v42 }
 0x361   : > { %v4884_v28 = vpop.eup %4883  ;;  %4351 = vmatprep.mubr.msk.bf16.mxu0 %vm8703_vm0, %v974_v43  ;;  %4363 = vmatprep.mubr.msk.bf16.mxu1 %vm8703_vm0, %v974_v43  ;;  %v969_v47 = vadd.f32 %v4156_v32, %v955_v44  ;;  %v943_v50 = vmul.f32 %v4882_v45, %v6348_v39 }
 0x362   : > { %v944_v51 = vmul.f32 %v4884_v28, %v6356_v48  ;;  %v970_v38 = vadd.f32 %v4156_v32, %v956_v46 }
 0x363   : > { %v975_v52 = vpack.c.bf16 %v969_v47, %v968_v21  ;;  %v957_v29 = vmul.f32 %v4155_v24, %v943_v50 }
 0x364   : > { %v4886_v54 = vpop.eup %4885  ;;  %v958_v57 = vmul.f32 %v4155_v24, %v944_v51 }
 0x365   : > { %4352 = vmatmul.mubr.msk.bf16.vlgmr.msra.gmra.mrb[0].mxu0 %vm8703_vm0, %v975_v52  ;;  %4364 = vmatmul.mubr.msk.bf16.vlgmr.msra.gmra.mrb[0].mxu1 %vm8703_vm0, %v975_v52  ;;  %v971_v55 = vadd.f32 %v4156_v32, %v957_v29  ;;  %v945_v56 = vmul.f32 %v4886_v54, %v6358_v49  ;;  %v5687_v49 = vmov 0  }
 0x366   : > { %4372 = vmatpush3.bf16.msra.mxu0 %v6368_v60  ;;  %v972_v39 = vadd.f32 %v4156_v32, %v958_v57  ;;  %4852 = vset.pattern.permute.xlu1 %v5687_v49  ;;  %v1253_v60 = vlaneseq }
 0x367   : > { %v976_v58 = vpack.c.bf16 %v971_v55, %v970_v38  ;;  %v959_v59 = vmul.f32 %v4155_v24, %v945_v56  ;;  %4373 = vmatprep.subr.bf16.mxu0 %v4858_v53  ;;  %4851 = vset.pattern.permute.xlu0 %v5687_v49 }
 0x368   : > { %v6394_v62 = vand.u32 127, %v1253_v60  ;;  %v6399_v63 = vshrl.u32 %v1253_v60, 7 }
 0x369   : > { %4355 = vmatprep.mubr.msk.bf16.mxu0 %vm8703_vm0, %v976_v58  ;;  %4367 = vmatprep.mubr.msk.bf16.mxu1 %vm8703_vm0, %v976_v58  ;;  %v973_v48 = vadd.f32 %v4156_v32, %v959_v59 }
 0x36a   : > { %4374 = vmatpush3.bf16.msra.mxu0 %v4858_v53  ;;  %vm1457_vm1 = vcmp.ge.s32.totalorder %v6394_v62, 8  ;;  %vm1458_vm2 = vcmp.lt.s32.totalorder %v6394_v62, 16  ;;  %vm1256_vm3 = vcmp.lt.s32.totalorder %v6394_v62, 8  ;;  %v6402_v0 = vsub.s32 0, %v6399_v63 }
 0x36b   : > { %v977_v61 = vpack.c.bf16 %v973_v48, %v972_v39  ;;  %vm1459_vm4 = vmand %vm1457_vm1, %vm1458_vm2  ;;  %vm1800_vm9 = vcmp.ge.s32.totalorder %v6394_v62, 16  ;;  %vm1801_vm10 = vcmp.lt.s32.totalorder %v6394_v62, 24  ;;  %vm2074_vm14 = vcmp.ge.s32.totalorder %v6394_v62, 24 }
 0x36c   : > { %vm1260_vm5 = vmpackc.low %vm1256_vm3, %vm1256_vm3  ;;  %vm2075_vm15 = vcmp.lt.s32.totalorder %v6394_v62, 32 }
 0x36d   : > { %4356 = vmatmul.mubr.msk.bf16.gmra.mrb[4].mxu0 %vm8703_vm0, %v977_v61  ;;  %4368 = vmatmul.mubr.msk.bf16.gmra.mrb[4].mxu1 %vm8703_vm0, %v977_v61  ;;  %vm1462_vm6 = vmpackc.low %vm1459_vm4, %vm1459_vm4  ;;  %v1261_v1 = vsel %vm1260_vm5, 65537, %v5687_v49  ;;  %vm1360_vm4 = vcmask 523264  }
 0x36e   : > { %4375 = vmatprep.mubr.msk.bf16.mxu0 %vm8703_vm0, %v974_v43  ;;  %v1463_v2 = vsel %vm1462_vm6, 65537, %v5687_v49  ;;  %v1265_v7 = vrot.slane %v1261_v1, %v6402_v0  ;;  %vm1802_vm11 = vmand %vm1800_vm9, %vm1801_vm10 }
 0x36f   : > { %v1467_v8 = vrot.slane %v1463_v2, %v6402_v0  ;;  %vm1805_vm12 = vmpackc.low %vm1802_vm11, %vm1802_vm11 }
 0x370   : > { %vm6414_vm7 = vcmp.ne.s16.totalorder %v1265_v7, 0  ;;  %v1806_v39 = vsel %vm1805_vm12, 65537, %v5687_v49  ;;  %vm2076_vm1 = vmand %vm2074_vm14, %vm2075_vm15 }
 0x371   : > { %vm6418_vm8 = vcmp.ne.s16.totalorder %v1467_v8, 0  ;;  %vm2079_vm2 = vmpackc.low %vm2076_vm1, %vm2076_vm1 }
 0x375   : > { %4376 = vmatmul.mubr.msk.bf16.vlgmr.msra.gmra.mrb[8].mxu0 %vm8703_vm0, %v975_v52 }
 0x376   : > { %4379 = vmatprep.mubr.msk.bf16.mxu0 %vm8703_vm0, %v976_v58 }
 0x37d   : > { %4380 = vmatmul.mubr.msk.bf16.gmra.mrb[12].mxu0 %vm8703_vm0, %v977_v61 }
 0x438   : > { %v4353_v3 = vpop.f32.mrb[0].mxu0  ;;  %v4365_v4 = vpop.f32.mrb[0].mxu1 }
 0x439   : > { %v1040_v5 = vpop.f32.mrb[1].mxu0  ;;  %v1129_v6 = vpop.f32.mrb[1].mxu1  ;;  %v1073_v11 = vmul.f32 0.35355338, %v4353_v3  ;;  %v1810_v3 = vrot.slane %v1806_v39, %v6402_v0 }
 0x43a   : > { %v4354_v9 = vpop.f32.mrb[2].mxu0  ;;  %v4366_v10 = vpop.f32.mrb[2].mxu1  ;;  %v1071_v16 = vmul.f32 0.35355338, %v1040_v5 }
 0x43b   : > { %v1074_v12 = vmul.f32 0.35355338, %v4354_v9  ;;  %v6408_v13 = vpack.c.bf16 %v4366_v10, %v4365_v4  ;;  %v1043_v14 = vpop.f32.mrb[3].mxu0  ;;  %v1132_v15 = vpop.f32.mrb[3].mxu1  ;;  %vm6525_vm13 = vcmp.ne.s16.totalorder %v1810_v3, 0 }
 0x43c   : > { %v1072_v17 = vmul.f32 0.35355338, %v1043_v14  ;;  %v6410_v18 = vpack.c.bf16 %v1132_v15, %v1129_v6 }
 0x43d   : > { %v6412_v19 = vpack.c.bf16 %v1074_v12, %v1073_v11  ;;  %v6456_v28 = vsel %vm8703_vm0, %v6408_v13, 0  ;;  %v2080_v11 = vsel %vm2079_vm2, 65537, %v5687_v49 }
 0x43e   : > { %v6422_v24 = vpack.c.bf16 %v1072_v17, %v1071_v16  ;;  %4591 = vmatprep.subr.msk.bf16.mxu1 %vm8703_vm0, %v6410_v18  ;;  %4595 = vmatprep.subr.msk.bf16.mxu0 %vm8703_vm0, %v6410_v18  ;;  %v6430_v25 = vsel %vm8703_vm0, %v6410_v18, 0  ;;  %v2084_v62 = vrot.slane %v2080_v11, %v6402_v0 }
 0x43f   : > { %4384 = vmatpush3.bf16.xpose.msra.mxu1 %v6430_v25  ;;  %4400 = vmatpush3.bf16.xpose.msra.mxu0 %v6430_v25  ;;  %v1268_v48 = vsel %vm6414_vm7, %v6412_v19, 0  ;;  %v1470_v61 = vsel %vm6418_vm8, %v6412_v19, 0  ;;  %v1813_v12 = vsel %vm6525_vm13, %v6412_v19, 0 }
 0x440   : > { %v4357_v26 = vpop.f32.mrb[4].mxu0  ;;  %v4369_v27 = vpop.f32.mrb[4].mxu1  ;;  %4592 = vmatprep.subr.msk.bf16.mxu1 %vm8703_vm0, %v6408_v13  ;;  %4596 = vmatprep.subr.msk.bf16.mxu0 %vm8703_vm0, %v6408_v13  ;;  %v1267_v30 = vsel %vm6414_vm7, %v6422_v24, 0  ;;  %v1469_v31 = vsel %vm6418_vm8, %v6422_v24, 0  ;;  %v1812_v8 = vsel %vm6525_vm13, %v6422_v24, 0  ;;  %vm6580_vm3 = vcmp.ne.s16.totalorder %v2084_v62, 0 }
 0x441   : > { %v1056_v32 = vpop.f32.mrb[5].mxu0  ;;  %v1145_v33 = vpop.f32.mrb[5].mxu1  ;;  %4391 = vmatprep.mubr.msk.bf16.mxu1 %vm8703_vm0, %v1267_v30  ;;  %4407 = vmatprep.mubr.msk.bf16.mxu0 %vm8703_vm0, %v1469_v31  ;;  %v1077_v36 = vmul.f32 0.35355338, %v4357_v26  ;;  %v2086_v17 = vsel %vm6580_vm3, %v6422_v24, 0 }
 0x442   : > { %v4358_v34 = vpop.f32.mrb[6].mxu0  ;;  %v4370_v35 = vpop.f32.mrb[6].mxu1  ;;  %v1075_v42 = vmul.f32 0.35355338, %v1056_v32 }
 0x443   : > { %v1078_v37 = vmul.f32 0.35355338, %v4358_v34  ;;  %v6446_v40 = vpack.c.bf16 %v4370_v35, %v4369_v27  ;;  %v1059_v20 = vpop.f32.mrb[7].mxu0  ;;  %v1148_v41 = vpop.f32.mrb[7].mxu1 }
 0x444   : > { %v1076_v43 = vmul.f32 0.35355338, %v1059_v20  ;;  %v6448_v44 = vpack.c.bf16 %v1148_v41, %v1145_v33 }
 0x445   : > { %v6450_v45 = vpack.c.bf16 %v1078_v37, %v1077_v36  ;;  %v6486_v59 = vsel %vm8703_vm0, %v6446_v40, 0 }
 0x446   : > { %v6452_v46 = vpack.c.bf16 %v1076_v43, %v1075_v42  ;;  %v6470_v53 = vsel %vm8703_vm0, %v6448_v44, 0 }
 0x447   : > { %4386 = vmatpush3.bf16.xpose.msra.mxu1 %v6456_v28  ;;  %4402 = vmatpush3.bf16.xpose.msra.mxu0 %v6456_v28  ;;  %v1270_v6 = vsel %vm6414_vm7, %v6450_v45, 0  ;;  %v1472_v7 = vsel %vm6418_vm8, %v6450_v45, 0  ;;  %v1815_v16 = vsel %vm6525_vm13, %v6450_v45, 0  ;;  %v2089_v24 = vsel %vm6580_vm3, %v6450_v45, 0 }
 0x448   : > { %v4377_v21 = vpop.f32.mrb[8].mxu0  ;;  %4593 = vmatprep.subr.msk.bf16.mxu1 %vm8703_vm0, %v6448_v44  ;;  %4597 = vmatprep.subr.msk.bf16.mxu0 %vm8703_vm0, %v6448_v44  ;;  %v1269_v60 = vsel %vm6414_vm7, %v6452_v46, 0  ;;  %v1471_v1 = vsel %vm6418_vm8, %v6452_v46, 0  ;;  %v1814_v14 = vsel %vm6525_vm13, %v6452_v46, 0 }
 0x449   : > { %v1210_v47 = vpop.f32.mrb[9].mxu0 }
 0x44a   : > { %v4378_v50 = vpop.f32.mrb[10].mxu0 }
 0x44b   : > { %v6464_v51 = vpack.c.bf16 %v4378_v50, %v4377_v21  ;;  %v1213_v52 = vpop.f32.mrb[11].mxu0 }
 0x44c   : > { %v6466_v29 = vpack.c.bf16 %v1213_v52, %v1210_v47 }
 0x44d   : > { %v1639_v4 = vsel %vm6418_vm8, %v6464_v51, 0 }
 0x44e   : > { %v1638_v2 = vsel %vm6418_vm8, %v6466_v29, 0  ;;  %v6612_v23 = vsel %vm6580_vm3, %v6466_v29, 0 }
 0x44f   : > { %4388 = vmatpush3.bf16.xpose.msra.mxu1 %v6470_v53  ;;  %4404 = vmatpush3.bf16.xpose.msra.mxu0 %v6470_v53 }
 0x450   : > { %v4381_v54 = vpop.f32.mrb[12].mxu0  ;;  %4594 = vmatprep.subr.msk.bf16.mxu1 %vm8703_vm0, %v6446_v40  ;;  %4598 = vmatprep.subr.msk.bf16.mxu0 %vm8703_vm0, %v6446_v40 }
 0x451   : > { %v1226_v38 = vpop.f32.mrb[13].mxu0 }
 0x452   : > { %v4382_v55 = vpop.f32.mrb[14].mxu0 }
 0x453   : > { %v6478_v56 = vpack.c.bf16 %v4382_v55, %v4381_v54  ;;  %v1229_v57 = vpop.f32.mrb[15].mxu0 }
 0x454   : > { %v6482_v58 = vpack.c.bf16 %v1229_v57, %v1226_v38 }
 0x455   : > { %v1641_v10 = vsel %vm6418_vm8, %v6478_v56, 0  ;;  %v6644_v26 = vsel %vm6580_vm3, %v6478_v56, 0 }
 0x456   : > { %v1640_v9 = vsel %vm6418_vm8, %v6482_v58, 0 }
 0x457   : > { %4390 = vmatpush3.bf16.xpose.msra.mxu1 %v6486_v59  ;;  %4406 = vmatpush3.bf16.xpose.msra.mxu0 %v6486_v59 }
 0x458   : > { %4599 = vmatprep.subr.msk.bf16.mxu1 %vm6418_vm8, %v6466_v29  ;;  %4607 = vmatprep.subr.msk.bf16.mxu0 %vm8703_vm0, %v6410_v18 }
 0x45e   : > { %4392 = vmatmul.mubr.msk.bf16.vlgmr.msra.gmra.mrb[8].mxu1 %vm8703_vm0, %v1268_v48  ;;  %4408 = vmatmul.mubr.msk.bf16.vlgmr.msra.gmra.mrb[16].mxu0 %vm8703_vm0, %v1470_v61 }
 0x45f   : > { %4395 = vmatprep.mubr.msk.bf16.mxu1 %vm8703_vm0, %v1269_v60  ;;  %4411 = vmatprep.mubr.msk.bf16.mxu0 %vm8703_vm0, %v1471_v1 }
 0x460   : > { %4416 = vmatpush3.bf16.msra.mxu1 %v1638_v2  ;;  %4448 = vmatpush3.bf16.xpose.msra.mxu0 %v6430_v25 }
 0x461   : > { %4600 = vmatprep.subr.msk.bf16.mxu1 %vm6418_vm8, %v6464_v51  ;;  %4608 = vmatprep.subr.msk.bf16.mxu0 %vm8703_vm0, %v6408_v13 }
 0x464   : > { %4418 = vmatpush3.bf16.msra.mxu1 %v1639_v4 }
 0x465   : > { %4601 = vmatprep.subr.msk.bf16.mxu1 %vm6418_vm8, %v6482_v58 }
 0x466   : > { %4396 = vmatmul.mubr.msk.bf16.gmra.mrb[12].mxu1 %vm8703_vm0, %v1270_v6  ;;  %4412 = vmatmul.mubr.msk.bf16.gmra.mrb[20].mxu0 %vm8703_vm0, %v1472_v7 }
 0x467   : > { %4455 = vmatprep.mubr.msk.bf16.mxu0 %vm8703_vm0, %v1812_v8 }
 0x468   : > { %4420 = vmatpush3.bf16.msra.mxu1 %v1640_v9  ;;  %4450 = vmatpush3.bf16.xpose.msra.mxu0 %v6456_v28 }
 0x469   : > { %4602 = vmatprep.subr.msk.bf16.mxu1 %vm6418_vm8, %v6478_v56  ;;  %4609 = vmatprep.subr.msk.bf16.mxu0 %vm8703_vm0, %v6448_v44 }
 0x46c   : > { %4422 = vmatpush3.bf16.msra.mxu1 %v1641_v10 }
 0x46d   : > { %4603 = vmatprep.subr.msk.bf16.mxu1 %vm6414_vm7, %v6466_v29 }
 0x470   : > { %4452 = vmatpush3.bf16.xpose.msra.mxu0 %v6470_v53 }
 0x471   : > { %4610 = vmatprep.subr.msk.bf16.mxu0 %vm8703_vm0, %v6446_v40 }
 0x478   : > { %4454 = vmatpush3.bf16.xpose.msra.mxu0 %v6486_v59 }
 0x479   : > { %4615 = vmatprep.subr.msk.bf16.mxu0 %vm8703_vm0, %v6410_v18  ;;  %v2088_v18 = vsel %vm6580_vm3, %v6452_v46, 0 }
 0x47f   : > { %4456 = vmatmul.mubr.msk.bf16.vlgmr.msra.gmra.mrb[24].mxu0 %vm8703_vm0, %v1813_v12 }
 0x480   : > { %4459 = vmatprep.mubr.msk.bf16.mxu0 %vm8703_vm0, %v1814_v14  ;;  %4480 = vmatpush3.bf16.xpose.msra.mxu0 %v6430_v25  ;;  %v6635_v25 = vsel %vm6580_vm3, %v6482_v58, 0 }
 0x481   : > { %4616 = vmatprep.subr.msk.bf16.mxu0 %vm8703_vm0, %v6408_v13  ;;  %v2087_v13 = vsel %vm6580_vm3, %v6412_v19, 0  ;;  %v6622_v19 = vsel %vm6580_vm3, %v6464_v51, 0 }
 0x487   : > { %4460 = vmatmul.mubr.msk.bf16.gmra.mrb[28].mxu0 %vm8703_vm0, %v1815_v16 }
 0x488   : > { %4482 = vmatpush3.bf16.xpose.msra.mxu0 %v6456_v28  ;;  %4487 = vmatprep.mubr.msk.bf16.mxu0 %vm8703_vm0, %v2086_v17 }
 0x489   : > { %4617 = vmatprep.subr.msk.bf16.mxu0 %vm8703_vm0, %v6448_v44 }
 0x490   : > { %4484 = vmatpush3.bf16.xpose.msra.mxu0 %v6470_v53 }
 0x491   : > { %4618 = vmatprep.subr.msk.bf16.mxu0 %vm8703_vm0, %v6446_v40 }
 0x498   : > { %4486 = vmatpush3.bf16.xpose.msra.mxu0 %v6486_v59 }
 0x499   : > { %4619 = vmatprep.subr.msk.bf16.mxu0 %vm6580_vm3, %v6466_v29 }
 0x49f   : > { %4488 = vmatmul.mubr.msk.bf16.vlgmr.msra.gmra.mrb[32].mxu0 %vm8703_vm0, %v2087_v13 }
 0x4a0   : > { %4491 = vmatprep.mubr.msk.bf16.mxu0 %vm8703_vm0, %v2088_v18  ;;  %4496 = vmatpush3.bf16.msra.mxu0 %v6612_v23 }
 0x4a1   : > { %4621 = vmatprep.subr.msk.bf16.mxu0 %vm6580_vm3, %v6464_v51 }
 0x4a4   : > { %4498 = vmatpush3.bf16.msra.mxu0 %v6622_v19 }
 0x4a5   : > { %4623 = vmatprep.subr.msk.bf16.mxu0 %vm6580_vm3, %v6482_v58 }
 0x4a7   : > { %4492 = vmatmul.mubr.msk.bf16.gmra.mrb[36].mxu0 %vm8703_vm0, %v2089_v24 }
 0x4a8   : > { %4500 = vmatpush3.bf16.msra.mxu0 %v6635_v25 }
 0x4a9   : > { %4625 = vmatprep.subr.msk.bf16.mxu0 %vm6580_vm3, %v6478_v56 }
 0x4ac   : > { %4502 = vmatpush3.bf16.msra.mxu0 %v6644_v26 }
 0x531   : > { %v6647_v27 = vpop.f32.mrb[8].mxu1  ;;  %v6649_v30 = vpop.f32.mrb[16].mxu0 }
 0x532   : > { %v6651_v31 = vpop.f32.mrb[9].mxu1  ;;  %v6653_v32 = vpop.f32.mrb[17].mxu0  ;;  %v1556_v33 = vsel %vm1360_vm4, %v6649_v30, -inf  ;;  %v1367_v57 = vsel %vm1360_vm4, %v6647_v27, -inf }
 0x533   : > { %v6657_v34 = vpop.f32.mrb[10].mxu1  ;;  %1557 = vmax.xlane.f32.xlu0 %v1556_v33  ;;  %v6659_v35 = vpop.f32.mrb[18].mxu0  ;;  %v1550_v20 = vsel %vm1360_vm4, %v6653_v32, -inf  ;;  %v1361_v46 = vsel %vm1360_vm4, %v6651_v31, -inf }
 0x534   : > { %v6661_v36 = vpop.f32.mrb[11].mxu1  ;;  %v6663_v37 = vpop.f32.mrb[19].mxu0  ;;  %v1559_v40 = vsel %vm1360_vm4, %v6659_v35, -inf  ;;  %v1370_v59 = vsel %vm1360_vm4, %v6657_v34, -inf }
 0x535   : > { %1560 = vmax.xlane.f32.xlu1 %v1559_v40  ;;  %v1553_v41 = vsel %vm1360_vm4, %v6663_v37, -inf  ;;  %v1364_v52 = vsel %vm1360_vm4, %v6661_v36, -inf }
 0x537   : > { %1551 = vmax.xlane.f32.xlu0 %v1550_v20 }
 0x539   : > { %1554 = vmax.xlane.f32.xlu1 %v1553_v41  ;;  %v6671_v42 = vpop.f32.mrb[12].mxu1  ;;  %v6673_v43 = vpop.f32.mrb[20].mxu0 }
 0x53a   : > { %v6675_v44 = vpop.f32.mrb[13].mxu1  ;;  %v6677_v45 = vpop.f32.mrb[21].mxu0  ;;  %v1568_v53 = vsel %vm1360_vm4, %v6673_v43, -inf  ;;  %v1379_v61 = vsel %vm1360_vm4, %v6671_v42, -inf }
 0x53b   : > { %1362 = vmax.xlane.f32.xlu0 %v1361_v46  ;;  %v6681_v28 = vpop.f32.mrb[14].mxu1  ;;  %v6683_v21 = vpop.f32.mrb[22].mxu0  ;;  %v1562_v38 = vsel %vm1360_vm4, %v6677_v45, -inf  ;;  %v1373_v39 = vsel %vm1360_vm4, %v6675_v44, -inf }
 0x53c   : > { %v6685_v47 = vpop.f32.mrb[15].mxu1  ;;  %v6687_v50 = vpop.f32.mrb[23].mxu0  ;;  %v1571_v54 = vsel %vm1360_vm4, %v6683_v21, -inf  ;;  %v1382_v48 = vsel %vm1360_vm4, %v6681_v28, -inf }
 0x53d   : > { %1365 = vmax.xlane.f32.xlu1 %v1364_v52  ;;  %v1565_v55 = vsel %vm1360_vm4, %v6687_v50, -inf  ;;  %v1376_v60 = vsel %vm1360_vm4, %v6685_v47, -inf }
 0x53f   : > { %1569 = vmax.xlane.f32.xlu0 %v1568_v53 }
 0x541   : > { %1572 = vmax.xlane.f32.xlu1 %v1571_v54 }
 0x543   : > { %1563 = vmax.xlane.f32.xlu0 %v1562_v38 }
 0x545   : > { %1566 = vmax.xlane.f32.xlu1 %v1565_v55 }
 0x547   : > { %1368 = vmax.xlane.f32.xlu0 %v1367_v57 }
 0x549   : > { %1371 = vmax.xlane.f32.xlu1 %v1370_v59 }
 0x54b   : > { %1374 = vmax.xlane.f32.xlu0 %v1373_v39 }
 0x54d   : > { %1383 = vmax.xlane.f32.xlu1 %v1382_v48 }
 0x54f   : > { %1380 = vmax.xlane.f32.xlu0 %v1379_v61 }
 0x551   : > { %1377 = vmax.xlane.f32.xlu1 %v1376_v60 }
 0x552   : > { %v6711_v1 = vpop.f32.mrb[24].mxu0 }
 0x553   : > { %v6713_v2 = vpop.f32.mrb[25].mxu0  ;;  %v1899_v3 = vsel %vm1360_vm4, %v6711_v1, -inf }
 0x554   : > { %v6717_v4 = vpop.f32.mrb[26].mxu0  ;;  %1900 = vmax.xlane.f32.xlu0 %v1899_v3  ;;  %v1893_v8 = vsel %vm1360_vm4, %v6713_v2, -inf }
 0x555   : > { %v6719_v6 = vpop.f32.mrb[27].mxu0  ;;  %v1902_v7 = vsel %vm1360_vm4, %v6717_v4, -inf }
 0x556   : > { %1903 = vmax.xlane.f32.xlu1 %v1902_v7  ;;  %v1896_v9 = vsel %vm1360_vm4, %v6719_v6, -inf }
 0x558   : > { %1894 = vmax.xlane.f32.xlu0 %v1893_v8 }
 0x55a   : > { %v6727_v10 = vpop.f32.mrb[28].mxu0  ;;  %1897 = vmax.xlane.f32.xlu1 %v1896_v9 }
 0x55b   : > { %v6729_v11 = vpop.f32.mrb[29].mxu0  ;;  %v1911_v12 = vsel %vm1360_vm4, %v6727_v10, -inf }
 0x55c   : > { %v6733_v14 = vpop.f32.mrb[30].mxu0  ;;  %1912 = vmax.xlane.f32.xlu0 %v1911_v12  ;;  %v1905_v17 = vsel %vm1360_vm4, %v6729_v11, -inf }
 0x55d   : > { %v6735_v62 = vpop.f32.mrb[31].mxu0  ;;  %v1914_v16 = vsel %vm1360_vm4, %v6733_v14, -inf }
 0x55e   : > { %1915 = vmax.xlane.f32.xlu1 %v1914_v16  ;;  %v1908_v13 = vsel %vm1360_vm4, %v6735_v62, -inf }
 0x560   : > { %1906 = vmax.xlane.f32.xlu0 %v1905_v17 }
 0x562   : > { %1909 = vmax.xlane.f32.xlu1 %v1908_v13 }
 0x572   : > { %v6743_v18 = vpop.f32.mrb[32].mxu0 }
 0x573   : > { %v6745_v24 = vpop.f32.mrb[33].mxu0  ;;  %v2173_v46 = vsel %vm1360_vm4, %v6743_v18, -inf }
 0x574   : > { %v6747_v33 = vpop.f32.mrb[34].mxu0  ;;  %v2167_v40 = vsel %vm1360_vm4, %v6745_v24, -inf }
 0x575   : > { %v6751_v20 = vpop.f32.mrb[35].mxu0  ;;  %2168 = vmax.xlane.f32.xlu0 %v2167_v40  ;;  %v2176_v53 = vsel %vm1360_vm4, %v6747_v33, -inf }
 0x576   : > { %v2170_v41 = vsel %vm1360_vm4, %v6751_v20, -inf }
 0x577   : > { %2171 = vmax.xlane.f32.xlu1 %v2170_v41 }
 0x579   : > { %2174 = vmax.xlane.f32.xlu0 %v2173_v46 }
 0x57a   : > { %v6757_v52 = vpop.f32.mrb[36].mxu0 }
 0x57b   : > { %v6761_v54 = vpop.f32.mrb[37].mxu0  ;;  %2177 = vmax.xlane.f32.xlu1 %v2176_v53  ;;  %v2185_v39 = vsel %vm1360_vm4, %v6757_v52, -inf }
 0x57c   : > { %v6763_v38 = vpop.f32.mrb[38].mxu0  ;;  %v2179_v55 = vsel %vm1360_vm4, %v6761_v54, -inf }
 0x57d   : > { %v6767_v57 = vpop.f32.mrb[39].mxu0  ;;  %2180 = vmax.xlane.f32.xlu0 %v2179_v55  ;;  %v2188_v48 = vsel %vm1360_vm4, %v6763_v38, -inf }
 0x57e   : > { %v2182_v59 = vsel %vm1360_vm4, %v6767_v57, -inf }
 0x57f   : > { %2183 = vmax.xlane.f32.xlu1 %v2182_v59 }
 0x581   : > { %2186 = vmax.xlane.f32.xlu0 %v2185_v39 }
 0x583   : > { %2189 = vmax.xlane.f32.xlu1 %v2188_v48 }
 0x5c0   : > { %v1558_v61 = vpop.xlane.xlu0 %1557 }
 0x5c1   : > { %v1576_v60 = vsub.f32 %v6649_v30, %v1558_v61 }
 0x5c2   : > { %v1561_v3 = vpop.xlane.xlu1 %1560 }
 0x5c3   : > { %v1586_v7 = vmul.f32 1.442695, %v1576_v60  ;;  %v1577_v8 = vsub.f32 %v6659_v35, %v1561_v3 }
 0x5c4   : > { %v1552_v9 = vpop.xlane.xlu0 %1551 }
 0x5c5   : > { %4887 = vpow2.f32 %v1586_v7  ;;  %v1588_v12 = vmul.f32 1.442695, %v1577_v8  ;;  %v1574_v16 = vsub.f32 %v6653_v32, %v1552_v9 }
 0x5c6   : > { %v1555_v17 = vpop.xlane.xlu1 %1554 }
 0x5c7   : > { %4889 = vpow2.f32 %v1588_v12  ;;  %v1582_v13 = vmul.f32 1.442695, %v1574_v16  ;;  %v1575_v40 = vsub.f32 %v6663_v37, %v1555_v17 }
 0x5c8   : > { %v1363_v41 = vpop.xlane.xlu0 %1362 }
 0x5c9   : > { %4891 = vpow2.f32 %v1582_v13  ;;  %v1584_v46 = vmul.f32 1.442695, %v1575_v40  ;;  %v1385_v53 = vsub.f32 %v6651_v31, %v1363_v41 }
 0x5ca   : > { %v1366_v30 = vpop.xlane.xlu1 %1365 }
 0x5cb   : > { %4893 = vpow2.f32 %v1584_v46  ;;  %v1393_v55 = vmul.f32 1.442695, %v1385_v53  ;;  %v1386_v35 = vsub.f32 %v6661_v36, %v1366_v30 }
 0x5cc   : > { %v1570_v59 = vpop.xlane.xlu0 %1569 }
 0x5cd   : > { %4895 = vpow2.f32 %v1393_v55  ;;  %v1395_v39 = vmul.f32 1.442695, %v1386_v35  ;;  %v1580_v32 = vsub.f32 %v6673_v43, %v1570_v59 }
 0x5ce   : > { %v1573_v48 = vpop.xlane.xlu1 %1572 }
 0x5cf   : > { %v6782_v61 = vpop.eup %4887  ;;  %4897 = vpow2.f32 %v1395_v39  ;;  %v1594_v37 = vmul.f32 1.442695, %v1580_v32  ;;  %v1581_v60 = vsub.f32 %v6683_v21, %v1573_v48 }
 0x5d0   : > { %v1564_v3 = vpop.xlane.xlu0 %1563  ;;  %v1604_v31 = vsel %vm1360_vm4, %v6782_v61, 0.0 }
 0x5d1   : > { %v6787_v7 = vpop.eup %4889  ;;  %4899 = vpow2.f32 %v1594_v37  ;;  %v1596_v36 = vmul.f32 1.442695, %v1581_v60  ;;  %v1578_v8 = vsub.f32 %v6677_v45, %v1564_v3  ;;  %1605 = vadd.xlane.f32.xlu0 %v1604_v31 }
 0x5d2   : > { %v1567_v9 = vpop.xlane.xlu1 %1566  ;;  %v1607_v43 = vsel %vm1360_vm4, %v6787_v7, 0.0 }
 0x5d3   : > { %v6792_v12 = vpop.eup %4891  ;;  %4901 = vpow2.f32 %v1596_v36  ;;  %v1590_v16 = vmul.f32 1.442695, %v1578_v8  ;;  %v1579_v21 = vsub.f32 %v6687_v50, %v1567_v9  ;;  %1608 = vadd.xlane.f32.xlu1 %v1607_v43 }
 0x5d4   : > { %v1369_v17 = vpop.xlane.xlu0 %1368  ;;  %v1598_v13 = vsel %vm1360_vm4, %v6792_v12, 0.0 }
 0x5d5   : > { %v6797_v40 = vpop.eup %4893  ;;  %4903 = vpow2.f32 %v1590_v16  ;;  %v1592_v45 = vmul.f32 1.442695, %v1579_v21  ;;  %v1387_v41 = vsub.f32 %v6647_v27, %v1369_v17  ;;  %1599 = vadd.xlane.f32.xlu0 %v1598_v13 }
 0x5d6   : > { %v1372_v46 = vpop.xlane.xlu1 %1371  ;;  %v1601_v53 = vsel %vm1360_vm4, %v6797_v40, 0.0 }
 0x5d7   : > { %v6802_v30 = vpop.eup %4895  ;;  %4905 = vpow2.f32 %v1592_v45  ;;  %v1397_v50 = vmul.f32 1.442695, %v1387_v41  ;;  %v1388_v55 = vsub.f32 %v6657_v34, %v1372_v46  ;;  %1602 = vadd.xlane.f32.xlu1 %v1601_v53 }
 0x5d8   : > { %v1375_v35 = vpop.xlane.xlu0 %1374  ;;  %v1409_v59 = vsel %vm1360_vm4, %v6802_v30, 0.0 }
 0x5d9   : > { %v6807_v39 = vpop.eup %4897  ;;  %4907 = vpow2.f32 %v1397_v50  ;;  %v1399_v27 = vmul.f32 1.442695, %v1388_v55  ;;  %v1389_v32 = vsub.f32 %v6675_v44, %v1375_v35  ;;  %1410 = vadd.xlane.f32.xlu0 %v1409_v59 }
 0x5da   : > { %v1384_v48 = vpop.xlane.xlu1 %1383  ;;  %v1412_v37 = vsel %vm1360_vm4, %v6807_v39, 0.0 }
 0x5db   : > { %v6812_v60 = vpop.eup %4899  ;;  %4909 = vpow2.f32 %v1399_v27  ;;  %v1401_v34 = vmul.f32 1.442695, %v1389_v32  ;;  %v1392_v3 = vsub.f32 %v6681_v28, %v1384_v48  ;;  %1413 = vadd.xlane.f32.xlu1 %v1412_v37 }
 0x5dc   : > { %v1381_v31 = vpop.xlane.xlu0 %1380  ;;  %v1616_v36 = vsel %vm1360_vm4, %v6812_v60, 0.0 }
 0x5dd   : > { %v6817_v8 = vpop.eup %4901  ;;  %4911 = vpow2.f32 %v1401_v34  ;;  %v1407_v44 = vmul.f32 1.442695, %v1392_v3  ;;  %v1391_v9 = vsub.f32 %v6671_v42, %v1381_v31  ;;  %1617 = vadd.xlane.f32.xlu0 %v1616_v36 }
 0x5de   : > { %v1378_v43 = vpop.xlane.xlu1 %1377  ;;  %v1619_v16 = vsel %vm1360_vm4, %v6817_v8, 0.0 }
 0x5df   : > { %v6822_v21 = vpop.eup %4903  ;;  %4913 = vpow2.f32 %v1407_v44  ;;  %v1405_v28 = vmul.f32 1.442695, %v1391_v9  ;;  %v1390_v17 = vsub.f32 %v6685_v47, %v1378_v43  ;;  %1620 = vadd.xlane.f32.xlu1 %v1619_v16 }
 0x5e0   : > { %v1610_v13 = vsel %vm1360_vm4, %v6822_v21, 0.0 }
 0x5e1   : > { %v6827_v45 = vpop.eup %4905  ;;  %4915 = vpow2.f32 %v1405_v28  ;;  %v1403_v41 = vmul.f32 1.442695, %v1390_v17  ;;  %v1901_v42 = vpop.xlane.xlu0 %1900  ;;  %1611 = vadd.xlane.f32.xlu0 %v1610_v13 }
 0x5e2   : > { %v1919_v46 = vsub.f32 %v6711_v1, %v1901_v42  ;;  %v1613_v53 = vsel %vm1360_vm4, %v6827_v45, 0.0 }
 0x5e3   : > { %v6832_v50 = vpop.eup %4907  ;;  %4917 = vpow2.f32 %v1403_v41  ;;  %v1904_v55 = vpop.xlane.xlu1 %1903  ;;  %1614 = vadd.xlane.f32.xlu1 %v1613_v53 }
 0x5e4   : > { %v1929_v47 = vmul.f32 1.442695, %v1919_v46  ;;  %v1920_v35 = vsub.f32 %v6717_v4, %v1904_v55  ;;  %v1415_v59 = vsel %vm1360_vm4, %v6832_v50, 0.0 }
 0x5e5   : > { %v6837_v27 = vpop.eup %4909  ;;  %v1895_v32 = vpop.xlane.xlu0 %1894  ;;  %1416 = vadd.xlane.f32.xlu0 %v1415_v59 }
 0x5e6   : > { %4919 = vpow2.f32 %v1929_v47  ;;  %v1931_v1 = vmul.f32 1.442695, %v1920_v35  ;;  %v1917_v48 = vsub.f32 %v6713_v2, %v1895_v32  ;;  %v1418_v37 = vsel %vm1360_vm4, %v6837_v27, 0.0 }
 0x5e7   : > { %v6842_v34 = vpop.eup %4911  ;;  %v1898_v3 = vpop.xlane.xlu1 %1897  ;;  %1419 = vadd.xlane.f32.xlu1 %v1418_v37 }
 0x5e8   : > { %4921 = vpow2.f32 %v1931_v1  ;;  %v1925_v4 = vmul.f32 1.442695, %v1917_v48  ;;  %v1918_v31 = vsub.f32 %v6719_v6, %v1898_v3  ;;  %v1421_v36 = vsel %vm1360_vm4, %v6842_v34, 0.0 }
 0x5e9   : > { %v6847_v44 = vpop.eup %4913  ;;  %v1913_v9 = vpop.xlane.xlu0 %1912  ;;  %1422 = vadd.xlane.f32.xlu0 %v1421_v36 }
 0x5ea   : > { %4923 = vpow2.f32 %v1925_v4  ;;  %v1927_v2 = vmul.f32 1.442695, %v1918_v31  ;;  %v1923_v43 = vsub.f32 %v6727_v10, %v1913_v9  ;;  %v1430_v16 = vsel %vm1360_vm4, %v6847_v44, 0.0 }
 0x5eb   : > { %v6852_v28 = vpop.eup %4915  ;;  %v1916_v17 = vpop.xlane.xlu1 %1915  ;;  %1431 = vadd.xlane.f32.xlu1 %v1430_v16 }
 0x5ec   : > { %4925 = vpow2.f32 %v1927_v2  ;;  %v1937_v6 = vmul.f32 1.442695, %v1923_v43  ;;  %v1924_v13 = vsub.f32 %v6733_v14, %v1916_v17  ;;  %v1427_v41 = vsel %vm1360_vm4, %v6852_v28, 0.0 }
 0x5ed   : > { %v6857_v42 = vpop.eup %4917  ;;  %v1907_v46 = vpop.xlane.xlu0 %1906  ;;  %1428 = vadd.xlane.f32.xlu0 %v1427_v41 }
 0x5ee   : > { %4927 = vpow2.f32 %v1937_v6  ;;  %v1939_v10 = vmul.f32 1.442695, %v1924_v13  ;;  %v1921_v53 = vsub.f32 %v6729_v11, %v1907_v46  ;;  %v1424_v55 = vsel %vm1360_vm4, %v6857_v42, 0.0 }
 0x5ef   : > { %v1910_v47 = vpop.xlane.xlu1 %1909  ;;  %1425 = vadd.xlane.f32.xlu1 %v1424_v55 }
 0x5f0   : > { %v6862_v35 = vpop.eup %4919  ;;  %4929 = vpow2.f32 %v1939_v10  ;;  %v1933_v14 = vmul.f32 1.442695, %v1921_v53  ;;  %v1922_v59 = vsub.f32 %v6735_v62, %v1910_v47 }
 0x5f1   : > { %v1947_v32 = vsel %vm1360_vm4, %v6862_v35, 0.0 }
 0x5f2   : > { %v6867_v1 = vpop.eup %4921  ;;  %4931 = vpow2.f32 %v1933_v14  ;;  %v1935_v48 = vmul.f32 1.442695, %v1922_v59  ;;  %1948 = vadd.xlane.f32.xlu0 %v1947_v32 }
 0x5f3   : > { %v1950_v11 = vsel %vm1360_vm4, %v6867_v1, 0.0 }
 0x5f4   : > { %v6871_v37 = vpop.eup %4923  ;;  %4933 = vpow2.f32 %v1935_v48  ;;  %1951 = vadd.xlane.f32.xlu1 %v1950_v11 }
 0x5f5   : > { %v1941_v3 = vsel %vm1360_vm4, %v6871_v37, 0.0 }
 0x5f6   : > { %v6875_v4 = vpop.eup %4925  ;;  %1942 = vadd.xlane.f32.xlu0 %v1941_v3 }
 0x5f7   : > { %v1944_v62 = vsel %vm1360_vm4, %v6875_v4, 0.0 }
 0x5f8   : > { %v6879_v31 = vpop.eup %4927  ;;  %1945 = vadd.xlane.f32.xlu1 %v1944_v62 }
 0x5f9   : > { %v1959_v36 = vsel %vm1360_vm4, %v6879_v31, 0.0 }
 0x5fa   : > { %v6883_v9 = vpop.eup %4929  ;;  %1960 = vadd.xlane.f32.xlu0 %v1959_v36 }
 0x5fb   : > { %v1962_v2 = vsel %vm1360_vm4, %v6883_v9, 0.0 }
 0x5fc   : > { %v6887_v43 = vpop.eup %4931  ;;  %1963 = vadd.xlane.f32.xlu1 %v1962_v2 }
 0x5fd   : > { %v1953_v16 = vsel %vm1360_vm4, %v6887_v43, 0.0 }
 0x5fe   : > { %v6891_v17 = vpop.eup %4933  ;;  %1954 = vadd.xlane.f32.xlu0 %v1953_v16 }
 0x5ff   : > { %v1956_v6 = vsel %vm1360_vm4, %v6891_v17, 0.0 }
 0x600   : > { %1957 = vadd.xlane.f32.xlu1 %v1956_v6 }
 0x602   : > { %v2169_v13 = vpop.xlane.xlu0 %2168 }
 0x603   : > { %v2191_v41 = vsub.f32 %v6745_v24, %v2169_v13 }
 0x604   : > { %v2172_v46 = vpop.xlane.xlu1 %2171 }
 0x605   : > { %v2199_v10 = vmul.f32 1.442695, %v2191_v41  ;;  %v2192_v53 = vsub.f32 %v6751_v20, %v2172_v46 }
 0x606   : > { %v2175_v55 = vpop.xlane.xlu0 %2174 }
 0x607   : > { %4935 = vpow2.f32 %v2199_v10  ;;  %v2201_v47 = vmul.f32 1.442695, %v2192_v53  ;;  %v2193_v14 = vsub.f32 %v6743_v18, %v2175_v55 }
 0x608   : > { %v2178_v59 = vpop.xlane.xlu1 %2177 }
 0x609   : > { %4937 = vpow2.f32 %v2201_v47  ;;  %v2203_v32 = vmul.f32 1.442695, %v2193_v14  ;;  %v2194_v48 = vsub.f32 %v6747_v33, %v2178_v59 }
 0x60a   : > { %v2181_v11 = vpop.xlane.xlu0 %2180 }
 0x60b   : > { %4939 = vpow2.f32 %v2203_v32  ;;  %v2205_v3 = vmul.f32 1.442695, %v2194_v48  ;;  %v2195_v62 = vsub.f32 %v6761_v54, %v2181_v11 }
 0x60c   : > { %v2184_v24 = vpop.xlane.xlu1 %2183 }
 0x60d   : > { %4941 = vpow2.f32 %v2205_v3  ;;  %v2207_v36 = vmul.f32 1.442695, %v2195_v62  ;;  %v2196_v20 = vsub.f32 %v6767_v57, %v2184_v24 }
 0x60e   : > { %v2187_v2 = vpop.xlane.xlu0 %2186 }
 0x60f   : > { %4943 = vpow2.f32 %v2207_v36  ;;  %v2209_v16 = vmul.f32 1.442695, %v2196_v20  ;;  %v2197_v18 = vsub.f32 %v6757_v52, %v2187_v2 }
 0x610   : > { %v2190_v6 = vpop.xlane.xlu1 %2189 }
 0x611   : > { %v6902_v13 = vpop.eup %4935  ;;  %4945 = vpow2.f32 %v2209_v16  ;;  %v2211_v33 = vmul.f32 1.442695, %v2197_v18  ;;  %v2198_v41 = vsub.f32 %v6763_v38, %v2190_v6 }
 0x612   : > { %v2215_v54 = vsel %vm1360_vm4, %v6902_v13, 0.0 }
 0x613   : > { %v6907_v46 = vpop.eup %4937  ;;  %4947 = vpow2.f32 %v2211_v33  ;;  %v2213_v10 = vmul.f32 1.442695, %v2198_v41  ;;  %2216 = vadd.xlane.f32.xlu0 %v2215_v54 }
 0x614   : > { %v2218_v57 = vsel %vm1360_vm4, %v6907_v46, 0.0 }
 0x615   : > { %v6911_v53 = vpop.eup %4939  ;;  %4949 = vpow2.f32 %v2213_v10  ;;  %2219 = vadd.xlane.f32.xlu1 %v2218_v57 }
 0x616   : > { %v2221_v52 = vsel %vm1360_vm4, %v6911_v53, 0.0 }
 0x617   : > { %v6915_v55 = vpop.eup %4941  ;;  %2222 = vadd.xlane.f32.xlu0 %v2221_v52 }
 0x618   : > { %v2224_v38 = vsel %vm1360_vm4, %v6915_v55, 0.0 }
 0x619   : > { %v6919_v47 = vpop.eup %4943  ;;  %2225 = vadd.xlane.f32.xlu1 %v2224_v38 }
 0x61a   : > { %v2227_v14 = vsel %vm1360_vm4, %v6919_v47, 0.0 }
 0x61b   : > { %v6923_v59 = vpop.eup %4945  ;;  %2228 = vadd.xlane.f32.xlu0 %v2227_v14 }
 0x61c   : > { %v2230_v32 = vsel %vm1360_vm4, %v6923_v59, 0.0 }
 0x61d   : > { %v6927_v48 = vpop.eup %4947  ;;  %2231 = vadd.xlane.f32.xlu1 %v2230_v32 }
 0x61e   : > { %v2233_v11 = vsel %vm1360_vm4, %v6927_v48, 0.0 }
 0x61f   : > { %v6931_v3 = vpop.eup %4949  ;;  %2234 = vadd.xlane.f32.xlu0 %v2233_v11 }
 0x620   : > { %v2236_v62 = vsel %vm1360_vm4, %v6931_v3, 0.0 }
 0x621   : > { %2237 = vadd.xlane.f32.xlu1 %v2236_v62 }
 0x65e   : > { %v1606_v24 = vpop.xlane.xlu0 %1605 }
 0x660   : > { %v1609_v36 = vpop.xlane.xlu1 %1608 }
 0x661   : > { %4951 = vrcp.f32 %v1609_v36 }
 0x662   : > { %v1600_v20 = vpop.xlane.xlu0 %1599 }
 0x663   : > { %4953 = vrcp.f32 %v1600_v20 }
 0x664   : > { %4955 = vrcp.f32 %v1606_v24  ;;  %v1603_v2 = vpop.xlane.xlu1 %1602 }
 0x665   : > { %4957 = vrcp.f32 %v1603_v2 }
 0x666   : > { %v1411_v16 = vpop.xlane.xlu0 %1410 }
 0x667   : > { %4959 = vrcp.f32 %v1411_v16 }
 0x668   : > { %v1414_v18 = vpop.xlane.xlu1 %1413 }
 0x669   : > { %4961 = vrcp.f32 %v1414_v18 }
 0x66a   : > { %v1618_v6 = vpop.xlane.xlu0 %1617 }
 0x66b   : > { %v4952_v33 = vpop.eup %4951 }
 0x66c   : > { %v1621_v41 = vpop.xlane.xlu1 %1620  ;;  %v1633_v38 = vmul.f32 %v4952_v33, %v6787_v7  ;;  %v1449_v7 = vsel %vm6414_vm7, %v6466_v29, 0  ;;  %v1450_v33 = vsel %vm6414_vm7, %v6464_v51, 0 }
 0x66d   : > { %v4954_v54 = vpop.eup %4953  ;;  %4963 = vrcp.f32 %v1621_v41 }
 0x66e   : > { %v4956_v10 = vpop.eup %4955  ;;  %v1612_v57 = vpop.xlane.xlu0 %1611  ;;  %v1630_v32 = vmul.f32 %v4954_v54, %v6792_v12 }
 0x66f   : > { %v4958_v52 = vpop.eup %4957  ;;  %4965 = vrcp.f32 %v1612_v57  ;;  %v1632_v62 = vmul.f32 %v4956_v10, %v6782_v61 }
 0x670   : > { %4967 = vrcp.f32 %v1618_v6  ;;  %v1615_v14 = vpop.xlane.xlu1 %1614  ;;  %v1631_v11 = vmul.f32 %v4958_v52, %v6797_v40 }
 0x671   : > { %4969 = vrcp.f32 %v1615_v14  ;;  %v1643_v20 = vpack.c.bf16 %v1633_v38, %v1632_v62  ;;  %v4960_v16 = vpop.eup %4959 }
 0x672   : > { %v1417_v24 = vpop.xlane.xlu0 %1416  ;;  %v1642_v36 = vpack.c.bf16 %v1631_v11, %v1630_v32  ;;  %v1451_v11 = vsel %vm6414_vm7, %v6482_v58, 0 }
 0x673   : > { %v4962_v40 = vpop.eup %4961 }
 0x674   : > { %4423 = vmatprep.mubr.msk.bf16.mxu1 %vm1360_vm4, %v1642_v36  ;;  %v1420_v2 = vpop.xlane.xlu1 %1419  ;;  %v1442_v32 = vmul.f32 %v4962_v40, %v6807_v39  ;;  %v1441_v36 = vmul.f32 %v4960_v16, %v6802_v30 }
 0x675   : > { %4424 = vmatmul.mubr.msk.bf16.vlgmr.msra.gmra.mrb[16].mxu1 %vm1360_vm4, %v1643_v20  ;;  %4971 = vrcp.f32 %v1420_v2 }
 0x676   : > { %4432 = vmatpush3.bf16.msra.mxu1 %v1449_v7  ;;  %v1423_v12 = vpop.xlane.xlu0 %1422  ;;  %4973 = vrcp.f32 %v1417_v24  ;;  %v1453_v39 = vpack.c.bf16 %v1442_v32, %v1441_v36 }
 0x677   : > { %4604 = vmatprep.subr.msk.bf16.mxu1 %vm6414_vm7, %v6464_v51  ;;  %v4964_v61 = vpop.eup %4963  ;;  %4975 = vrcp.f32 %v1423_v12 }
 0x678   : > { %v1432_v18 = vpop.xlane.xlu1 %1431  ;;  %v1637_v57 = vmul.f32 %v4964_v61, %v6817_v8 }
 0x679   : > { %v4966_v6 = vpop.eup %4965 }
 0x67a   : > { %v4968_v41 = vpop.eup %4967  ;;  %4434 = vmatpush3.bf16.msra.mxu1 %v1450_v33  ;;  %v1429_v54 = vpop.xlane.xlu0 %1428  ;;  %v1634_v38 = vmul.f32 %v4966_v6, %v6822_v21 }
 0x67b   : > { %v4970_v10 = vpop.eup %4969  ;;  %4605 = vmatprep.subr.msk.bf16.mxu1 %vm6414_vm7, %v6482_v58  ;;  %v1636_v62 = vmul.f32 %v4968_v41, %v6812_v60  ;;  %v1452_v60 = vsel %vm6414_vm7, %v6478_v56, 0 }
 0x67c   : > { %v1426_v52 = vpop.xlane.xlu1 %1425  ;;  %v1635_v14 = vmul.f32 %v4970_v10, %v6827_v45 }
 0x67d   : > { %4977 = vrcp.f32 %v1426_v52  ;;  %v1645_v21 = vpack.c.bf16 %v1637_v57, %v1636_v62  ;;  %v1983_v62 = vsel %vm6525_vm13, %v6482_v58, 0 }
 0x67e   : > { %4979 = vrcp.f32 %v1429_v54  ;;  %4436 = vmatpush3.bf16.msra.mxu1 %v1451_v11  ;;  %v1644_v24 = vpack.c.bf16 %v1635_v14, %v1634_v38  ;;  %v1981_v54 = vsel %vm6525_vm13, %v6466_v29, 0 }
 0x67f   : > { %v1949_v8 = vpop.xlane.xlu0 %1948  ;;  %4606 = vmatprep.subr.msk.bf16.mxu1 %vm6414_vm7, %v6478_v56  ;;  %v4972_v45 = vpop.eup %4971  ;;  %4981 = vrcp.f32 %v1432_v18 }
 0x680   : > { %4427 = vmatprep.mubr.msk.bf16.mxu1 %vm1360_vm4, %v1644_v24  ;;  %v4974_v2 = vpop.eup %4973  ;;  %v1444_v30 = vmul.f32 %v4972_v45, %v6837_v27 }
 0x681   : > { %v1952_v20 = vpop.xlane.xlu1 %1951  ;;  %4428 = vmatmul.mubr.msk.bf16.gmra.mrb[20].mxu1 %vm1360_vm4, %v1645_v21  ;;  %v4976_v16 = vpop.eup %4975  ;;  %v1443_v12 = vmul.f32 %v4974_v2, %v6832_v50 }
 0x682   : > { %4438 = vmatpush3.bf16.msra.mxu1 %v1452_v60  ;;  %4439 = vmatprep.mubr.msk.bf16.mxu1 %vm1360_vm4, %v1453_v39  ;;  %v1445_v33 = vmul.f32 %v4976_v16, %v6842_v34  ;;  %v1984_v39 = vsel %vm6525_vm13, %v6478_v56, 0 }
 0x683   : > { %v1943_v7 = vpop.xlane.xlu0 %1942  ;;  %4611 = vmatprep.subr.msk.bf16.mxu1 %vm6525_vm13, %v6466_v29  ;;  %v1454_v61 = vpack.c.bf16 %v1444_v30, %v1443_v12 }
 0x684   : > { %4983 = vrcp.f32 %v1943_v7 }
 0x685   : > { %4985 = vrcp.f32 %v1952_v20  ;;  %v1946_v40 = vpop.xlane.xlu1 %1945 }
 0x686   : > { %4987 = vrcp.f32 %v1946_v40 }
 0x687   : > { %v4978_v22 = vpop.eup %4977  ;;  %v1961_v18 = vpop.xlane.xlu0 %1960  ;;  %4989 = vrcp.f32 %v1949_v8 }
 0x688   : > { %v4980_v6 = vpop.eup %4979  ;;  %v1446_v27 = vmul.f32 %v4978_v22, %v6857_v42  ;;  %v1982_v42 = vsel %vm6525_vm13, %v6464_v51, 0 }
 0x689   : > { %v1964_v41 = vpop.xlane.xlu1 %1963  ;;  %4440 = vmatmul.mubr.msk.bf16.vlgmr.msra.gmra.mrb[16].mxu1 %vm1360_vm4, %v1454_v61  ;;  %v4982_v50 = vpop.eup %4981  ;;  %v1447_v52 = vmul.f32 %v4980_v6, %v6852_v28 }
 0x68a   : > { %4464 = vmatpush3.bf16.msra.mxu1 %v1981_v54  ;;  %v1455_v10 = vpack.c.bf16 %v1446_v27, %v1445_v33  ;;  %v1448_v38 = vmul.f32 %v4982_v50, %v6847_v44 }
 0x68b   : > { %v1955_v57 = vpop.xlane.xlu0 %1954  ;;  %4612 = vmatprep.subr.msk.bf16.mxu1 %vm6525_vm13, %v6464_v51 }
 0x68c   : > { %4991 = vrcp.f32 %v1955_v57  ;;  %4443 = vmatprep.mubr.msk.bf16.mxu1 %vm1360_vm4, %v1455_v10  ;;  %v1456_v28 = vpack.c.bf16 %v1448_v38, %v1447_v52  ;;  %v4859_v10 = vld [vmem:[#allocation16] sm:$0xff]   ;;  %v4860_v57 = vld [vmem:[#allocation16 + $0x8] sm:$0xff]  }
 0x68d   : > { %4993 = vrcp.f32 %v1964_v41  ;;  %v1958_v34 = vpop.xlane.xlu1 %1957 }
 0x68e   : > { %v4984_v14 = vpop.eup %4983  ;;  %4995 = vrcp.f32 %v1958_v34  ;;  %4466 = vmatpush3.bf16.msra.mxu1 %v1982_v42 }
 0x68f   : > { %v4986_v32 = vpop.eup %4985  ;;  %4613 = vmatprep.subr.msk.bf16.mxu1 %vm6525_vm13, %v6482_v58  ;;  %4997 = vrcp.f32 %v1961_v18  ;;  %v1973_v24 = vmul.f32 %v4984_v14, %v6871_v37 }
 0x690   : > { %v4988_v11 = vpop.eup %4987  ;;  %v1976_v8 = vmul.f32 %v4986_v32, %v6867_v1 }
 0x691   : > { %4444 = vmatmul.mubr.msk.bf16.gmra.mrb[20].mxu1 %vm1360_vm4, %v1456_v28  ;;  %v1974_v44 = vmul.f32 %v4988_v11, %v6875_v4  ;;  %v4990_v36 = vpop.eup %4989 }
 0x692   : > { %4468 = vmatpush3.bf16.msra.mxu1 %v1983_v62  ;;  %v1975_v45 = vmul.f32 %v4990_v36, %v6862_v35 }
 0x693   : > { %4614 = vmatprep.subr.msk.bf16.mxu1 %vm6525_vm13, %v6478_v56  ;;  %v1985_v21 = vpack.c.bf16 %v1974_v44, %v1973_v24 }
 0x694   : > { %v1986_v20 = vpack.c.bf16 %v1976_v8, %v1975_v45 }
 0x695   : > { %4471 = vmatprep.mubr.msk.bf16.mxu1 %vm1360_vm4, %v1985_v21 }
 0x696   : > { %v4992_v37 = vpop.eup %4991  ;;  %4470 = vmatpush3.bf16.msra.mxu1 %v1984_v39 }
 0x697   : > { %v4994_v4 = vpop.eup %4993  ;;  %4620 = vmatprep.subr.msk.bf16.mxu1 %vm6580_vm3, %v6466_v29  ;;  %v1977_v60 = vmul.f32 %v4992_v37, %v6887_v43 }
 0x698   : > { %v4996_v1 = vpop.eup %4995  ;;  %v1980_v30 = vmul.f32 %v4994_v4, %v6883_v9  ;;  %v4213_v4 = vld [vmem:[#allocation17] ss:$0 sm:$0xff] }
 0x699   : > { %4472 = vmatmul.mubr.msk.bf16.vlgmr.msra.gmra.mrb[16].mxu1 %vm1360_vm4, %v1986_v20  ;;  %v1978_v35 = vmul.f32 %v4996_v1, %v6891_v17  ;;  %v4998_v2 = vpop.eup %4997  ;;  %v5047_v1 = vld [vmem:[%s6270_s29 + $0x10] sm:$0xff] }
 0x69a   : > { %4563 = vmatpush3.bf16.msra.mxu1 %v6612_v23  ;;  %v1979_v29 = vmul.f32 %v4998_v2, %v6879_v31 }
 0x69b   : > { %4622 = vmatprep.subr.msk.bf16.mxu1 %vm6580_vm3, %v6464_v51  ;;  %v1987_v5 = vpack.c.bf16 %v1978_v35, %v1977_v60  ;;  %v5048_v35 = vld [vmem:[%s6270_s29] sm:$0xff] }
 0x69c   : > { %v1988_v43 = vpack.c.bf16 %v1980_v30, %v1979_v29 }
 0x69d   : > { %4475 = vmatprep.mubr.msk.bf16.mxu1 %vm1360_vm4, %v1987_v5 }
 0x69e   : > { %4564 = vmatpush3.bf16.msra.mxu1 %v6622_v19 }
 0x69f   : > { %4624 = vmatprep.subr.msk.bf16.mxu1 %vm6580_vm3, %v6482_v58 }
 0x6a0   : > { %v2217_v17 = vpop.xlane.xlu0 %2216 }
 0x6a1   : > { %4999 = vrcp.f32 %v2217_v17  ;;  %4476 = vmatmul.mubr.msk.bf16.gmra.mrb[20].mxu1 %vm1360_vm4, %v1988_v43  ;;  %v5049_v43 = vld [vmem:[%s6270_s29 + $0x18] sm:$0xff] }
 0x6a2   : > { %4565 = vmatpush3.bf16.msra.mxu1 %v6635_v25  ;;  %v2220_v51 = vpop.xlane.xlu1 %2219 }
 0x6a3   : > { %5001 = vrcp.f32 %v2220_v51  ;;  %4626 = vmatprep.subr.msk.bf16.mxu1 %vm6580_vm3, %v6478_v56  ;;  %v5050_v51 = vld [vmem:[%s6270_s29 + $0x8] sm:$0xff] }
 0x6a4   : > { %v2223_v23 = vpop.xlane.xlu0 %2222 }
 0x6a5   : > { %5003 = vrcp.f32 %v2223_v23 }
 0x6a6   : > { %4566 = vmatpush3.bf16.msra.mxu1 %v6644_v26  ;;  %v2226_v19 = vpop.xlane.xlu1 %2225 }
 0x6a7   : > { %5005 = vrcp.f32 %v2226_v19  ;;  %4511 = vmatprep.subr.bf16.mxu1 %v4859_v10 }
 0x6a8   : > { %v2229_v58 = vpop.xlane.xlu0 %2228 }
 0x6a9   : > { %5007 = vrcp.f32 %v2229_v58 }
 0x6aa   : > { %v2232_v31 = vpop.xlane.xlu1 %2231 }
 0x6ab   : > { %v5000_v9 = vpop.eup %4999  ;;  %5009 = vrcp.f32 %v2232_v31 }
 0x6ac   : > { %v2235_v7 = vpop.xlane.xlu0 %2234  ;;  %v2247_v12 = vmul.f32 %v5000_v9, %v6902_v13 }
 0x6ad   : > { %v5002_v16 = vpop.eup %5001  ;;  %5011 = vrcp.f32 %v2235_v7 }
 0x6ae   : > { %v2238_v25 = vpop.xlane.xlu1 %2237  ;;  %v2248_v15 = vmul.f32 %v5002_v16, %v6907_v46 }
 0x6af   : > { %v5004_v56 = vpop.eup %5003  ;;  %5013 = vrcp.f32 %v2238_v25 }
 0x6b0   : > { %v2259_v40 = vpack.c.bf16 %v2248_v15, %v2247_v12  ;;  %v2249_v26 = vmul.f32 %v5004_v56, %v6911_v53  ;;  %v5051_v12 = vld [vmem:[%s6270_s29 + $0x30] sm:$0xff]  ;;  %v5052_v56 = vld [vmem:[%s6270_s29 + $0x20] sm:$0xff] }
 0x6b1   : > { %v5006_v22 = vpop.eup %5005 }
 0x6b2   : > { %v2250_v61 = vmul.f32 %v5006_v22, %v6915_v55  ;;  %4503 = vmatprep.mubr.msk.bf16.mxu0 %vm1360_vm4, %v2259_v40 }
 0x6b3   : > { %v5008_v18 = vpop.eup %5007 }
 0x6b4   : > { %v2260_v6 = vpack.c.bf16 %v2250_v61, %v2249_v26  ;;  %v2251_v27 = vmul.f32 %v5008_v18, %v6919_v47 }
 0x6b5   : > { %v5010_v33 = vpop.eup %5009 }
 0x6b6   : > { %4504 = vmatmul.mubr.msk.bf16.vlgmr.msra.gmra.mrb[40].mxu0 %vm1360_vm4, %v2260_v6  ;;  %v2252_v13 = vmul.f32 %v5010_v33, %v6923_v59  ;;  %v5053_v6 = vld [vmem:[%s6270_s29 + $0x38] sm:$0xff] }
 0x6b7   : > { %v5012_v46 = vpop.eup %5011 }
 0x6b8   : > { %v2261_v41 = vpack.c.bf16 %v2252_v13, %v2251_v27  ;;  %v2253_v50 = vmul.f32 %v5012_v46, %v6927_v48  ;;  %v5054_v27 = vld [vmem:[%s6270_s29 + $0x28] sm:$0xff]  ;;  %s5567_s29 = scalar_lea.vmem %s5566_s24, 2048 }
 0x6b9   : > { %v5014_v54 = vpop.eup %5013  ;;  %p5569_p1 = scmp.lt.s32.totalorder %s5567_s29, %s5561_s17 }
 0x6ba   : > { %v2254_v53 = vmul.f32 %v5014_v54, %v6931_v3  ;;  %4507 = vmatprep.mubr.msk.bf16.mxu1 %vm1360_vm4, %v2261_v41 }
 0x6bb   : > { %p5570_p13 = por %p5569_p1, %p5568_p12 }
 0x6bc   : > { %v2262_v55 = vpack.c.bf16 %v2254_v53, %v2253_v50 }
 0x6bd   : > { %p5571_p0 = pnand %p5570_p13, %p5564_p4 }
 0x6be   : > { %4508 = vmatmul.mubr.msk.bf16.vlgmr.msra.gmra.mrb[20].mxu1 %vm1360_vm4, %v2262_v55 }
 0x6bf   : > { %4512 = vmatpush3.bf16.msra.mxu1 %v4859_v10 }
 0x6c0   : > { %4513 = vmatprep.subr.bf16.mxu1 %v4860_v57 }
 0x6c3   : > { %4514 = vmatpush3.bf16.msra.mxu1 %v4860_v57 }
 0x76c   : > { %v4473_v47 = vpop.f32.mrb[16].mxu1 }
 0x76d   : > { %v2035_v59 = vpop.f32.mrb[17].mxu1 }
 0x76e   : > { %v4474_v52 = vpop.f32.mrb[18].mxu1 }
 0x76f   : > { %v2038_v34 = vpop.f32.mrb[19].mxu1 }
 0x789   : > { %v4505_v42 = vpop.f32.mrb[40].mxu0 }
 0x78a   : > { %v4567_v38 = vadd.f32 %v4505_v42, %v4473_v47  ;;  %v2309_v48 = vpop.f32.mrb[41].mxu0 }
 0x78b   : > { %v4568_v14 = vadd.f32 %v2309_v48, %v2035_v59  ;;  %v4506_v3 = vpop.f32.mrb[42].mxu0 }
 0x78c   : > { %v4569_v32 = vadd.f32 %v4506_v3, %v4474_v52  ;;  %v2312_v28 = vpop.f32.mrb[43].mxu0 }
 0x78d   : > { %v4570_v11 = vadd.f32 %v2312_v28, %v2038_v34 }
 0x78e   : > { %v2349_v62 = vpack.c.bf16 %v4569_v32, %v4567_v38 }
 0x78f   : > { %v2348_v24 = vpack.c.bf16 %v4570_v11, %v4568_v14 }
 0x791   : > { %v4509_v44 = vpop.f32.mrb[20].mxu1  ;;  %4515 = vmatprep.mubr.msk.bf16.mxu1 %vm8703_vm0, %v2348_v24 }
 0x792   : > { %v2325_v36 = vpop.f32.mrb[21].mxu1  ;;  %4516 = vmatmul.mubr.msk.bf16.vlgmr.msra.gmra.mrb[24].mxu1 %vm8703_vm0, %v2349_v62 }
 0x793   : > { %v4510_v8 = vpop.f32.mrb[22].mxu1 }
 0x794   : > { %v2351_v21 = vpack.c.bf16 %v4510_v8, %v4509_v44  ;;  %v2328_v45 = vpop.f32.mrb[23].mxu1 }
 0x795   : > { %v2350_v39 = vpack.c.bf16 %v2328_v45, %v2325_v36 }
 0x797   : > { %4519 = vmatprep.mubr.msk.bf16.mxu1 %vm8703_vm0, %v2350_v39 }
 0x79a   : > { %4520 = vmatmul.mubr.msk.bf16.gmra.mrb[28].mxu1 %vm8703_vm0, %v2351_v21 }
 0x865   : > { %v4517_v37 = vpop.f32.mrb[24].mxu1 }
 0x866   : > { %v2414_v20 = vpop.f32.mrb[25].mxu1  ;;  %v2447_v60 = vadd.f32 %v5047_v1, %v4517_v37 }
 0x867   : > { %v2445_v2 = vadd.f32 %v5048_v35, %v2414_v20  ;;  %v4518_v5 = vpop.f32.mrb[26].mxu1 }
 0x868   : > { %v2417_v30 = vpop.f32.mrb[27].mxu1  ;;  %v2448_v17 = vadd.f32 %v5049_v43, %v4518_v5  ;;  %v7054_v19 = vadd.f32 %v4213_v4, %v2447_v60 }
 0x869   : > { %v7050_v29 = vadd.f32 %v4213_v4, %v2445_v2  ;;  %v2446_v23 = vadd.f32 %v5050_v51, %v2417_v30 }
 0x86a   : > { %8875 = vst [vmem:[#allocation50_spill] sm:$0xff] %v7054_v19  ;;  %v7060_v9 = vadd.f32 %v4213_v4, %v2448_v17  ;;  %v2476_v26 = vsel %vm8703_vm0, %v7054_v19, 0.0 }
 0x86b   : > { %8874 = vst [vmem:[#allocation49_spill] sm:$0xff] %v7050_v29  ;;  %v7056_v58 = vadd.f32 %v4213_v4, %v2446_v23  ;;  %v2470_v31 = vsel %vm8703_vm0, %v7050_v29, 0.0 }
 0x86c   : > { %2471 = vadd.xlane.f32.xlu0 %v2470_v31  ;;  %8877 = vst [vmem:[#allocation52_spill] sm:$0xff] %v7060_v9  ;;  %v2479_v46 = vsel %vm8703_vm0, %v7060_v9, 0.0 }
 0x86d   : > { %8876 = vst [vmem:[#allocation51_spill] sm:$0xff] %v7056_v58  ;;  %v4521_v7 = vpop.f32.mrb[28].mxu1  ;;  %v2473_v16 = vsel %vm8703_vm0, %v7056_v58, 0.0 }
 0x86e   : > { %2474 = vadd.xlane.f32.xlu1 %v2473_v16  ;;  %v2430_v25 = vpop.f32.mrb[29].mxu1  ;;  %v2451_v15 = vadd.f32 %v5051_v12, %v4521_v7  ;;  %v7126_v7 = vld [vmem:[#allocation5 + $0x8] sm:$0xff] }
 0x86f   : > { %v2449_v40 = vadd.f32 %v5052_v56, %v2430_v25  ;;  %v4522_v22 = vpop.f32.mrb[30].mxu1  ;;  %v7134_v56 = vld [vmem:[#allocation5] sm:$0xff] }
 0x870   : > { %2477 = vadd.xlane.f32.xlu0 %v2476_v26  ;;  %v2433_v61 = vpop.f32.mrb[31].mxu1  ;;  %v2452_v33 = vadd.f32 %v5053_v6, %v4522_v22  ;;  %v7074_v41 = vadd.f32 %v4213_v4, %v2451_v15  ;;  %v2715_v15 = vld [vmem:[#allocation7 + $0x8] sm:$0xff]  ;;  %v2723_v26 = vadd.s32 4294967295, %v7126_v7 }
 0x871   : > { %v7068_v18 = vadd.f32 %v4213_v4, %v2449_v40  ;;  %v2450_v13 = vadd.f32 %v5054_v27, %v2433_v61  ;;  %v2811_v61 = vadd.s32 4294967295, %v2715_v15  ;;  %v7142_v27 = vld [vmem:[#allocation7] sm:$0xff] }
 0x872   : > { %2480 = vadd.xlane.f32.xlu1 %v2479_v46  ;;  %8879 = vst [vmem:[#allocation54_spill] sm:$0xff] %v7074_v41  ;;  %v7080_v53 = vadd.f32 %v4213_v4, %v2452_v33  ;;  %v2488_v10 = vsel %vm8703_vm0, %v7074_v41, 0.0  ;;  %v2722_v33 = vadd.s32 4294967295, %v7134_v56  ;;  %vm2731_vm5 = vcmp.ge.s32.totalorder %v2723_v26, 0 }
 0x873   : > { %8878 = vst [vmem:[#allocation53_spill] sm:$0xff] %v7068_v18  ;;  %v7076_v54 = vadd.f32 %v4213_v4, %v2450_v13  ;;  %v2482_v50 = vsel %vm8703_vm0, %v7068_v18, 0.0  ;;  %vm2739_vm6 = vcmp.lt.s32.totalorder %v2723_v26, 8  ;;  %vm2819_vm7 = vcmp.ge.s32.totalorder %v2811_v61, 0  ;;  %v7294_v26 = vld [vmem:[#allocation7 + $0x28] sm:$0xff] }
 0x874   : > { %2483 = vadd.xlane.f32.xlu0 %v2482_v50  ;;  %8881 = vst [vmem:[#allocation56_spill] sm:$0xff] %v7080_v53  ;;  %v2491_v57 = vsel %vm8703_vm0, %v7080_v53, 0.0  ;;  %vm2827_vm8 = vcmp.lt.s32.totalorder %v2811_v61, 8  ;;  %vm2730_vm9 = vcmp.ge.s32.totalorder %v2722_v33, 0  ;;  %vm2738_vm10 = vcmp.lt.s32.totalorder %v2722_v33, 8  ;;  %vm7144_vm11 = vmand %vm2731_vm5, %vm2739_vm6 }
 0x875   : > { %8880 = vst [vmem:[#allocation55_spill] sm:$0xff] %v7076_v54  ;;  %v2485_v55 = vsel %vm8703_vm0, %v7076_v54, 0.0  ;;  %vm2842_vm12 = vcmp.ge.s32.totalorder %v7142_v27, 0  ;;  %vm2850_vm13 = vcmp.lt.s32.totalorder %v7142_v27, 8  ;;  %v2810_v46 = vadd.s32 4294967295, %v7142_v27  ;;  %vm7151_vm14 = vmand %vm2819_vm7, %vm2827_vm8 }
 0x876   : > { %2486 = vadd.xlane.f32.xlu1 %v2485_v55  ;;  %v8884_v50 = vmov 0  ;;  %vm7155_vm15 = vmand %vm2730_vm9, %vm2738_vm10  ;;  %v8886_v55 = vmov 0  ;;  %vm2843_vm5 = vcmp.ge.s32.totalorder %v2715_v15, 0  ;;  %vm2851_vm6 = vcmp.lt.s32.totalorder %v2715_v15, 8 }
 0x877   : > { %v8885_v50 = vsel %vm7151_vm14, 4294967295, %v8884_v50  ;;  %v8887_v55 = vsel %vm7155_vm15, 4294967295, %v8886_v55  ;;  %vm7159_vm1 = vmand %vm2842_vm12, %vm2850_vm13  ;;  %vm2818_vm2 = vcmp.ge.s32.totalorder %v2810_v46, 0  ;;  %vm2826_vm3 = vcmp.lt.s32.totalorder %v2810_v46, 8 }
 0x878   : > { %2489 = vadd.xlane.f32.xlu0 %v2488_v10  ;;  %v2867_v10 = vadd.s32 1, %v2715_v15  ;;  %vm2920_vm4 = vmand %vm7144_vm11, %vm7151_vm14  ;;  %v8917_v15 = vmov 0  ;;  %v8921_v13 = vmov 0  ;;  %v2815_v46 = vadd.s32 4294967295, %v7294_v26 }
 0x879   : > { %vm7180_vm10 = vmand %vm2818_vm2, %vm2826_vm3 }
 0x87a   : > { %2492 = vadd.xlane.f32.xlu1 %v2491_v57  ;;  %v8888_v57 = vmov 0  ;;  %vm2875_vm8 = vcmp.ge.s32.totalorder %v2867_v10, 0  ;;  %vm2883_vm9 = vcmp.lt.s32.totalorder %v2867_v10, 8  ;;  %vm7185_vm12 = vmand %vm2843_vm5, %vm2851_vm6 }
 0x87b   : > { %v8889_v57 = vsel %vm7159_vm1, 4294967295, %v8888_v57  ;;  %vm7190_vm13 = vmand %vm2875_vm8, %vm2883_vm9 }
 0x87c   : > { %vm2919_vm2 = vmand %vm7155_vm15, %vm7180_vm10  ;;  %vm8898_vm6 = vnez %v8889_v57 }
 0x8f9   : > { %v2472_v47 = vpop.xlane.xlu0 %2471 }
 0x8fa   : > { %v2494_v59 = vmul.f32 0.03125, %v2472_v47  ;;  %v7163_v47 = vld [vmem:[#allocation5 + $0x18] sm:$0xff] }
 0x8fb   : > { %v2475_v52 = vpop.xlane.xlu1 %2474 }
 0x8fc   : > { %v7089_v34 = vsub.f32 %v7050_v29, %v2494_v59  ;;  %v2495_v42 = vmul.f32 0.03125, %v2475_v52  ;;  %v7165_v59 = vld [vmem:[#allocation7 + $0x18] sm:$0xff]  ;;  %v7171_v52 = vld [vmem:[#allocation5 + $0x10] sm:$0xff] }
 0x8fd   : > { %v2478_v38 = vpop.xlane.xlu0 %2477  ;;  %v7961_v29 = vld [vmem:[#allocation23] ss:$0 sm:$0xff] }
 0x8fe   : > { %v7092_v48 = vsub.f32 %v7056_v58, %v2495_v42  ;;  %v2496_v14 = vmul.f32 0.03125, %v2478_v38  ;;  %v2510_v3 = vmul.f32 %v7089_v34, %v7089_v34  ;;  %v7177_v42 = vld [vmem:[#allocation7 + $0x10] sm:$0xff]  ;;  %v2725_v38 = vadd.s32 4294967295, %v7163_v47 }
 0x8ff   : > { %v2481_v32 = vpop.xlane.xlu1 %2480  ;;  %v2868_v33 = vadd.s32 1, %v7177_v42 }
 0x900   : > { %v7097_v28 = vsub.f32 %v7054_v19, %v2496_v14  ;;  %v2497_v11 = vmul.f32 0.03125, %v2481_v32  ;;  %v2518_v62 = vsel %vm8703_vm0, %v2510_v3, 0.0  ;;  %v2511_v24 = vmul.f32 %v7092_v48, %v7092_v48 }
 0x901   : > { %2519 = vadd.xlane.f32.xlu0 %v2518_v62  ;;  %v2484_v44 = vpop.xlane.xlu0 %2483  ;;  %v8890_v14 = vmov 0  ;;  %v2869_v3 = vadd.s32 1, %v7165_v59  ;;  %v8892_v32 = vmov 0  ;;  %v8894_v62 = vmov 0 }
 0x902   : > { %v7103_v36 = vsub.f32 %v7060_v9, %v2497_v11  ;;  %v2498_v8 = vmul.f32 0.03125, %v2484_v44  ;;  %v2521_v21 = vsel %vm8703_vm0, %v2511_v24, 0.0  ;;  %v2512_v45 = vmul.f32 %v7097_v28, %v7097_v28 }
 0x903   : > { %2522 = vadd.xlane.f32.xlu1 %v2521_v21  ;;  %v2487_v39 = vpop.xlane.xlu1 %2486  ;;  %v8891_v14 = vsel %vm7180_vm10, 4294967295, %v8890_v14  ;;  %v8893_v32 = vsel %vm7185_vm12, 4294967295, %v8892_v32  ;;  %v2724_v11 = vadd.s32 4294967295, %v7171_v52  ;;  %v8895_v62 = vsel %vm7190_vm13, 4294967295, %v8894_v62  ;;  %vm8899_vm12 = vmand %vm7155_vm15, %vm8898_vm6 }
 0x904   : > { %v7109_v37 = vsub.f32 %v7068_v18, %v2498_v8  ;;  %v2499_v4 = vmul.f32 0.03125, %v2487_v39  ;;  %v2524_v20 = vsel %vm8703_vm0, %v2512_v45, 0.0  ;;  %v2513_v1 = vmul.f32 %v7103_v36, %v7103_v36 }
 0x905   : > { %2525 = vadd.xlane.f32.xlu0 %v2524_v20  ;;  %v2490_v60 = vpop.xlane.xlu0 %2489  ;;  %v2812_v24 = vadd.s32 4294967295, %v7177_v42  ;;  %v2928_v44 = vsel %vm2920_vm4, 1, %v5687_v49  ;;  %vm2733_vm3 = vcmp.ge.s32.totalorder %v2725_v38, 0  ;;  %vm2741_vm5 = vcmp.lt.s32.totalorder %v2725_v38, 8 }
 0x906   : > { %v7115_v35 = vsub.f32 %v7076_v54, %v2499_v4  ;;  %v2500_v2 = vmul.f32 0.03125, %v2490_v60  ;;  %v2527_v5 = vsel %vm8703_vm0, %v2513_v1, 0.0  ;;  %v2514_v30 = vmul.f32 %v7109_v37, %v7109_v37  ;;  %vm7209_vm1 = vmand %vm2733_vm3, %vm2741_vm5  ;;  %v4861_v1 = vld [vmem:[#allocation22] sm:$0xff]  }
 0x907   : > { %2528 = vadd.xlane.f32.xlu1 %v2527_v5  ;;  %v2493_v43 = vpop.xlane.xlu1 %2492  ;;  %vm2877_vm8 = vcmp.ge.s32.totalorder %v2869_v3, 0  ;;  %vm2885_vm9 = vcmp.lt.s32.totalorder %v2869_v3, 8  ;;  %vm2732_vm4 = vcmp.ge.s32.totalorder %v2724_v11, 0  ;;  %vm2740_vm7 = vcmp.lt.s32.totalorder %v2724_v11, 8  ;;  %4523 = vmatprep.subr.bf16.mxu0 %v4861_v1 }
 0x908   : > { %v7121_v17 = vsub.f32 %v7074_v41, %v2500_v2  ;;  %v2501_v51 = vmul.f32 0.03125, %v2493_v43  ;;  %v2530_v23 = vsel %vm8703_vm0, %v2514_v30, 0.0  ;;  %v2515_v31 = vmul.f32 %v7115_v35, %v7115_v35  ;;  %4524 = vmatpush3.bf16.msra.mxu0 %v4861_v1  ;;  %v4862_v43 = vld [vmem:[#allocation22 + $0x8] sm:$0xff]  }
 0x909   : > { %2531 = vadd.xlane.f32.xlu0 %v2530_v23  ;;  %v2927_v8 = vsel %vm2919_vm2, 1, %v5687_v49  ;;  %vm2820_vm10 = vcmp.ge.s32.totalorder %v2812_v24, 0  ;;  %vm2828_vm14 = vcmp.lt.s32.totalorder %v2812_v24, 8  ;;  %v8896_v21 = vmov 0  ;;  %vm7224_vm2 = vmand %vm2732_vm4, %vm2740_vm7  ;;  %4525 = vmatprep.subr.bf16.mxu0 %v4862_v43 }
 0x90a   : > { %v7129_v16 = vsub.f32 %v7080_v53, %v2501_v51  ;;  %v2533_v25 = vsel %vm8703_vm0, %v2515_v31, 0.0  ;;  %v2516_v12 = vmul.f32 %v7121_v17, %v7121_v17  ;;  %v8897_v21 = vsel %vm7209_vm1, 4294967295, %v8896_v21  ;;  %vm7230_vm1 = vmand %vm2820_vm10, %vm2828_vm14 }
 0x90b   : > { %2534 = vadd.xlane.f32.xlu1 %v2533_v25  ;;  %v2813_v45 = vadd.s32 4294967295, %v7165_v59  ;;  %v3003_v39 = vsel %vm8899_vm12, 1, %v5687_v49  ;;  %v8900_v4 = vmov 0  ;;  %v8902_v20 = vmov 0  ;;  %vm8906_vm7 = vmand %vm7144_vm11, %vm7190_vm13 }
 0x90c   : > { %v2536_v40 = vsel %vm8703_vm0, %v2516_v12, 0.0  ;;  %v2517_v22 = vmul.f32 %v7129_v16, %v7129_v16  ;;  %v8903_v20 = vsel %vm7224_vm2, 4294967295, %v8902_v20  ;;  %vm2755_vm3 = vcmp.ge.s32.totalorder %v7126_v7, 0  ;;  %4526 = vmatpush3.bf16.msra.mxu0 %v4862_v43 }
 0x90d   : > { %2537 = vadd.xlane.f32.xlu0 %v2536_v40  ;;  %vm2763_vm5 = vcmp.lt.s32.totalorder %v7126_v7, 8  ;;  %v8904_v60 = vmov 0  ;;  %v3097_v2 = vsel %vm8906_vm7, 1, %v5687_v49  ;;  %vm8907_vm12 = vnez %v8897_v21  ;;  %vm2921_vm7 = vmand %vm7224_vm2, %vm7230_vm1  ;;  %v7287_v40 = vld [vmem:[#allocation5 + $0x28] sm:$0xff]  ;;  %v7360_v21 = vld [vmem:[#allocation7 + $0x38] sm:$0xff] }
 0x90e   : > { %v2539_v6 = vsel %vm8703_vm0, %v2517_v22, 0.0  ;;  %vm7220_vm0 = vmand %vm2877_vm8, %vm2885_vm9  ;;  %v8905_v60 = vsel %vm7230_vm1, 4294967295, %v8904_v60  ;;  %vm2821_vm9 = vcmp.ge.s32.totalorder %v2813_v45, 0  ;;  %vm2829_vm4 = vcmp.lt.s32.totalorder %v2813_v45, 8 }
 0x90f   : > { %2540 = vadd.xlane.f32.xlu1 %v2539_v6  ;;  %v8901_v4 = vsel %vm7220_vm0, 4294967295, %v8900_v4  ;;  %vm3091_vm8 = vmand %vm8907_vm12, %vm7220_vm0  ;;  %vm8908_vm14 = vnez %v8893_v32  ;;  %v8910_v30 = vmov 0  ;;  %vm2757_vm0 = vcmp.ge.s32.totalorder %v7163_v47, 0 }
 0x910   : > { %vm8909_vm10 = vmand %vm7144_vm11, %vm8908_vm14  ;;  %vm2765_vm13 = vcmp.lt.s32.totalorder %v7163_v47, 8  ;;  %v8912_v51 = vmov 0  ;;  %v3099_v23 = vsel %vm3091_vm8, 1, %v5687_v49  ;;  %vm8914_vm11 = vnez %v8885_v50 }
 0x911   : > { %v3004_v5 = vsel %vm8909_vm10, 1, %v5687_v49  ;;  %vm7250_vm6 = vmand %vm2755_vm3, %vm2763_vm5  ;;  %vm2844_vm5 = vcmp.ge.s32.totalorder %v7177_v42, 0  ;;  %vm2852_vm10 = vcmp.lt.s32.totalorder %v7177_v42, 8  ;;  %v2866_v31 = vadd.s32 1, %v7142_v27 }
 0x912   : > { %v8911_v30 = vsel %vm7250_vm6, 4294967295, %v8910_v30  ;;  %vm7260_vm15 = vmand %vm2821_vm9, %vm2829_vm4  ;;  %v2929_v25 = vsel %vm2921_vm7, 1, %v5687_v49  ;;  %v8915_v12 = vmov 0  ;;  %vm2845_vm4 = vcmp.ge.s32.totalorder %v7165_v59, 0 }
 0x913   : > { %v8913_v51 = vsel %vm7260_vm15, 4294967295, %v8912_v51  ;;  %vm3165_vm3 = vmand %vm7250_vm6, %vm8914_vm11  ;;  %vm2853_vm11 = vcmp.lt.s32.totalorder %v7165_v59, 8  ;;  %vm2882_vm7 = vcmp.lt.s32.totalorder %v2866_v31, 8  ;;  %v8919_v6 = vmov 0 }
 0x914   : > { %vm7273_vm9 = vmand %vm2757_vm0, %vm2765_vm13  ;;  %v3173_v22 = vsel %vm3165_vm3, 1, %v5687_v49  ;;  %vm2874_vm13 = vcmp.ge.s32.totalorder %v2866_v31, 0  ;;  %v2727_v27 = vadd.s32 4294967295, %v7287_v40  ;;  %v8924_v38 = vmov 0  ;;  %v7412_v31 = vld [vmem:[#allocation5 + $0x20] sm:$0xff] }
 0x915   : > { %v8916_v12 = vsel %vm7273_vm9, 4294967295, %v8915_v12  ;;  %vm2922_vm8 = vmand %vm8907_vm12, %vm7260_vm15  ;;  %v8929_v24 = vmov 0  ;;  %v8937_v43 = vmov 0  ;;  %v3053_v19 = vsub.s32 1, %v6399_v63 }
 0x916   : > { %vm7283_vm1 = vmand %vm2844_vm5, %vm2852_vm10  ;;  %v2930_v61 = vsel %vm2922_vm8, 1, %v5687_v49 }
 0x917   : > { %v8918_v15 = vsel %vm7283_vm1, 4294967295, %v8917_v15  ;;  %vm3167_vm0 = vmand %vm7273_vm9, %vm7260_vm15 }
 0x918   : > { %vm7297_vm5 = vmand %vm2845_vm4, %vm2853_vm11  ;;  %v3175_v10 = vsel %vm3167_vm0, 1, %v5687_v49  ;;  %vm2876_vm4 = vcmp.ge.s32.totalorder %v2868_v33, 0  ;;  %vm2735_vm0 = vcmp.ge.s32.totalorder %v2727_v27, 0  ;;  %vm2823_vm11 = vcmp.ge.s32.totalorder %v2815_v46, 0 }
 0x919   : > { %v8920_v6 = vsel %vm7297_vm5, 4294967295, %v8919_v6  ;;  %vm2997_vm3 = vmand %vm7224_vm2, %vm7283_vm1  ;;  %vm2743_vm1 = vcmp.lt.s32.totalorder %v2727_v27, 8  ;;  %vm2831_vm2 = vcmp.lt.s32.totalorder %v2815_v46, 8 }
 0x91a   : > { %vm7307_vm10 = vmand %vm2874_vm13, %vm2882_vm7  ;;  %v3005_v59 = vsel %vm2997_vm3, 1, %v5687_v49  ;;  %vm2884_vm13 = vcmp.lt.s32.totalorder %v2868_v33, 8  ;;  %vm8923_vm7 = vnez %v8887_v55  ;;  %v8935_v55 = vmov 0 }
 0x91b   : > { %v8922_v13 = vsel %vm7307_vm10, 4294967295, %v8921_v13  ;;  %vm3241_vm8 = vmand %vm7250_vm6, %vm8908_vm14  ;;  %v8946_v33 = vmov 0 }
 0x91c   : > { %vm3243_vm3 = vmand %vm7273_vm9, %vm7297_vm5  ;;  %v3249_v42 = vsel %vm3241_vm8, 1, %v5687_v49  ;;  %vm2847_vm8 = vcmp.ge.s32.totalorder %v7294_v26, 0 }
 0x91d   : > { %vm7331_vm14 = vmand %vm2876_vm4, %vm2884_vm13  ;;  %vm2855_vm4 = vcmp.lt.s32.totalorder %v7294_v26, 8 }
 0x91e   : > { %v8925_v38 = vsel %vm7331_vm14, 4294967295, %v8924_v38  ;;  %vm8926_vm15 = vmand %vm8907_vm12, %vm7297_vm5  ;;  %vm2762_vm12 = vcmp.lt.s32.totalorder %v7134_v56, 8 }
 0x91f   : > { %v3006_v3 = vsel %vm8926_vm15, 1, %v5687_v49  ;;  %vm7341_vm6 = vmand %vm2735_vm0, %vm2743_vm1  ;;  %vm8931_vm15 = vnez %v8903_v20  ;;  %vm2756_vm0 = vcmp.ge.s32.totalorder %v7171_v52, 0 }
 0x920   : > { %2939 = vperm.xlu1 %4852, %v2928_v44   ;;  %vm7345_vm9 = vmand %vm2823_vm11, %vm2831_vm2  ;;  %v7351_v44 = vld [vmem:[#allocation5 + $0x38] sm:$0xff]  ;;  %vm2754_vm2 = vcmp.ge.s32.totalorder %v7134_v56, 0 }
 0x921   : > { %v8930_v24 = vsel %vm7345_vm9, 4294967295, %v8929_v24  ;;  %vm8932_vm11 = vmand %vm8923_vm7, %vm7307_vm10  ;;  %v2729_v1 = vadd.s32 4294967295, %v7351_v44  ;;  %vm2857_vm10 = vcmp.lt.s32.totalorder %v7360_v21, 8 }
 0x922   : > { %v3096_v45 = vsel %vm8932_vm11, 1, %v5687_v49  ;;  %vm2924_vm13 = vmand %vm7341_vm6, %vm7345_vm9 }
 0x923   : > { %2936 = vperm.xlu0 %4851, %v2927_v8   ;;  %v3251_v8 = vsel %vm3243_vm3, 1, %v5687_v49  ;;  %vm2764_vm3 = vcmp.lt.s32.totalorder %v7171_v52, 8  ;;  %vm7374_vm1 = vmand %vm2847_vm8, %vm2855_vm4  ;;  %vm2737_vm11 = vcmp.ge.s32.totalorder %v2729_v1, 0 }
 0x924   : > { %3012 = vperm.xlu1 %4852, %v3003_v39   ;;  %v8933_v39 = vmov 0  ;;  %vm7379_vm5 = vmand %vm2754_vm2, %vm2762_vm12  ;;  %vm8940_vm2 = vnez %v8891_v14 }
 0x925   : > { %v8934_v39 = vsel %vm7374_vm1, 4294967295, %v8933_v39  ;;  %v8936_v55 = vsel %vm7379_vm5, 4294967295, %v8935_v55  ;;  %vm7385_vm7 = vmand %vm2756_vm0, %vm2764_vm3  ;;  %vm8941_vm0 = vnez %v8905_v60 }
 0x926   : > { %v8938_v43 = vsel %vm7385_vm7, 4294967295, %v8937_v43  ;;  %vm8939_vm8 = vmand %vm8931_vm15, %vm7331_vm14  ;;  %vm8943_vm14 = vnez %v8911_v30  ;;  %v2726_v30 = vadd.s32 4294967295, %v7412_v31 }
 0x927   : > { %3108 = vperm.xlu0 %4851, %v3097_v2   ;;  %v2817_v2 = vadd.s32 4294967295, %v7360_v21  ;;  %vm3000_vm4 = vmand %vm7341_vm6, %vm7374_vm1  ;;  %vm8942_vm1 = vnez %v8895_v62 }
 0x928   : > { %3015 = vperm.xlu1 %4852, %v3004_v5   ;;  %v2932_v5 = vsel %vm2924_vm13, 1, %v5687_v49  ;;  %vm3164_vm12 = vmand %vm7379_vm5, %vm8940_vm2  ;;  %vm2745_vm13 = vcmp.lt.s32.totalorder %v2729_v1, 8  ;;  %v3008_v20 = vsel %vm3000_vm4, 1, %v5687_v49  ;;  %vm2849_vm4 = vcmp.ge.s32.totalorder %v7360_v21, 0 }
 0x929   : > { %vm2825_vm15 = vcmp.ge.s32.totalorder %v2817_v2, 0  ;;  %vm3317_vm9 = vmand %vm8943_vm14, %vm8942_vm1  ;;  %vm8948_vm14 = vnez %v8889_v57  ;;  %v8955_v1 = vmov 0 }
 0x92a   : > { %vm7415_vm2 = vmand %vm2737_vm11, %vm2745_vm13  ;;  %v3325_v27 = vsel %vm3317_vm9, 1, %v5687_v49 }
 0x92b   : > { %3114 = vperm.xlu0 %4851, %v3099_v23   ;;  %v3098_v23 = vsel %vm8939_vm8, 1, %v5687_v49  ;;  %vm2833_vm8 = vcmp.lt.s32.totalorder %v2817_v2, 8  ;;  %vm8949_vm11 = vmand %vm7385_vm7, %vm8941_vm0 }
 0x92c   : > { %2942 = vperm.xlu1 %4852, %v2929_v25   ;;  %v3172_v25 = vsel %vm3164_vm12, 1, %v5687_v49  ;;  %vm7421_vm3 = vmand %vm2825_vm15, %vm2833_vm8  ;;  %vm2734_vm15 = vcmp.ge.s32.totalorder %v2726_v30, 0  ;;  %vm2742_vm8 = vcmp.lt.s32.totalorder %v2726_v30, 8 }
 0x92d   : > { %v8947_v33 = vsel %vm7421_vm3, 4294967295, %v8946_v33  ;;  %vm3240_vm12 = vmand %vm7379_vm5, %vm8948_vm14  ;;  %vm8952_vm14 = vnez %v8918_v15 }
 0x92e   : > { %vm2926_vm13 = vmand %vm7415_vm2, %vm7421_vm3 }
 0x92f   : > { %3184 = vperm.xlu0 %4851, %v3173_v22   ;;  %v8944_v22 = vmov 0  ;;  %vm7444_vm9 = vmand %vm2849_vm4, %vm2857_vm10 }
 0x930   : > { %2945 = vperm.xlu1 %4852, %v2930_v61   ;;  %v8945_v22 = vsel %vm7415_vm2, 4294967295, %v8944_v22  ;;  %v7419_v61 = vld [vmem:[#allocation7 + $0x20] sm:$0xff]  ;;  %vm3002_vm10 = vmand %vm7415_vm2, %vm7444_vm9 }
 0x931   : > { %v2814_v46 = vadd.s32 4294967295, %v7419_v61  ;;  %vm7459_vm4 = vmand %vm2734_vm15, %vm2742_vm8  ;;  %v3010_v2 = vsel %vm3002_vm10, 1, %v5687_v49  ;;  %vm2846_vm8 = vcmp.ge.s32.totalorder %v7419_v61, 0 }
 0x933   : > { %3190 = vperm.xlu0 %4851, %v3175_v10   ;;  %v3174_v10 = vsel %vm8949_vm11, 1, %v5687_v49  ;;  %vm2822_vm1 = vcmp.ge.s32.totalorder %v2814_v46, 0  ;;  %vm2830_vm0 = vcmp.lt.s32.totalorder %v2814_v46, 8  ;;  %vm8958_vm11 = vnez %v8916_v12 }
 0x934   : > { %3018 = vperm.xlu1 %4852, %v3005_v59   ;;  %v8950_v59 = vmov 0  ;;  %vm7464_vm5 = vmand %vm2822_vm1, %vm2830_vm0  ;;  %v2873_v12 = vadd.s32 1, %v7360_v21 }
 0x935   : > { %v8951_v59 = vsel %vm7444_vm9, 4294967295, %v8950_v59  ;;  %v8956_v1 = vsel %vm7464_vm5, 4294967295, %v8955_v1  ;;  %vm2854_vm9 = vcmp.lt.s32.totalorder %v7419_v61, 8  ;;  %vm8959_vm1 = vmand %vm7385_vm7, %vm8952_vm14 }
 0x936   : > { %vm7494_vm2 = vmand %vm2846_vm8, %vm2854_vm9  ;;  %vm2881_vm8 = vcmp.ge.s32.totalorder %v2873_v12, 0 }
 0x937   : > { %3260 = vperm.xlu0 %4851, %v3249_v42   ;;  %v2871_v42 = vadd.s32 1, %v7294_v26  ;;  %v8953_v26 = vmov 0  ;;  %vm2999_vm9 = vmand %vm7459_vm4, %vm7494_vm2 }
 0x938   : > { %3021 = vperm.xlu1 %4852, %v3006_v3   ;;  %v2934_v3 = vsel %vm2926_vm13, 1, %v5687_v49  ;;  %v8954_v26 = vsel %vm7459_vm4, 4294967295, %v8953_v26 }
 0x939   : > { %vm2879_vm3 = vcmp.ge.s32.totalorder %v2871_v42, 0  ;;  %vm2887_vm13 = vcmp.lt.s32.totalorder %v2871_v42, 8  ;;  %v2781_v42 = vadd.s32 1, %v7163_v47  ;;  %v3007_v47 = vsel %vm2999_vm9, 1, %v5687_v49 }
 0x93a   : > { %vm7483_vm0 = vmand %vm2879_vm3, %vm2887_vm13  ;;  %vm8975_vm9 = vnez %v8945_v22  ;;  %v2870_v22 = vadd.s32 1, %v7419_v61  ;;  %v2778_v61 = vadd.s32 1, %v7134_v56 }
 0x93b   : > { %3266 = vperm.xlu0 %4851, %v3251_v8   ;;  %v3248_v8 = vsel %vm3240_vm12, 1, %v5687_v49  ;;  %vm8957_vm12 = vnez %v8901_v4  ;;  %vm3093_vm3 = vmand %vm7341_vm6, %vm7483_vm0  ;;  %vm2789_vm14 = vcmp.ge.s32.totalorder %v2781_v42, 0  ;;  %vm2797_vm6 = vcmp.lt.s32.totalorder %v2781_v42, 8 }
 0x93c   : > { %3105 = vperm.xlu1 %4852, %v3096_v45   ;;  %v2779_v45 = vadd.s32 1, %v7126_v7  ;;  %vm3319_vm15 = vmand %vm8958_vm11, %vm8957_vm12  ;;  %v3250_v7 = vsel %vm8959_vm1, 1, %v5687_v49  ;;  %vm8967_vm1 = vnez %v8936_v55  ;;  %v3101_v11 = vsel %vm3093_vm3, 1, %v5687_v49 }
 0x93d   : > { %vm2923_vm11 = vmand %vm7459_vm4, %vm7464_vm5  ;;  %v8980_v55 = vmov 0 }
 0x93e   : > { %vm2787_vm10 = vcmp.ge.s32.totalorder %v2779_v45, 0  ;;  %vm2795_vm12 = vcmp.lt.s32.totalorder %v2779_v45, 8 }
 0x93f   : > { %2951 = vperm.xlu0 %4851, %v2932_v5   ;;  %v7475_v5 = vld [vmem:[#allocation5 + $0x30] sm:$0xff]  ;;  %vm7506_vm13 = vmand %vm2787_vm10, %vm2795_vm12  ;;  %vm8968_vm10 = vnez %v8885_v50  ;;  %v8973_v50 = vmov 0 }
 0x940   : > { %3111 = vperm.xlu1 %4852, %v3098_v23   ;;  %v8960_v23 = vmov 0  ;;  %v2728_v30 = vadd.s32 4294967295, %v7475_v5 }
 0x941   : > { %v8961_v23 = vsel %vm7483_vm0, 4294967295, %v8960_v23 }
 0x942   : > { %vm2744_vm12 = vcmp.lt.s32.totalorder %v2728_v30, 8 }
 0x943   : > { %3027 = vperm.xlu0 %4851, %v3008_v20   ;;  %v7487_v20 = vld [vmem:[#allocation7 + $0x30] sm:$0xff] }
 0x944   : > { %3181 = vperm.xlu1 %4852, %v3172_v25   ;;  %v8962_v25 = vmov 0  ;;  %v2816_v46 = vadd.s32 4294967295, %v7487_v20  ;;  %v2872_v56 = vadd.s32 1, %v7487_v20 }
 0x945   : > { %v8963_v25 = vsel %vm7494_vm2, 4294967295, %v8962_v25  ;;  %vm3393_vm2 = vmand %vm7506_vm13, %vm8968_vm10  ;;  %vm2759_vm10 = vcmp.ge.s32.totalorder %v7287_v40, 0 }
 0x946   : > { %vm2824_vm0 = vcmp.ge.s32.totalorder %v2816_v46, 0  ;;  %vm2832_vm5 = vcmp.lt.s32.totalorder %v2816_v46, 8  ;;  %v3401_v45 = vsel %vm3393_vm2, 1, %v5687_v49 }
 0x947   : > { %3336 = vperm.xlu0 %4851, %v3325_v27   ;;  %v3327_v27 = vsel %vm3319_vm15, 1, %v5687_v49  ;;  %vm2889_vm15 = vcmp.lt.s32.totalorder %v2873_v12, 8  ;;  %vm7533_vm3 = vmand %vm2824_vm0, %vm2832_vm5  ;;  %vm8976_vm5 = vnez %v8922_v13 }
 0x948   : > { %3187 = vperm.xlu1 %4852, %v3174_v10   ;;  %v2931_v10 = vsel %vm2923_vm11, 1, %v5687_v49  ;;  %vm2736_vm11 = vcmp.ge.s32.totalorder %v2728_v30, 0  ;;  %vm7525_vm4 = vmand %vm2881_vm8, %vm2889_vm15  ;;  %v8974_v50 = vsel %vm7533_vm3, 4294967295, %v8973_v50  ;;  %vm2848_vm15 = vcmp.ge.s32.totalorder %v7487_v20, 0 }
 0x949   : > { %vm7529_vm7 = vmand %vm2736_vm11, %vm2744_vm12  ;;  %vm2856_vm11 = vcmp.lt.s32.totalorder %v7487_v20, 8  ;;  %v2780_v20 = vadd.s32 1, %v7171_v52 }
 0x94a   : > { %vm3095_vm8 = vmand %vm8975_vm9, %vm7525_vm4  ;;  %vm2767_vm9 = vcmp.lt.s32.totalorder %v7287_v40, 8 }
 0x94b   : > { %2957 = vperm.xlu0 %4851, %v2934_v3   ;;  %v8969_v3 = vmov 0  ;;  %vm8977_vm0 = vmand %vm8967_vm1, %vm8976_vm5  ;;  %v3103_v12 = vsel %vm3095_vm8, 1, %v5687_v49  ;;  %vm8985_vm8 = vnez %v8930_v24  ;;  %vm2769_vm5 = vcmp.lt.s32.totalorder %v7351_v44, 8 }
 0x94c   : > { %3257 = vperm.xlu1 %4852, %v3248_v8   ;;  %v8970_v3 = vsel %vm7525_vm4, 4294967295, %v8969_v3  ;;  %vm7550_vm12 = vmand %vm2789_vm14, %vm2797_vm6  ;;  %vm8982_vm14 = vnez %v8913_v51 }
 0x94d   : > { %vm2925_vm2 = vmand %vm7529_vm7, %vm7533_vm3 }
 0x94e   : > { %vm7561_vm4 = vmand %vm2848_vm15, %vm2856_vm11  ;;  %v2933_v30 = vsel %vm2925_vm2, 1, %v5687_v49  ;;  %vm2878_vm11 = vcmp.ge.s32.totalorder %v2870_v22, 0 }
 0x94f   : > { %3033 = vperm.xlu0 %4851, %v3010_v2   ;;  %v3324_v2 = vsel %vm8977_vm0, 1, %v5687_v49  ;;  %v8981_v55 = vsel %vm7561_vm4, 4294967295, %v8980_v55  ;;  %vm3395_vm6 = vmand %vm7550_vm12, %vm8982_vm14  ;;  %vm2886_vm0 = vcmp.lt.s32.totalorder %v2870_v22, 8  ;;  %vm8989_vm14 = vnez %v8938_v43 }
 0x950   : > { %3263 = vperm.xlu1 %4852, %v3250_v7   ;;  %vm7571_vm1 = vmand %vm2759_vm10, %vm2767_vm9  ;;  %v3403_v51 = vsel %vm3395_vm6, 1, %v5687_v49  ;;  %vm8988_vm9 = vnez %v8925_v38  ;;  %vm2761_vm6 = vcmp.ge.s32.totalorder %v7351_v44, 0 }
 0x951   : > { %vm3001_vm15 = vmand %vm7529_vm7, %vm7561_vm4 }
 0x952   : > { %vm3169_vm2 = vmand %vm7571_vm1, %vm8985_vm8  ;;  %v3009_v46 = vsel %vm3001_vm15, 1, %v5687_v49  ;;  %vm8990_vm15 = vnez %v8954_v26  ;;  %vm2794_vm8 = vcmp.lt.s32.totalorder %v2778_v61, 8 }
 0x953   : > { %3342 = vperm.xlu0 %4851, %v3327_v27   ;;  %vm7586_vm10 = vmand %vm2878_vm11, %vm2886_vm0  ;;  %v3177_v42 = vsel %vm3169_vm2, 1, %v5687_v49  ;;  %vm2786_vm0 = vcmp.ge.s32.totalorder %v2778_v61, 0 }
 0x954   : > { %2948 = vperm.xlu1 %4852, %v2931_v10   ;;  %v8986_v10 = vmov 0  ;;  %vm3318_vm4 = vmand %vm8989_vm14, %vm8988_vm9  ;;  %vm8991_vm14 = vnez %v8893_v32 }
 0x955   : > { %v8987_v10 = vsel %vm7586_vm10, 4294967295, %v8986_v10  ;;  %vm3092_vm11 = vmand %vm8990_vm15, %vm7586_vm10  ;;  %v3326_v43 = vsel %vm3318_vm4, 1, %v5687_v49  ;;  %vm2880_vm15 = vcmp.ge.s32.totalorder %v2872_v56, 0  ;;  %vm2888_vm10 = vcmp.lt.s32.totalorder %v2872_v56, 8 }
 0x956   : > { %vm3469_vm9 = vmand %vm7506_vm13, %vm8991_vm14  ;;  %v3100_v32 = vsel %vm3092_vm11, 1, %v5687_v49  ;;  %vm8996_vm4 = vnez %v8947_v33  ;;  %vm2796_vm11 = vcmp.lt.s32.totalorder %v2780_v20, 8  ;;  %vm9000_vm14 = vnez %v8920_v6 }
 0x957   : > { %3120 = vperm.xlu0 %4851, %v3101_v11   ;;  %vm7607_vm3 = vmand %vm2761_vm6, %vm2769_vm5  ;;  %v3477_v26 = vsel %vm3469_vm9, 1, %v5687_v49  ;;  %vm8997_vm6 = vnez %v8891_v14  ;;  %vm2788_vm9 = vcmp.ge.s32.totalorder %v2780_v20, 0  ;;  %v9001_v14 = vmov 0 }
 0x958   : > { %3024 = vperm.xlu1 %4852, %v3007_v47   ;;  %vm7611_vm2 = vmand %vm2786_vm0, %vm2794_vm8 }
 0x959   : > { %vm3171_vm5 = vmand %vm7607_vm3, %vm8996_vm4 }
 0x95a   : > { %vm3392_vm8 = vmand %vm7611_vm2, %vm8997_vm6  ;;  %v3179_v52 = vsel %vm3171_vm5, 1, %v5687_v49  ;;  %vm2758_vm5 = vcmp.ge.s32.totalorder %v7412_v31, 0  ;;  %vm2766_vm6 = vcmp.lt.s32.totalorder %v7412_v31, 8 }
 0x95b   : > { %3412 = vperm.xlu0 %4851, %v3401_v45   ;;  %vm7626_vm0 = vmand %vm2880_vm15, %vm2888_vm10  ;;  %v8998_v45 = vmov 0 }
 0x95c   : > { %3333 = vperm.xlu1 %4852, %v3324_v2   ;;  %v8999_v45 = vsel %vm7626_vm0, 4294967295, %v8998_v45  ;;  %v3400_v2 = vsel %vm3392_vm8, 1, %v5687_v49  ;;  %vm3471_vm4 = vmand %vm7550_vm12, %vm9000_vm14  ;;  %vm9003_vm8 = vnez %v8934_v39 }
 0x95d   : > { %vm3094_vm10 = vmand %vm7529_vm7, %vm7626_vm0  ;;  %v3479_v22 = vsel %vm3471_vm4, 1, %v5687_v49  ;;  %vm9004_vm7 = vnez %v8905_v60  ;;  %vm9007_vm4 = vnez %v8895_v62  ;;  %vm9008_vm0 = vnez %v8956_v1 }
 0x95e   : > { %vm7640_vm15 = vmand %vm2788_vm9, %vm2796_vm11  ;;  %v3102_v6 = vsel %vm3094_vm10, 1, %v5687_v49 }
 0x95f   : > { %3126 = vperm.xlu0 %4851, %v3103_v12   ;;  %v9002_v14 = vsel %vm7640_vm15, 4294967295, %v9001_v14  ;;  %vm3245_vm14 = vmand %vm7571_vm1, %vm9003_vm8 }
 0x960   : > { %2954 = vperm.xlu1 %4852, %v2933_v30   ;;  %vm3394_vm9 = vmand %vm7640_vm15, %vm9004_vm7  ;;  %v3253_v12 = vsel %vm3245_vm14, 1, %v5687_v49  ;;  %vm9009_vm14 = vnez %v8951_v59 }
 0x961   : > { %vm7656_vm11 = vmand %vm2758_vm5, %vm2766_vm6  ;;  %v3402_v30 = vsel %vm3394_vm9, 1, %v5687_v49  ;;  %vm2760_vm5 = vcmp.ge.s32.totalorder %v7475_v5, 0  ;;  %vm2768_vm6 = vcmp.lt.s32.totalorder %v7475_v5, 8  ;;  %vm9010_vm9 = vnez %v8889_v57 }
 0x962   : > { %vm3545_vm10 = vmand %vm7506_vm13, %vm9007_vm4  ;;  %v2783_v57 = vadd.s32 1, %v7287_v40 }
 0x963   : > { %3418 = vperm.xlu0 %4851, %v3403_v51   ;;  %vm3168_vm7 = vmand %vm7656_vm11, %vm9008_vm0  ;;  %v3553_v60 = vsel %vm3545_vm10, 1, %v5687_v49  ;;  %vm9013_vm10 = vnez %v8901_v4  ;;  %v2785_v4 = vadd.s32 1, %v7351_v44 }
 0x964   : > { %3030 = vperm.xlu1 %4852, %v3009_v46   ;;  %v3176_v51 = vsel %vm3168_vm7, 1, %v5687_v49  ;;  %vm3247_vm13 = vmand %vm7607_vm3, %vm9009_vm14  ;;  %vm9014_vm14 = vnez %v8974_v50 }
 0x965   : > { %vm3468_vm4 = vmand %vm7611_vm2, %vm9010_vm9  ;;  %v3255_v21 = vsel %vm3247_vm13, 1, %v5687_v49 }
 0x966   : > { %vm7682_vm0 = vmand %vm2760_vm5, %vm2768_vm6  ;;  %v3476_v61 = vsel %vm3468_vm4, 1, %v5687_v49  ;;  %vm9015_vm5 = vnez %v8961_v23  ;;  %vm2791_vm4 = vcmp.ge.s32.totalorder %v2783_v57, 0 }
 0x967   : > { %3196 = vperm.xlu0 %4851, %v3177_v42   ;;  %vm3547_vm7 = vmand %vm7550_vm12, %vm9013_vm10  ;;  %vm9016_vm12 = vnez %v8918_v15  ;;  %vm2799_vm10 = vcmp.lt.s32.totalorder %v2783_v57, 8 }
 0x968   : > { %3339 = vperm.xlu1 %4852, %v3326_v43   ;;  %vm3170_vm9 = vmand %vm7682_vm0, %vm9014_vm14  ;;  %v3555_v46 = vsel %vm3547_vm7, 1, %v5687_v49  ;;  %vm9017_vm7 = vnez %v8963_v25 }
 0x969   : > { %v3178_v42 = vsel %vm3170_vm9, 1, %v5687_v49  ;;  %vm3321_vm6 = vmand %vm7571_vm1, %vm9015_vm5  ;;  %vm9018_vm1 = vnez %v8970_v3  ;;  %vm2793_vm5 = vcmp.ge.s32.totalorder %v2785_v4, 0 }
 0x96a   : > { %vm3470_vm13 = vmand %vm7640_vm15, %vm9016_vm12  ;;  %v3329_v40 = vsel %vm3321_vm6, 1, %v5687_v49  ;;  %vm2801_vm15 = vcmp.lt.s32.totalorder %v2785_v4, 8  ;;  %vm9021_vm6 = vnez %v8922_v13 }
 0x96b   : > { %3488 = vperm.xlu0 %4851, %v3477_v26   ;;  %vm3244_vm9 = vmand %vm7656_vm11, %vm9017_vm7  ;;  %v3478_v7 = vsel %vm3470_vm13, 1, %v5687_v49  ;;  %vm9022_vm7 = vnez %v8930_v24 }
 0x96c   : > { %3117 = vperm.xlu1 %4852, %v3100_v32   ;;  %vm3323_vm12 = vmand %vm7607_vm3, %vm9018_vm1  ;;  %v3252_v27 = vsel %vm3244_vm9, 1, %v5687_v49  ;;  %vm9026_vm9 = vnez %v8981_v55 }
 0x96d   : > { %vm7718_vm14 = vmand %vm2791_vm4, %vm2799_vm10  ;;  %v3331_v44 = vsel %vm3323_vm12, 1, %v5687_v49  ;;  %vm9025_vm10 = vnez %v8947_v33  ;;  %vm9028_vm12 = vnez %v9002_v14 }
 0x96e   : > { %vm3544_vm13 = vmand %vm7611_vm2, %vm9021_vm6 }
 0x96f   : > { %3202 = vperm.xlu0 %4851, %v3179_v52   ;;  %vm3397_vm3 = vmand %vm7718_vm14, %vm9022_vm7  ;;  %v3552_v13 = vsel %vm3544_vm13, 1, %v5687_v49  ;;  %vm9027_vm7 = vnez %v8925_v38 }
 0x970   : > { %3409 = vperm.xlu1 %4852, %v3400_v2   ;;  %vm7732_vm4 = vmand %vm2793_vm5, %vm2801_vm15  ;;  %v3405_v43 = vsel %vm3397_vm3, 1, %v5687_v49  ;;  %vm9030_vm3 = vnez %v8987_v10 }
 0x971   : > { %vm3399_vm2 = vmand %vm7732_vm4, %vm9025_vm10 }
 0x972   : > { %vm3246_vm15 = vmand %vm7682_vm0, %vm9026_vm9  ;;  %v3407_v26 = vsel %vm3399_vm2, 1, %v5687_v49 }
 0x973   : > { %3494 = vperm.xlu0 %4851, %v3479_v22   ;;  %v3254_v52 = vsel %vm3246_vm15, 1, %v5687_v49  ;;  %vm3473_vm5 = vmand %vm7718_vm14, %vm9003_vm8  ;;  %vm9029_vm8 = vnez %v8951_v59  ;;  %v2784_v59 = vadd.s32 1, %v7475_v5 }
 0x974   : > { %3123 = vperm.xlu1 %4852, %v3102_v6   ;;  %vm3546_vm6 = vmand %vm9028_vm12, %vm9027_vm7  ;;  %vm9032_vm7 = vnez %v8999_v45 }
 0x975   : > { %vm3475_vm13 = vmand %vm7732_vm4, %vm9029_vm8  ;;  %vm2792_vm8 = vcmp.ge.s32.totalorder %v2784_v59, 0 }
 0x976   : > { %vm3320_vm10 = vmand %vm7656_vm11, %vm9030_vm3 }
 0x977   : > { %3272 = vperm.xlu0 %4851, %v3253_v12   ;;  %v3481_v12 = vsel %vm3473_vm5, 1, %v5687_v49  ;;  %vm9031_vm5 = vnez %v8961_v23  ;;  %vm3322_vm12 = vmand %vm7682_vm0, %vm9032_vm7  ;;  %vm9038_vm0 = vnez %v8974_v50 }
 0x978   : > { %3415 = vperm.xlu1 %4852, %v3402_v30   ;;  %v2782_v30 = vadd.s32 1, %v7412_v31  ;;  %vm3549_vm11 = vmand %vm7718_vm14, %vm9031_vm5  ;;  %vm2800_vm14 = vcmp.lt.s32.totalorder %v2784_v59, 8 }
 0x979   : > { %v3557_v23 = vsel %vm3549_vm11, 1, %v5687_v49  ;;  %vm9040_vm11 = vcmask 261120  }
 0x97a   : > { %vm2790_vm2 = vcmp.ge.s32.totalorder %v2782_v30, 0  ;;  %vm2798_vm15 = vcmp.lt.s32.totalorder %v2782_v30, 8 }
 0x97b   : > { %3564 = vperm.xlu0 %4851, %v3553_v60  }
 0x97c   : > { %3193 = vperm.xlu1 %4852, %v3176_v51   ;;  %v3554_v51 = vsel %vm3546_vm6, 1, %v5687_v49  ;;  %vm7778_vm6 = vmand %vm2790_vm2, %vm2798_vm15 }
 0x97d   : > { %vm7799_vm15 = vmand %vm2792_vm8, %vm2800_vm14 }
 0x97e   : > { %vm9041_vm8 = vmmov %vm9040_vm11 }
 0x97f   : > { %3278 = vperm.xlu0 %4851, %v3255_v21   ;;  %vm3548_vm14 = vmand %vm7778_vm6, %vm9030_vm3 }
 0x980   : > { %3485 = vperm.xlu1 %4852, %v3476_v61   ;;  %v3483_v61 = vsel %vm3475_vm13, 1, %v5687_v49  ;;  %vm3551_vm13 = vmand %vm7732_vm4, %vm9018_vm1  ;;  %vm9039_vm4 = vnez %v8963_v25 }
 0x981   : > { %v3559_v56 = vsel %vm3551_vm13, 1, %v5687_v49  ;;  %vm3398_vm1 = vmand %vm7799_vm15, %vm9038_vm0 }
 0x982   : > { %v3406_v30 = vsel %vm3398_vm1, 1, %v5687_v49  ;;  %vm3472_vm5 = vmand %vm7778_vm6, %vm9039_vm4 }
 0x983   : > { %3570 = vperm.xlu0 %4851, %v3555_v46   ;;  %vm3550_vm13 = vmand %vm7799_vm15, %vm9032_vm7 }
 0x984   : > { %3199 = vperm.xlu1 %4852, %v3178_v42   ;;  %v3328_v42 = vsel %vm3320_vm10, 1, %v5687_v49  ;;  %vm9035_vm10 = vnez %v8956_v1  ;;  %v3558_v10 = vsel %vm3550_vm13, 1, %v5687_v49 }
 0x985   : > { %vm3396_vm2 = vmand %vm7778_vm6, %vm9035_vm10 }
 0x986   : > { %v3404_v1 = vsel %vm3396_vm2, 1, %v5687_v49  ;;  %vm9043_vm10 = vmmov %vm9041_vm8 }
 0x987   : > { %3348 = vperm.xlu0 %4851, %v3329_v40  }
 0x988   : > { %3491 = vperm.xlu1 %4852, %v3478_v7  }
 0x98b   : > { %3354 = vperm.xlu0 %4851, %v3331_v44   ;;  %v4214_v44 = vld [vmem:[#allocation19] ss:$0 sm:$0xff] }
 0x98c   : > { %3269 = vperm.xlu1 %4852, %v3252_v27  }
 0x98e   : > { %v2520_v11 = vpop.xlane.xlu0 %2519 }
 0x98f   : > { %v2542_v24 = vmul.f32 0.03125, %v2520_v11  ;;  %3424 = vperm.xlu0 %4851, %v3405_v43  }
 0x990   : > { %3561 = vperm.xlu1 %4852, %v3552_v13   ;;  %v2523_v47 = vpop.xlane.xlu1 %2522  ;;  %v3330_v13 = vsel %vm3322_vm12, 1, %v5687_v49  ;;  %vm3474_vm12 = vmand %vm7799_vm15, %vm9026_vm9 }
 0x991   : > { %v2550_v20 = vadd.f32 1e-05, %v2542_v24  ;;  %v2543_v32 = vmul.f32 0.03125, %v2523_v47  ;;  %vm9042_vm9 = vmmov %vm9041_vm8 }
 0x992   : > { %v2526_v33 = vpop.xlane.xlu0 %2525 }
 0x993   : > { %5015 = vrsqrt.f32 %v2550_v20  ;;  %v2551_v2 = vadd.f32 1e-05, %v2543_v32  ;;  %v2544_v22 = vmul.f32 0.03125, %v2526_v33  ;;  %3430 = vperm.xlu0 %4851, %v3407_v26   ;;  %v4215_v20 = vld [vmem:[#allocation20] ss:$0 sm:$0xff] }
 0x994   : > { %3275 = vperm.xlu1 %4852, %v3254_v52   ;;  %v2529_v6 = vpop.xlane.xlu1 %2528 }
 0x995   : > { %5017 = vrsqrt.f32 %v2551_v2  ;;  %v2552_v39 = vadd.f32 1e-05, %v2544_v22  ;;  %v2545_v60 = vmul.f32 0.03125, %v2529_v6 }
 0x996   : > { %v2532_v38 = vpop.xlane.xlu0 %2531 }
 0x997   : > { %5019 = vrsqrt.f32 %v2552_v39  ;;  %v2553_v14 = vadd.f32 1e-05, %v2545_v60  ;;  %v2546_v21 = vmul.f32 0.03125, %v2532_v38  ;;  %3500 = vperm.xlu0 %4851, %v3481_v12  }
 0x998   : > { %3567 = vperm.xlu1 %4852, %v3554_v51   ;;  %v2535_v31 = vpop.xlane.xlu1 %2534 }
 0x999   : > { %5021 = vrsqrt.f32 %v2553_v14  ;;  %v2554_v57 = vadd.f32 1e-05, %v2546_v21  ;;  %v2547_v46 = vmul.f32 0.03125, %v2535_v31  ;;  %v3480_v31 = vsel %vm3472_vm5, 1, %v5687_v49 }
 0x99a   : > { %v2538_v8 = vpop.xlane.xlu0 %2537 }
 0x99b   : > { %5023 = vrsqrt.f32 %v2554_v57  ;;  %v2555_v4 = vadd.f32 1e-05, %v2547_v46  ;;  %v2548_v40 = vmul.f32 0.03125, %v2538_v8  ;;  %3506 = vperm.xlu0 %4851, %v3483_v61   ;;  %v3482_v8 = vsel %vm3474_vm12, 1, %v5687_v49 }
 0x99c   : > { %3345 = vperm.xlu1 %4852, %v3328_v42   ;;  %v2541_v7 = vpop.xlane.xlu1 %2540 }
 0x99d   : > { %v5016_v15 = vpop.eup %5015  ;;  %5025 = vrsqrt.f32 %v2555_v4  ;;  %v2556_v27 = vadd.f32 1e-05, %v2548_v40  ;;  %v2549_v43 = vmul.f32 0.03125, %v2541_v7 }
 0x99e   : > { %v2566_v11 = vmul.f32 %v5016_v15, %v7089_v34 }
 0x99f   : > { %v5018_v24 = vpop.eup %5017  ;;  %5027 = vrsqrt.f32 %v2556_v27  ;;  %v2557_v47 = vadd.f32 1e-05, %v2549_v43  ;;  %3576 = vperm.xlu0 %4851, %v3557_v23  }
 0x9a0   : > { %v2567_v3 = vmul.f32 %v5018_v24, %v7092_v48  ;;  %3351 = vperm.xlu1 %4852, %v3330_v13   ;;  %v2580_v34 = vmul.f32 %v4214_v44, %v2566_v11  ;;  %v7843_v23 = vpop.permute.xlu1 %2939 }
 0x9a1   : > { %v5020_v26 = vpop.eup %5019  ;;  %5029 = vrsqrt.f32 %v2557_v47  ;;  %9045 = vst [vmem:[#allocation58_spill] sm:$0xff] %v7843_v23 }
 0x9a2   : > { %v2568_v32 = vmul.f32 %v5020_v26, %v7097_v28  ;;  %v2581_v52 = vmul.f32 %v4214_v44, %v2567_v3  ;;  %v2594_v22 = vadd.f32 %v4215_v20, %v2580_v34  ;;  %v7841_v5 = vpop.permute.xlu0 %2936 }
 0x9a3   : > { %v5022_v33 = vpop.eup %5021  ;;  %3582 = vperm.xlu0 %4851, %v3559_v56   ;;  %9044 = vst [vmem:[#allocation57_spill] sm:$0xff] %v7841_v5 }
 0x9a4   : > { %v2582_v48 = vmul.f32 %v4214_v44, %v2568_v32  ;;  %v2569_v2 = vmul.f32 %v5022_v33, %v7103_v36  ;;  %3421 = vperm.xlu1 %4852, %v3404_v1   ;;  %v2595_v6 = vadd.f32 %v4215_v20, %v2581_v52 }
 0x9a5   : > { %v5024_v12 = vpop.eup %5023 }
 0x9a6   : > { %v2583_v39 = vmul.f32 %v4214_v44, %v2569_v2  ;;  %v2570_v28 = vmul.f32 %v5024_v12, %v7109_v37  ;;  %v2602_v60 = vpack.c.bf16 %v2595_v6, %v2594_v22  ;;  %v2596_v51 = vadd.f32 %v4215_v20, %v2582_v48  ;;  %v7845_v15 = vpop.permute.xlu0 %3108 }
 0x9a7   : > { %v5026_v50 = vpop.eup %5025 }
 0x9a8   : > { %v2571_v38 = vmul.f32 %v5026_v50, %v7115_v35  ;;  %3427 = vperm.xlu1 %4852, %v3406_v30   ;;  %4527 = vmatprep.mubr.msk.bf16.mxu0 %vm9040_vm11, %v2602_v60  ;;  %v2597_v36 = vadd.f32 %v4215_v20, %v2583_v39  ;;  %v2584_v14 = vmul.f32 %v4214_v44, %v2570_v28 }
 0x9a9   : > { %v5028_v21 = vpop.eup %5027 }
 0x9aa   : > { %v2572_v37 = vmul.f32 %v5028_v21, %v7121_v17  ;;  %v2603_v61 = vpack.c.bf16 %v2597_v36, %v2596_v51  ;;  %v2585_v25 = vmul.f32 %v4214_v44, %v2571_v38  ;;  %v2598_v57 = vadd.f32 %v4215_v20, %v2584_v14  ;;  %v7849_v27 = vpop.permute.xlu0 %3114 }
 0x9ab   : > { %v5030_v59 = vpop.eup %5029  ;;  %vm3131_vm5 = vcmp.eq.s32.totalorder %v7849_v27, 1 }
 0x9ac   : > { %v2573_v35 = vmul.f32 %v5030_v59, %v7129_v16  ;;  %3497 = vperm.xlu1 %4852, %v3480_v31   ;;  %4528 = vmatmul.mubr.msk.bf16.vlgmr.msra.gmra.mrb[44].mxu0 %vm9041_vm8, %v2603_v61  ;;  %v2599_v46 = vadd.f32 %v4215_v20, %v2585_v25  ;;  %v2586_v42 = vmul.f32 %v4214_v44, %v2572_v37  ;;  %v3556_v16 = vsel %vm3548_vm14, 1, %v5687_v49  ;;  %v4863_v37 = vld [vmem:[#allocation28] sm:$0xff]   ;;  %v4864_v61 = vld [vmem:[#allocation28 + $0x8] sm:$0xff]   ;;  %v4865_v59 = vld [vmem:[#allocation28 + $0x10] sm:$0xff]  }
 0x9ad   : > { %4535 = vmatprep.subr.bf16.mxu1 %v4863_v37  ;;  %vm8799_vm14 = vcmp.lt.s32.totalorder %v6399_v63, 1 }
 0x9ae   : > { %v2604_v4 = vpack.c.bf16 %v2599_v46, %v2598_v57  ;;  %v2587_v17 = vmul.f32 %v4214_v44, %v2573_v35  ;;  %v2600_v55 = vadd.f32 %v4215_v20, %v2586_v42  ;;  %v7847_v44 = vpop.permute.xlu1 %3012  ;;  %v7853_v43 = vpop.permute.xlu0 %3184  ;;  %4536 = vmatpush3.bf16.msra.mxu1 %v4863_v37  ;;  %v4866_v35 = vld [vmem:[#allocation28 + $0x18] sm:$0xff]  }
 0x9af   : > { %9046 = vst [vmem:[#allocation59_spill] sm:$0xff] %v7847_v44  ;;  %4537 = vmatprep.subr.bf16.mxu1 %v4864_v61 }
 0x9b0   : > { %3503 = vperm.xlu1 %4852, %v3482_v8   ;;  %4531 = vmatprep.mubr.msk.bf16.mxu0 %vm9042_vm9, %v2604_v4  ;;  %v2601_v40 = vadd.f32 %v4215_v20, %v2587_v17  ;;  %v4867_v8 = vld [vmem:[#allocation28 + $0x20] sm:$0xff]   ;;  %v4868_v17 = vld [vmem:[#allocation28 + $0x28] sm:$0xff]   ;;  %vm8800_vm9 = vcmp.lt.s32.totalorder %v6399_v63, 7 }
 0x9b2   : > { %v2605_v7 = vpack.c.bf16 %v2601_v40, %v2600_v55  ;;  %v7851_v45 = vpop.permute.xlu1 %3015  ;;  %v7857_v11 = vpop.permute.xlu0 %3190  ;;  %4538 = vmatpush3.bf16.msra.mxu1 %v4864_v61  ;;  %v4869_v40 = vld [vmem:[#allocation28 + $0x30] sm:$0xff]  }
 0x9b3   : > { %4539 = vmatprep.subr.bf16.mxu1 %v4865_v59  ;;  %vm3036_vm3 = vcmp.eq.s32.totalorder %v7851_v45, 1  ;;  %vm3207_vm11 = vcmp.eq.s32.totalorder %v7857_v11, 1 }
 0x9b4   : > { %3573 = vperm.xlu1 %4852, %v3556_v16   ;;  %4532 = vmatmul.mubr.msk.bf16.gmra.mrb[48].mxu0 %vm9043_vm10, %v2605_v7 }
 0x9b6   : > { %v7855_v13 = vpop.permute.xlu1 %2942  ;;  %v7861_v24 = vpop.permute.xlu0 %3260  ;;  %4540 = vmatpush3.bf16.msra.mxu1 %v4865_v59 }
 0x9b7   : > { %4541 = vmatprep.subr.bf16.mxu1 %v4866_v35 }
 0x9b8   : > { %3579 = vperm.xlu1 %4852, %v3558_v10   ;;  %v4870_v10 = vld [vmem:[#allocation28 + $0x38] sm:$0xff]  }
 0x9ba   : > { %v7859_v49 = vpop.permute.xlu1 %2945  ;;  %v7865_v62 = vpop.permute.xlu0 %3266  ;;  %4542 = vmatpush3.bf16.msra.mxu1 %v4866_v35 }
 0x9bb   : > { %4543 = vmatprep.subr.bf16.mxu1 %v4867_v8  ;;  %vm3283_vm6 = vcmp.eq.s32.totalorder %v7865_v62, 1 }
 0x9be   : > { %v7863_v47 = vpop.permute.xlu1 %3018  ;;  %v7869_v56 = vpop.permute.xlu0 %2951  ;;  %4544 = vmatpush3.bf16.msra.mxu1 %v4867_v8 }
 0x9bf   : > { %4545 = vmatprep.subr.bf16.mxu1 %v4868_v17  ;;  %vm3037_vm0 = vcmp.eq.s32.totalorder %v7863_v47, 1 }
 0x9c2   : > { %v7867_v3 = vpop.permute.xlu1 %3021  ;;  %v7873_v26 = vpop.permute.xlu0 %3027  ;;  %4546 = vmatpush3.bf16.msra.mxu1 %v4868_v17 }
 0x9c3   : > { %4547 = vmatprep.subr.bf16.mxu1 %v4869_v40  ;;  %vm3038_vm7 = vcmp.eq.s32.totalorder %v7867_v3, 1 }
 0x9c6   : > { %v7871_v34 = vpop.permute.xlu1 %3105  ;;  %v7877_v20 = vpop.permute.xlu0 %3336  ;;  %4548 = vmatpush3.bf16.msra.mxu1 %v4869_v40 }
 0x9c7   : > { %9047 = vst [vmem:[#allocation60_spill] sm:$0xff] %v7871_v34  ;;  %4549 = vmatprep.subr.bf16.mxu1 %v4870_v10 }
 0x9ca   : > { %v7875_v1 = vpop.permute.xlu1 %3111  ;;  %v7881_v52 = vpop.permute.xlu0 %2957  ;;  %4550 = vmatpush3.bf16.msra.mxu1 %v4870_v10 }
 0x9cb   : > { %9049 = vst [vmem:[#allocation62_spill] sm:$0xff] %v7881_v52 }
 0x9ce   : > { %v7879_v32 = vpop.permute.xlu1 %3181  ;;  %v7885_v48 = vpop.permute.xlu0 %3033 }
 0x9cf   : > { %9048 = vst [vmem:[#allocation61_spill] sm:$0xff] %v7879_v32 }
 0x9d2   : > { %v7883_v33 = vpop.permute.xlu1 %3187  ;;  %v7889_v22 = vpop.permute.xlu0 %3342 }
 0x9d3   : > { %vm3206_vm10 = vcmp.eq.s32.totalorder %v7883_v33, 1 }
 0x9d6   : > { %v7887_v2 = vpop.permute.xlu1 %3257  ;;  %v7893_v12 = vpop.permute.xlu0 %3120 }
 0x9d7   : > { %9050 = vst [vmem:[#allocation63_spill] sm:$0xff] %v7893_v12  ;;  %vm3280_vm2 = vcmp.eq.s32.totalorder %v7887_v2, 1 }
 0x9da   : > { %v7891_v6 = vpop.permute.xlu1 %3263  ;;  %v7897_v39 = vpop.permute.xlu0 %3412 }
 0x9db   : > { %vm3282_vm15 = vcmp.eq.s32.totalorder %v7891_v6, 1 }
 0x9de   : > { %v7895_v30 = vpop.permute.xlu1 %2948  ;;  %v7901_v60 = vpop.permute.xlu0 %3126 }
 0x9df   : > { %9051 = vst [vmem:[#allocation64_spill] sm:$0xff] %v7901_v60  ;;  %vm2963_vm12 = vcmp.eq.s32.totalorder %v7895_v30, 1 }
 0x9e2   : > { %v7899_v28 = vpop.permute.xlu1 %3024  ;;  %v7905_v51 = vpop.permute.xlu0 %3418 }
 0x9e3   : > { %vm3039_vm1 = vcmp.eq.s32.totalorder %v7899_v28, 1 }
 0x9e6   : > { %v7903_v50 = vpop.permute.xlu1 %3333  ;;  %v7909_v36 = vpop.permute.xlu0 %3196 }
 0x9e7   : > { %9053 = vst [vmem:[#allocation66_spill] sm:$0xff] %v7909_v36  ;;  %v3146_v36 = vsub.s32 2, %v6399_v63 }
 0x9ea   : > { %v7907_v38 = vpop.permute.xlu1 %2954  ;;  %v7913_v21 = vpop.permute.xlu0 %3488 }
 0x9eb   : > { %9052 = vst [vmem:[#allocation65_spill] sm:$0xff] %v7907_v38  ;;  %v3374_v38 = vsub.s32 5, %v6399_v63  ;;  %vm3509_vm4 = vcmp.eq.s32.totalorder %v7913_v21, 1 }
 0x9ee   : > { %v7911_v14 = vpop.permute.xlu1 %3030  ;;  %v7917_v25 = vpop.permute.xlu0 %3202 }
 0x9ef   : > { %9054 = vst [vmem:[#allocation67_spill] sm:$0xff] %v7911_v14  ;;  %9055 = vst [vmem:[#allocation68_spill] sm:$0xff] %v7917_v25  ;;  %v3450_v14 = vsub.s32 6, %v6399_v63 }
 0x9f2   : > { %v7915_v31 = vpop.permute.xlu1 %3339  ;;  %v7921_v46 = vpop.permute.xlu0 %3494 }
 0x9f3   : > { %vm3358_vm8 = vcmp.eq.s32.totalorder %v7915_v31, 1 }
 0x9f6   : > { %v7919_v57 = vpop.permute.xlu1 %3117  ;;  %v7925_v4 = vpop.permute.xlu0 %3272 }
 0x9f7   : > { %9056 = vst [vmem:[#allocation69_spill] sm:$0xff] %v7925_v4 }
 0x9fa   : > { %v7923_v42 = vpop.permute.xlu1 %3409  ;;  %v7929_v16 = vpop.permute.xlu0 %3564 }
 0x9fe   : > { %v7927_v55 = vpop.permute.xlu1 %3123  ;;  %v7933_v37 = vpop.permute.xlu0 %3278 }
 0x9ff   : > { %9057 = vst [vmem:[#allocation70_spill] sm:$0xff] %v7927_v55  ;;  %9058 = vst [vmem:[#allocation71_spill] sm:$0xff] %v7933_v37  ;;  %v3222_v55 = vsub.s32 3, %v6399_v63 }
 0xa02   : > { %v7931_v7 = vpop.permute.xlu1 %3415  ;;  %v7937_v59 = vpop.permute.xlu0 %3570 }
 0xa03   : > { %9059 = vst [vmem:[#allocation72_spill] sm:$0xff] %v7937_v59  ;;  %v3298_v59 = vsub.s32 4, %v6399_v63 }
 0xa06   : > { %v7935_v61 = vpop.permute.xlu1 %3193  ;;  %v7941_v8 = vpop.permute.xlu0 %3348 }
 0xa07   : > { %9060 = vst [vmem:[#allocation73_spill] sm:$0xff] %v7941_v8  ;;  %v3526_v8 = vsub.s32 7, %v6399_v63 }
 0xa0a   : > { %v7939_v35 = vpop.permute.xlu1 %3485  ;;  %v7945_v53 = vpop.permute.xlu0 %3354 }
 0xa0b   : > { %9062 = vst [vmem:[#allocation75_spill] sm:$0xff] %v7945_v53 }
 0xa0e   : > { %v7943_v54 = vpop.permute.xlu1 %3199  ;;  %v7949_v18 = vpop.permute.xlu0 %3424 }
 0xa0f   : > { %9061 = vst [vmem:[#allocation74_spill] sm:$0xff] %v7943_v54  ;;  %9063 = vst [vmem:[#allocation76_spill] sm:$0xff] %v7949_v18  ;;  %v2898_v18 = vld [vmem:[#allocation25] sm:$0xff] }
 0xa10   : > { %v7987_v53 = vrot.slane %v2898_v18, %v3298_v59  ;;  %v7989_v25 = vrot.slane %v2898_v18, %v3526_v8  ;;  %v8008_v59 = vrot.slane %v2898_v18, %v3146_v36  ;;  %v8010_v8 = vrot.slane %v2898_v18, %v3222_v55 }
 0xa11   : > { %v8012_v3 = vrot.slane %v2898_v18, %v3374_v38  ;;  %v8022_v5 = vrot.slane %v2898_v18, %v3450_v14 }
 0xa12   : > { %v7947_v17 = vpop.permute.xlu1 %3491  ;;  %v7953_v40 = vpop.permute.xlu0 %3430 }
 0xa13   : > { %9064 = vst [vmem:[#allocation77_spill] sm:$0xff] %v7953_v40  ;;  %v7985_v40 = vrot.slane %v2898_v18, %v3053_v19  ;;  %vm3510_vm13 = vcmp.eq.s32.totalorder %v7947_v17, 1 }
 0xa16   : > { %v7951_v41 = vpop.permute.xlu1 %3269  ;;  %v7957_v10 = vpop.permute.xlu0 %3500 }
 0xa1a   : > { %v7955_v58 = vpop.permute.xlu1 %3561  ;;  %v3507_v12 = vpop.permute.xlu0 %3506 }
 0xa1e   : > { %v7959_v9 = vpop.permute.xlu1 %3275 }
 0xa22   : > { %v7994_v32 = vpop.permute.xlu1 %3567 }
 0xa7f   : > { %v4529_v54 = vpop.f32.mrb[44].mxu0 }
 0xa80   : > { %v7978_v52 = vadd.f32 %v4529_v54, %v7961_v29  ;;  %v2675_v4 = vpop.f32.mrb[45].mxu0 }
 0xa81   : > { %v7992_v54 = vadd.f32 %v7961_v29, %v2675_v4  ;;  %v4530_v60 = vpop.f32.mrb[46].mxu0  ;;  %v8006_v4 = vrot.slane %v2898_v18, %v6402_v0  ;;  %v8036_v18 = vpop.permute.xlu0 %3576 }
 0xa82   : > { %v3046_v37 = vsel %vm3038_vm7, %v7978_v52, 0.0  ;;  %v3290_v34 = vsel %vm3282_vm15, %v7978_v52, 0.0  ;;  %v2678_v19 = vpop.f32.mrb[47].mxu0  ;;  %vm3515_vm15 = vcmp.eq.s32.totalorder %v3507_v12, 1  ;;  %v2902_v36 = vrot.slane %v7978_v52, 7  ;;  %9066 = vst [vmem:[#allocation79_spill] sm:$0xff] %v8036_v18 }
 0xa83   : > { %v3044_v6 = vsel %vm3036_vm3, %v7992_v54, 0.0  ;;  %v3288_v0 = vsel %vm3280_vm2, %v7992_v54, 0.0  ;;  %v3517_v55 = vsel %vm3509_vm4, %v7978_v52, 0.0  ;;  %v8030_v23 = vadd.f32 %v4530_v60, %v7961_v29 }
 0xa84   : > { %vm3205_vm7 = vcmp.eq.s32.totalorder %v7853_v43, 1  ;;  %vm3434_vm2 = vcmp.eq.s32.totalorder %v7931_v7, 1  ;;  %v3058_v45 = vmul.f32 %v7985_v40, %v3046_v37  ;;  %v8040_v2 = vmul.f32 %v7987_v53, %v3290_v34  ;;  %v8058_v34 = vpop.permute.xlu1 %3345 }
 0xa85   : > { %9065 = vst [vmem:[#allocation78_spill] sm:$0xff] %v8030_v23  ;;  %v8044_v60 = vadd.f32 %v7961_v29, %v2678_v19  ;;  %v3047_v38 = vsel %vm3039_vm1, %v8030_v23, 0.0  ;;  %v3291_v37 = vsel %vm3283_vm6, %v8030_v23, 0.0  ;;  %vm3129_vm4 = vcmp.eq.s32.totalorder %v7845_v15, 1  ;;  %9068 = vst [vmem:[#allocation81_spill] sm:$0xff] %v8058_v34  ;;  %v8111_v11 = vpop.permute.xlu0 %3582 }
 0xa86   : > { %9067 = vst [vmem:[#allocation80_spill] sm:$0xff] %v8040_v2  ;;  %vm3130_vm3 = vcmp.eq.s32.totalorder %v7875_v1, 1  ;;  %v8061_v19 = vmul.f32 %v7989_v25, %v3517_v55  ;;  %v3523_v14 = vsel %vm3515_vm15, %v7992_v54, 0.0  ;;  %v8071_v21 = vmul.f32 %v7985_v40, %v3044_v6 }
 0xa87   : > { %v8054_v18 = vpop.f32.mrb[48].mxu0  ;;  %v2901_v44 = vrot.slane %v8044_v60, 7  ;;  %v9072_v2 = vrot.slane %v8030_v23, 7  ;;  %v9074_v28 = vrot.slane %v7978_v52, 1  ;;  %v3045_v34 = vsel %vm3037_vm0, %v8044_v60, 0.0 }
 0xa88   : > { %9069 = vst [vmem:[#allocation82_spill] sm:$0xff] %v8061_v19  ;;  %v8067_v62 = vpop.f32.mrb[49].mxu0  ;;  %9071 = vst [vmem:[#allocation84_spill] sm:$0xff] %v8071_v21  ;;  %v9073_v19 = vrot.slane %v8030_v23, 1  ;;  %vm3357_vm1 = vcmp.eq.s32.totalorder %v7877_v20, 1  ;;  %vm3356_vm15 = vcmp.eq.s32.totalorder %v7903_v50, 1  ;;  %v8103_v21 = vmul.f32 %v7987_v53, %v3288_v0  ;;  %v8133_v17 = vpop.permute.xlu1 %3351 }
 0xa89   : > { %9070 = vst [vmem:[#allocation83_spill] sm:$0xff] %v8067_v62  ;;  %v2915_v55 = vsel %vm8799_vm14, %v2902_v36, %v9072_v2  ;;  %v8086_v62 = vpop.f32.mrb[50].mxu0  ;;  %vm3432_vm6 = vcmp.eq.s32.totalorder %v7923_v42, 1  ;;  %vm3433_vm0 = vcmp.eq.s32.totalorder %v7897_v39, 1  ;;  %v3059_v27 = vmul.f32 %v7985_v40, %v3047_v38 }
 0xa8a   : > { %v3084_v12 = vsel %vm8800_vm9, %v9074_v28, %v9073_v19  ;;  %9075 = vst [vmem:[#allocation85_spill] sm:$0xff] %v8086_v62  ;;  %v2971_v6 = vsel %vm2963_vm12, %v2915_v55, 0.0  ;;  %v3215_v19 = vsel %vm3207_vm11, %v2915_v55, 0.0  ;;  %v8099_v28 = vpop.f32.mrb[51].mxu0  ;;  %9077 = vst [vmem:[#allocation87_spill] sm:$0xff] %v8103_v21  ;;  %v8106_v62 = vmul.f32 %v7989_v25, %v3523_v14 }
 0xa8b   : > { %v3139_v2 = vsel %vm3131_vm5, %v3084_v12, 0.0  ;;  %v3366_v47 = vsel %vm3358_vm8, %v3084_v12, 0.0  ;;  %9076 = vst [vmem:[#allocation86_spill] sm:$0xff] %v8099_v28  ;;  %v2983_v30 = vmul.f32 %v8006_v4, %v2971_v6  ;;  %vm3508_vm5 = vcmp.eq.s32.totalorder %v7939_v35, 1 }
 0xa8c   : > { %9078 = vst [vmem:[#allocation88_spill] sm:$0xff] %v8106_v62  ;;  %v8114_v31 = vmul.f32 %v7987_v53, %v3291_v37  ;;  %v3518_v28 = vsel %vm3510_vm13, %v8030_v23, 0.0  ;;  %v2916_v0 = vsel %vm8799_vm14, %v2901_v44, %v2902_v36  ;;  %v9079_v14 = vrot.slane %v7992_v54, 7 }
 0xa8d   : > { %v8125_v38 = vadd.f32 %v3059_v27, %v2983_v30  ;;  %v3151_v62 = vmul.f32 %v8008_v59, %v3139_v2  ;;  %vm9080_vm11 = vcmp.eq.s32.totalorder %v7855_v13, 1  ;;  %vm9081_vm12 = vcmp.eq.s32.totalorder %v7859_v49, 1 }
 0xa8e   : > { %v2917_v6 = vsel %vm8799_vm14, %v9079_v14, %v2901_v44  ;;  %v2970_v21 = vsel %vm9081_vm12, %v2916_v0, 0.0  ;;  %vm3042_vm8 = vcmp.eq.s32.totalorder %v7885_v48, 1  ;;  %v3057_v44 = vmul.f32 %v7985_v40, %v3045_v34 }
 0xa8f   : > { %v2969_v37 = vsel %vm9080_vm11, %v2917_v6, 0.0  ;;  %v2982_v23 = vmul.f32 %v8006_v4, %v2970_v21  ;;  %v3072_v30 = vrot.slane %v8044_v60, 1  ;;  %vm3584_vm13 = vcmp.eq.s32.totalorder %v7955_v58, 1 }
 0xa90   : > { %v2981_v36 = vmul.f32 %v8006_v4, %v2969_v37  ;;  %vm3591_vm14 = vcmp.eq.s32.totalorder %v8111_v11, 1  ;;  %v3442_v13 = vsel %vm3434_vm2, %v2915_v55, 0.0  ;;  %v3213_v49 = vsel %vm3205_vm7, %v2917_v6, 0.0 }
 0xa91   : > { %v3214_v2 = vsel %vm3206_vm10, %v2916_v0, 0.0  ;;  %vm9082_vm11 = vcmp.eq.s32.totalorder %v7861_v24, 1  ;;  %vm3040_vm12 = vcmp.eq.s32.totalorder %v7873_v26, 1  ;;  %v3066_v27 = vadd.f32 %v3058_v45, %v2982_v23  ;;  %v9093_v26 = vld [vmem:[#allocation78_spill] sm:$0xff] }
 0xa92   : > { %v3289_v21 = vsel %vm9082_vm11, %v8044_v60, 0.0  ;;  %v3065_v34 = vadd.f32 %v3057_v44, %v2981_v36  ;;  %v9083_v14 = vrot.slane %v7978_v52, 1  ;;  %v9084_v55 = vrot.slane %v7992_v54, 1 }
 0xa93   : > { %vm3286_vm10 = vcmp.eq.s32.totalorder %v7959_v9, 1  ;;  %v3227_v33 = vmul.f32 %v8010_v8, %v3215_v19  ;;  %v8162_v24 = vmul.f32 %v7989_v25, %v3518_v28  ;;  %vm3513_vm7 = vcmp.eq.s32.totalorder %v7957_v10, 1  ;;  %v9099_v10 = vld [vmem:[#allocation57_spill] sm:$0xff] }
 0xa94   : > { %v3085_v7 = vsel %vm8800_vm9, %v3072_v30, %v9083_v14  ;;  %v3086_v43 = vsel %vm8800_vm9, %v9084_v55, %v3072_v30  ;;  %v3378_v45 = vmul.f32 %v8012_v3, %v3366_v47  ;;  %vm9085_vm2 = vcmp.eq.s32.totalorder %v7929_v16, 1 }
 0xa95   : > { %v3137_v23 = vsel %vm3129_vm4, %v3086_v43, 0.0  ;;  %v3138_v52 = vsel %vm3130_vm3, %v3085_v7, 0.0  ;;  %v8172_v37 = vsel %vm9085_vm2, %v3084_v12, 0.0  ;;  %v3159_v19 = vadd.f32 %v3151_v62, %v3066_v27  ;;  %v8187_v62 = vpop.permute.xlu1 %3421 }
 0xa96   : > { %v3150_v36 = vmul.f32 %v8008_v59, %v3138_v52  ;;  %vm2964_vm11 = vcmp.eq.s32.totalorder %v7869_v56, 1  ;;  %vm3132_vm9 = vcmp.eq.s32.totalorder %v7919_v57, 1  ;;  %vm3208_vm4 = vcmp.eq.s32.totalorder %v7935_v61, 1  ;;  %v9102_v57 = vld [vmem:[#allocation61_spill] sm:$0xff] }
 0xa97   : > { %v3454_v15 = vmul.f32 %v8022_v5, %v3442_v13  ;;  %v3364_v1 = vsel %vm3356_vm15, %v3086_v43, 0.0  ;;  %v3365_v47 = vsel %vm3357_vm1, %v3085_v7, 0.0  ;;  %v3440_v16 = vsel %vm3432_vm6, %v2917_v6, 0.0  ;;  %v9087_v13 = vld [vmem:[#allocation83_spill] sm:$0xff] }
 0xa98   : > { %vm3359_vm3 = vcmp.eq.s32.totalorder %v7889_v22, 1  ;;  %vm3284_vm2 = vcmp.eq.s32.totalorder %v7951_v41, 1  ;;  %v3158_v12 = vadd.f32 %v3150_v36, %v3065_v34  ;;  %v8190_v28 = vmul.f32 %v8010_v8, %v3213_v49  ;;  %v9090_v34 = vld [vmem:[#allocation80_spill] sm:$0xff] }
 0xa99   : > { %v3226_v44 = vmul.f32 %v8010_v8, %v3214_v2  ;;  %v3441_v50 = vsel %vm3433_vm0, %v2916_v0, 0.0  ;;  %vm3435_vm1 = vcmp.eq.s32.totalorder %v7905_v51, 1  ;;  %vm3511_vm15 = vcmp.eq.s32.totalorder %v7921_v46, 1  ;;  %v9104_v41 = vld [vmem:[#allocation68_spill] sm:$0xff] }
 0xa9a   : > { %v8198_v20 = vmul.f32 %v8008_v59, %v3137_v23  ;;  %v8201_v42 = vmul.f32 %v7987_v53, %v3289_v21  ;;  %v3516_v6 = vsel %vm3508_vm5, %v8044_v60, 0.0  ;;  %v8208_v30 = vadd.f32 %v8054_v18, %v7961_v29  ;;  %v9092_v23 = vld [vmem:[#allocation59_spill] sm:$0xff] }
 0xa9b   : > { %vm3586_vm6 = vcmp.eq.s32.totalorder %v7994_v32, 1  ;;  %v3234_v39 = vadd.f32 %v3226_v44, %v3158_v12  ;;  %v8212_v0 = vmul.f32 %v8022_v5, %v3440_v16  ;;  %v8216_v49 = vadd.f32 %v7961_v29, %v9087_v13  ;;  %v9098_v44 = vld [vmem:[#allocation58_spill] sm:$0xff] }
 0xa9c   : > { %v3235_v2 = vadd.f32 %v3227_v33, %v3159_v19  ;;  %v8219_v21 = vmul.f32 %v8012_v3, %v3364_v1  ;;  %v8222_v35 = vmul.f32 %v8012_v3, %v3365_v47  ;;  %v8225_v18 = vmul.f32 %v8022_v5, %v3441_v50  ;;  %v8249_v1 = vpop.permute.xlu1 %3427 }
 0xa9d   : > { %9086 = vst [vmem:[#allocation89_spill] sm:$0xff] %v8212_v0  ;;  %v3050_v60 = vsel %vm3042_vm8, %v8208_v30, 0.0  ;;  %v3310_v27 = vadd.f32 %v9090_v34, %v3234_v39  ;;  %v8232_v14 = vmul.f32 %v7989_v25, %v3516_v6  ;;  %v8236_v55 = vsel %vm3584_vm13, %v3085_v7, 0.0  ;;  %v9101_v34 = vld [vmem:[#allocation71_spill] sm:$0xff]  ;;  %v9126_v0 = vld [vmem:[#allocation74_spill] sm:$0xff] }
 0xa9e   : > { %9088 = vst [vmem:[#allocation83_spill] sm:$0xff] %v8222_v35  ;;  %9089 = vst [vmem:[#allocation90_spill] sm:$0xff] %v8225_v18  ;;  %v8240_v33 = vsel %vm3591_vm14, %v3086_v43, 0.0  ;;  %vm3035_vm0 = vcmp.eq.s32.totalorder %v9092_v23, 1  ;;  %v8804_v52 = vrot.slane %v8208_v30, 7  ;;  %v8803_v48 = vrot.slane %v8216_v49, 7 }
 0xa9f   : > { %9091 = vst [vmem:[#allocation80_spill] sm:$0xff] %v8232_v14  ;;  %v3048_v36 = vsel %vm3040_vm12, %v8216_v49, 0.0  ;;  %v8801_v19 = vrot.slane %v8216_v49, 1  ;;  %v3386_v58 = vadd.f32 %v3378_v45, %v3310_v27  ;;  %v8802_v7 = vrot.slane %v8208_v30, 1  ;;  %v9128_v35 = vld [vmem:[#allocation81_spill] sm:$0xff] }
 0xaa0   : > { %v3294_v11 = vsel %vm3286_vm10, %v8208_v30, 0.0  ;;  %v3311_v43 = vadd.f32 %v8114_v31, %v3235_v2  ;;  %v3521_v47 = vsel %vm3513_vm7, %v8208_v30, 0.0  ;;  %v9094_v16 = vrot.slane %v9093_v26, 7  ;;  %v9100_v2 = vld [vmem:[#allocation60_spill] sm:$0xff] }
 0xaa1   : > { %vm9095_vm14 = vcmp.lt.s32.totalorder %v6399_v63, 1  ;;  %v3060_v45 = vmul.f32 %v7985_v40, %v3048_v36  ;;  %v9096_v9 = vrot.slane %v9093_v26, 1  ;;  %vm9097_vm5 = vcmp.lt.s32.totalorder %v6399_v63, 7 }
 0xaa2   : > { %v2914_v12 = vsel %vm9095_vm14, %v9094_v16, %v8803_v48  ;;  %vm2960_vm8 = vcmp.eq.s32.totalorder %v9098_v44, 1  ;;  %vm2959_vm13 = vcmp.eq.s32.totalorder %v9099_v10, 1  ;;  %v3462_v50 = vadd.f32 %v3454_v15, %v3386_v58  ;;  %v9103_v58 = vld [vmem:[#allocation64_spill] sm:$0xff] }
 0xaa3   : > { %v3083_v31 = vsel %vm9097_vm5, %v9096_v9, %v8801_v19  ;;  %v2972_v6 = vsel %vm2964_vm11, %v2914_v12, 0.0  ;;  %v3216_v13 = vsel %vm3208_vm4, %v2914_v12, 0.0  ;;  %vm3128_vm12 = vcmp.eq.s32.totalorder %v9100_v2, 1  ;;  %v9123_v2 = vld [vmem:[#allocation86_spill] sm:$0xff] }
 0xaa4   : > { %v3140_v39 = vsel %vm3132_vm9, %v3083_v31, 0.0  ;;  %vm3287_vm10 = vcmp.eq.s32.totalorder %v9101_v34, 1  ;;  %v2984_v27 = vmul.f32 %v8006_v4, %v2972_v6  ;;  %v3292_v15 = vsel %vm3284_vm2, %v8216_v49, 0.0  ;;  %v8299_v6 = vld [vmem:[#allocation25 + $0x8] ss:$0 sm:$0xff] }
 0xaa5   : > { %v3152_v36 = vmul.f32 %v8008_v59, %v3140_v39  ;;  %v3367_v56 = vsel %vm3359_vm3, %v3083_v31, 0.0  ;;  %vm3204_vm9 = vcmp.eq.s32.totalorder %v9102_v57, 1  ;;  %vm3135_vm7 = vcmp.eq.s32.totalorder %v9103_v58, 1  ;;  %v9125_v58 = vld [vmem:[#allocation66_spill] sm:$0xff]  ;;  %v9127_v57 = vld [vmem:[#allocation73_spill] sm:$0xff] }
 0xaa6   : > { %v3379_v61 = vmul.f32 %v8012_v3, %v3367_v56  ;;  %v3443_v26 = vsel %vm3435_vm1, %v2914_v12, 0.0  ;;  %v3519_v16 = vsel %vm3511_vm15, %v8216_v49, 0.0  ;;  %v3538_v9 = vadd.f32 %v8162_v24, %v3462_v50  ;;  %v8308_v12 = vpop.permute.xlu1 %3497  ;;  %v9105_v56 = vld [vmem:[#allocation85_spill] sm:$0xff] }
 0xaa7   : > { %vm3211_vm11 = vcmp.eq.s32.totalorder %v9104_v41, 1  ;;  %v8301_v22 = vadd.f32 %v3060_v45, %v2984_v27  ;;  %v3160_v39 = vadd.f32 %v3152_v36, %v8125_v38  ;;  %v3228_v19 = vmul.f32 %v8010_v8, %v3216_v13  ;;  %v9107_v27 = vld [vmem:[#allocation75_spill] sm:$0xff]  ;;  %v9108_v36 = vld [vmem:[#allocation77_spill] sm:$0xff] }
 0xaa8   : > { %v3594_v51 = vsel %vm3586_vm6, %v3083_v31, 0.0  ;;  %vm3362_vm4 = vcmp.eq.s32.totalorder %v8133_v17, 1  ;;  %v3387_v46 = vadd.f32 %v3379_v61, %v3311_v43  ;;  %v3455_v24 = vmul.f32 %v8022_v5, %v3443_v26 }
 0xaa9   : > { %v3606_v50 = vmul.f32 %v8299_v6, %v3594_v51  ;;  %v8314_v45 = vadd.f32 %v9105_v56, %v7961_v29  ;;  %v8317_v38 = vmul.f32 %v7985_v40, %v3050_v60  ;;  %v3236_v13 = vadd.f32 %v3228_v19, %v3160_v39  ;;  %v9109_v19 = vld [vmem:[#allocation79_spill] sm:$0xff] }
 0xaaa   : > { %v3304_v32 = vmul.f32 %v7987_v53, %v3292_v15  ;;  %v3531_v31 = vmul.f32 %v7989_v25, %v3519_v16  ;;  %vm3363_vm3 = vcmp.eq.s32.totalorder %v9107_v27, 1  ;;  %vm3439_vm2 = vcmp.eq.s32.totalorder %v9108_v36, 1 }
 0xaab   : > { %9106 = vst [vmem:[#allocation59_spill] sm:$0xff] %v8314_v45  ;;  %vm3438_vm1 = vcmp.eq.s32.totalorder %v8249_v1, 1  ;;  %v3463_v43 = vadd.f32 %v3455_v24, %v3387_v46  ;;  %v8324_v61 = vadd.f32 %v3606_v50, %v3538_v9  ;;  %v2907_v26 = vrot.slane %v8314_v45, 7  ;;  %v9111_v9 = vld [vmem:[#allocation67_spill] sm:$0xff]  ;;  %v9112_v46 = vld [vmem:[#allocation69_spill] sm:$0xff] }
 0xaac   : > { %v3043_v60 = vsel %vm3035_vm0, %v8314_v45, 0.0  ;;  %v8332_v15 = vmul.f32 %v7987_v53, %v3294_v11  ;;  %v8335_v16 = vmul.f32 %v7989_v25, %v3521_v47  ;;  %v8337_v39 = vadd.f32 %v3304_v32, %v3236_v13  ;;  %vm9113_vm0 = vmmov %vm9095_vm14 }
 0xaad   : > { %v3078_v51 = vrot.slane %v8314_v45, 1  ;;  %vm3041_vm6 = vcmp.eq.s32.totalorder %v9111_v9, 1  ;;  %v8342_v24 = vadd.f32 %v3531_v31, %v3463_v43  ;;  %v2911_v23 = vsel %vm9113_vm0, %v8804_v52, %v2907_v26  ;;  %vm9115_vm5 = vmmov %vm9113_vm0 }
 0xaae   : > { %9110 = vst [vmem:[#allocation78_spill] sm:$0xff] %v8335_v16  ;;  %v9114_v11 = vrot.slane %v7992_v54, 7  ;;  %v3055_v50 = vmul.f32 %v7985_v40, %v3043_v60  ;;  %vm3512_vm15 = vcmp.eq.s32.totalorder %v8308_v12, 1  ;;  %v2967_v56 = vsel %vm2959_vm13, %v2911_v23, 0.0 }
 0xaaf   : > { %vm9116_vm14 = vcmp.lt.s32.totalorder %v6399_v63, 7  ;;  %v9117_v31 = vrot.slane %v7992_v54, 1  ;;  %v2979_v60 = vmul.f32 %v8006_v4, %v2967_v56  ;;  %v9120_v54 = vld [vmem:[#allocation63_spill] sm:$0xff]  ;;  %v2695_v48 = vadd.f32 %v7961_v29, %v9123_v2 }
 0xab0   : > { %v2918_v47 = vsel %vm9115_vm5, %v2907_v26, %v9114_v11  ;;  %v3080_v32 = vsel %vm9116_vm14, %v8802_v7, %v3078_v51  ;;  %vm9118_vm0 = vmmov %vm9116_vm14  ;;  %v8368_v26 = vpop.permute.xlu1 %3503  ;;  %v3295_v11 = vsel %vm3287_vm10, %v8314_v45, 0.0  ;;  %v9119_v7 = vld [vmem:[#allocation62_spill] sm:$0xff]  ;;  %vm3133_vm13 = vcmp.eq.s32.totalorder %v9120_v54, 1  ;;  %v9124_v45 = vld [vmem:[#allocation84_spill] sm:$0xff] }
 0xab1   : > { %v2968_v13 = vsel %vm2960_vm8, %v2918_v47, 0.0  ;;  %v8366_v43 = vsel %vm9118_vm0, %v3078_v51, %v9117_v31  ;;  %vm2966_vm8 = vcmp.eq.s32.totalorder %v9119_v7, 1  ;;  %v9121_v51 = vld [vmem:[#allocation65_spill] sm:$0xff]  ;;  %v9122_v31 = vld [vmem:[#allocation70_spill] sm:$0xff]  ;;  %v3143_v56 = vsel %vm3135_vm7, %v3080_v32, 0.0 }
 0xab2   : > { %v2980_v10 = vmul.f32 %v8006_v4, %v2968_v13  ;;  %v3136_v44 = vsel %vm3128_vm12, %v8366_v43, 0.0  ;;  %vm2965_vm14 = vcmp.eq.s32.totalorder %v9121_v51, 1  ;;  %vm3134_vm5 = vcmp.eq.s32.totalorder %v9122_v31, 1 }
 0xab3   : > { %v3212_v13 = vsel %vm3204_vm9, %v2918_v47, 0.0  ;;  %v8390_v34 = vmul.f32 %v8299_v6, %v8236_v55  ;;  %v3063_v52 = vadd.f32 %v3055_v50, %v2979_v60  ;;  %v3148_v14 = vmul.f32 %v8008_v59, %v3136_v44 }
 0xab4   : > { %v3064_v16 = vadd.f32 %v9124_v45, %v2980_v10  ;;  %v3219_v18 = vsel %vm3211_vm11, %v2911_v23, 0.0  ;;  %vm3209_vm12 = vcmp.eq.s32.totalorder %v9125_v58, 1  ;;  %vm3210_vm10 = vcmp.eq.s32.totalorder %v9126_v0, 1 }
 0xab5   : > { %vm3361_vm9 = vcmp.eq.s32.totalorder %v9127_v57, 1  ;;  %vm3360_vm7 = vcmp.eq.s32.totalorder %v9128_v35, 1  ;;  %v8401_v29 = vmul.f32 %v7987_v53, %v3295_v11  ;;  %v3370_v55 = vsel %vm3362_vm4, %v3080_v32, 0.0 }
 0xab6   : > { %v8407_v45 = vmul.f32 %v8299_v6, %v8172_v37  ;;  %v8411_v41 = vmul.f32 %v8299_v6, %v8240_v33  ;;  %v3155_v50 = vmul.f32 %v8008_v59, %v3143_v56  ;;  %v3156_v60 = vadd.f32 %v3148_v14, %v3063_v52  ;;  %v3574_v52 = vpop.permute.xlu1 %3573  ;;  %v9132_v56 = vld [vmem:[#allocation72_spill] sm:$0xff] }
 0xab7   : > { %v3157_v10 = vadd.f32 %v8198_v20, %v3064_v16  ;;  %v3224_v44 = vmul.f32 %v8010_v8, %v3212_v13  ;;  %vm3436_vm11 = vcmp.eq.s32.totalorder %v8187_v62, 1  ;;  %v3231_v17 = vmul.f32 %v8010_v8, %v3219_v18  ;;  %v9129_v20 = vld [vmem:[#allocation76_spill] sm:$0xff]  ;;  %v9133_v13 = vld [vmem:[#allocation87_spill] sm:$0xff] }
 0xab8   : > { %v8421_v37 = vsel %vm3363_vm3, %v8366_v43, 0.0  ;;  %v8425_v33 = vsel %vm3438_vm1, %v2911_v23, 0.0  ;;  %v8429_v14 = vsel %vm3439_vm2, %v2918_v47, 0.0  ;;  %vm3437_vm4 = vcmp.eq.s32.totalorder %v9129_v20, 1 }
 0xab9   : > { %v3232_v16 = vadd.f32 %v3224_v44, %v3156_v60  ;;  %v3233_v11 = vadd.f32 %v8190_v28, %v3157_v10  ;;  %v8434_v18 = vmul.f32 %v8012_v3, %v3370_v55  ;;  %vm9130_vm3 = vcmp.eq.s32.totalorder %v9109_v19, 1 }
 0xaba   : > { %v8438_v27 = vsel %vm9130_vm3, %v3080_v32, 0.0  ;;  %v2905_v1 = vrot.slane %v2695_v48, 7  ;;  %v3049_v23 = vsel %vm3041_vm6, %v2695_v48, 0.0  ;;  %v3076_v36 = vrot.slane %v2695_v48, 1  ;;  %v3580_v20 = vpop.permute.xlu1 %3579 }
 0xabb   : > { %vm9131_vm2 = vcmp.eq.s32.totalorder %v9112_v46, 1  ;;  %vm3587_vm1 = vcmp.eq.s32.totalorder %v9132_v56, 1  ;;  %v3308_v2 = vadd.f32 %v9133_v13, %v3232_v16  ;;  %v3061_v28 = vmul.f32 %v7985_v40, %v3049_v23 }
 0xabc   : > { %v3293_v47 = vsel %vm9131_vm2, %v2695_v48, 0.0  ;;  %v3520_v19 = vsel %vm3512_vm15, %v2695_v48, 0.0  ;;  %vm3588_vm0 = vcmp.eq.s32.totalorder %v3574_v52, 1  ;;  %v9134_v32 = vrot.slane %v8208_v30, 7 }
 0xabd   : > { %v3305_v55 = vmul.f32 %v7987_v53, %v3293_v47  ;;  %vm9135_vm6 = vcmp.lt.s32.totalorder %v6399_v63, 1  ;;  %v9136_v46 = vrot.slane %v8216_v49, 7  ;;  %v9138_v10 = vrot.slane %v8208_v30, 1 }
 0xabe   : > { %v2912_v9 = vsel %vm9135_vm6, %v2905_v1, %v9134_v32  ;;  %vm9137_vm3 = vmmov %vm9135_vm6  ;;  %vm9139_vm2 = vcmp.lt.s32.totalorder %v6399_v63, 7  ;;  %v9140_v53 = vrot.slane %v8216_v49, 1 }
 0xabf   : > { %v2913_v60 = vsel %vm9137_vm3, %v9136_v46, %v2905_v1  ;;  %v3081_v40 = vsel %vm9139_vm2, %v3076_v36, %v9138_v10  ;;  %vm9141_vm15 = vmmov %vm9139_vm2  ;;  %v2974_v44 = vsel %vm2966_vm8, %v2912_v9, 0.0  ;;  %v3218_v7 = vsel %vm3210_vm10, %v2912_v9, 0.0 }
 0xac0   : > { %v3082_v48 = vsel %vm9141_vm15, %v9140_v53, %v3076_v36  ;;  %v2973_v12 = vsel %vm2965_vm14, %v2913_v60, 0.0  ;;  %v3142_v30 = vsel %vm3134_vm5, %v3081_v40, 0.0  ;;  %v2986_v23 = vmul.f32 %v8006_v4, %v2974_v44  ;;  %v8500_v53 = vld [vmem:[#allocation26] ss:$0 sm:$0xff] }
 0xac1   : > { %v3141_v16 = vsel %vm3133_vm13, %v3082_v48, 0.0  ;;  %v2985_v1 = vmul.f32 %v8006_v4, %v2973_v12  ;;  %v3154_v63 = vmul.f32 %v8008_v59, %v3142_v30  ;;  %v3217_v51 = vsel %vm3209_vm12, %v2913_v60, 0.0 }
 0xac2   : > { %v3153_v49 = vmul.f32 %v8008_v59, %v3141_v16  ;;  %v3368_v54 = vsel %vm3360_vm7, %v3082_v48, 0.0  ;;  %v3369_v31 = vsel %vm3361_vm9, %v3081_v40, 0.0  ;;  %v3070_v47 = vadd.f32 %v8317_v38, %v2986_v23 }
 0xac3   : > { %v3069_v36 = vadd.f32 %v3061_v28, %v2985_v1  ;;  %v3229_v13 = vmul.f32 %v8010_v8, %v3217_v51  ;;  %v3230_v59 = vmul.f32 %v8010_v8, %v3218_v7  ;;  %v3380_v58 = vmul.f32 %v8012_v3, %v3368_v54  ;;  %v9145_v51 = vld [vmem:[#allocation80_spill] sm:$0xff] }
 0xac4   : > { %v3161_v4 = vadd.f32 %v3153_v49, %v8301_v22  ;;  %v3381_v0 = vmul.f32 %v8012_v3, %v3369_v31  ;;  %v3444_v35 = vsel %vm3436_vm11, %v2913_v60, 0.0  ;;  %v3163_v46 = vadd.f32 %v3155_v50, %v3070_v47  ;;  %v9147_v47 = vld [vmem:[#allocation82_spill] sm:$0xff] }
 0xac5   : > { %v3162_v32 = vadd.f32 %v3154_v63, %v3069_v36  ;;  %v3445_v28 = vsel %vm3437_vm4, %v2912_v9, 0.0  ;;  %v3388_v38 = vadd.f32 %v3380_v58, %v8337_v39  ;;  %v3456_v22 = vmul.f32 %v8022_v5, %v3444_v35 }
 0xac6   : > { %v3237_v57 = vadd.f32 %v3229_v13, %v3161_v4  ;;  %v3457_v10 = vmul.f32 %v8022_v5, %v3445_v28  ;;  %v3532_v8 = vmul.f32 %v7989_v25, %v3520_v19  ;;  %vm3514_vm8 = vcmp.eq.s32.totalorder %v8368_v26, 1 }
 0xac7   : > { %v3238_v62 = vadd.f32 %v3230_v59, %v3162_v32  ;;  %v3239_v60 = vadd.f32 %v3231_v17, %v3163_v46  ;;  %v3595_v50 = vsel %vm3587_vm1, %v3082_v48, 0.0  ;;  %v3464_v9 = vadd.f32 %v3456_v22, %v3388_v38  ;;  %v9142_v48 = vld [vmem:[#allocation83_spill] sm:$0xff] }
 0xac8   : > { %v3313_v12 = vadd.f32 %v3305_v55, %v3237_v57  ;;  %v3596_v39 = vsel %vm3588_vm0, %v3081_v40, 0.0  ;;  %v3607_v44 = vmul.f32 %v8299_v6, %v3595_v50  ;;  %v3309_v16 = vadd.f32 %v8201_v42, %v3233_v11  ;;  %v9148_v32 = vld [vmem:[#allocation59_spill] sm:$0xff] }
 0xac9   : > { %v3314_v19 = vadd.f32 %v8332_v15, %v3238_v62  ;;  %v3384_v1 = vadd.f32 %v8219_v21, %v3308_v2  ;;  %v8512_v17 = vadd.f32 %v8500_v53, %v8324_v61  ;;  %v3540_v55 = vadd.f32 %v3532_v8, %v3464_v9  ;;  %v9143_v15 = vld [vmem:[#allocation89_spill] sm:$0xff]  ;;  %v9144_v2 = vld [vmem:[#allocation90_spill] sm:$0xff] }
 0xaca   : > { %v3389_v30 = vadd.f32 %v3381_v0, %v3313_v12  ;;  %v3615_v56 = vadd.f32 %v3607_v44, %v8342_v24  ;;  %v3385_v23 = vadd.f32 %v9142_v48, %v3309_v16  ;;  %v3608_v52 = vmul.f32 %v8299_v6, %v3596_v39 }
 0xacb   : > { %vm3590_vm13 = vcmp.eq.s32.totalorder %v3580_v20, 1  ;;  %v3383_v42 = vmul.f32 %v8012_v3, %v8421_v37  ;;  %v3460_v40 = vadd.f32 %v9143_v15, %v3384_v1  ;;  %v3645_v21 = vmul.f32 %v8512_v17, %v8512_v17  ;;  %v9146_v3 = vld [vmem:[#allocation78_spill] sm:$0xff] }
 0xacc   : > { %v3465_v11 = vadd.f32 %v3457_v10, %v3389_v30  ;;  %v3461_v61 = vadd.f32 %v9144_v2, %v3385_v23  ;;  %v8524_v49 = vadd.f32 %v8500_v53, %v3615_v56  ;;  %v3609_v24 = vmul.f32 %v8299_v6, %v8438_v27 }
 0xacd   : > { %v3616_v63 = vadd.f32 %v3608_v52, %v3540_v55  ;;  %v3536_v7 = vadd.f32 %v9145_v51, %v3460_v40  ;;  %v3653_v54 = vmul.f32 %v3645_v21, %v8512_v17  ;;  %v3315_v31 = vadd.f32 %v8401_v29, %v3239_v60  ;;  %v9149_v55 = vld [vmem:[#allocation88_spill] sm:$0xff] }
 0xace   : > { %v3541_v37 = vadd.f32 %v9146_v3, %v3465_v11  ;;  %v3458_v36 = vmul.f32 %v8022_v5, %v8425_v33  ;;  %v3537_v4 = vadd.f32 %v9147_v47, %v3461_v61  ;;  %v3646_v13 = vmul.f32 %v8524_v49, %v8524_v49 }
 0xacf   : > { %v8538_v59 = vadd.f32 %v8500_v53, %v3616_v63  ;;  %v3612_v27 = vadd.f32 %v8390_v34, %v3536_v7  ;;  %v3661_v58 = vmul.f32 0.044715, %v3653_v54  ;;  %v3390_v35 = vadd.f32 %v8434_v18, %v3314_v19 }
 0xad0   : > { %v3617_v0 = vadd.f32 %v3609_v24, %v3541_v37  ;;  %v3522_v29 = vsel %vm3514_vm8, %v9148_v32, 0.0  ;;  %v3613_v33 = vadd.f32 %v8407_v45, %v3537_v4  ;;  %v3654_v46 = vmul.f32 %v3646_v13, %v8524_v49 }
 0xad1   : > { %v3647_v57 = vmul.f32 %v8538_v59, %v8538_v59  ;;  %v8550_v28 = vadd.f32 %v8500_v53, %v3612_v27  ;;  %v3669_v34 = vadd.f32 %v3661_v58, %v8512_v17  ;;  %v3391_v18 = vadd.f32 %v3383_v42, %v3315_v31 }
 0xad2   : > { %v8554_v38 = vadd.f32 %v8500_v53, %v3617_v0  ;;  %v8557_v22 = vadd.f32 %v8500_v53, %v3613_v33  ;;  %v3662_v26 = vmul.f32 0.044715, %v3654_v46  ;;  %v3466_v10 = vadd.f32 %v3458_v36, %v3390_v35 }
 0xad3   : > { %v3655_v45 = vmul.f32 %v3647_v57, %v8538_v59  ;;  %v3459_v8 = vmul.f32 %v8022_v5, %v8429_v14  ;;  %v3534_v62 = vmul.f32 %v7989_v25, %v3522_v29  ;;  %v3643_v60 = vmul.f32 %v8550_v28, %v8550_v28 }
 0xad4   : > { %v3677_v12 = vmul.f32 0.7978846, %v3669_v34  ;;  %v3598_v50 = vsel %vm3590_vm13, %v8366_v43, 0.0  ;;  %v3644_v9 = vmul.f32 %v8557_v22, %v8557_v22  ;;  %v3670_v39 = vadd.f32 %v3662_v26, %v8524_v49 }
 0xad5   : > { %v3648_v44 = vmul.f32 %v8554_v38, %v8554_v38  ;;  %v3651_v16 = vmul.f32 %v3643_v60, %v8550_v28  ;;  %v3663_v5 = vmul.f32 0.044715, %v3655_v45  ;;  %v3467_v25 = vadd.f32 %v3459_v8, %v3391_v18 }
 0xad6   : > { %5031 = vtanh.f32 %v3677_v12  ;;  %v3652_v14 = vmul.f32 %v3644_v9, %v8557_v22  ;;  %v3678_v19 = vmul.f32 0.7978846, %v3670_v39  ;;  %v3542_v20 = vadd.f32 %v3534_v62, %v3466_v10 }
 0xad7   : > { %v3656_v30 = vmul.f32 %v3648_v44, %v8554_v38  ;;  %v3659_v43 = vmul.f32 0.044715, %v3651_v16  ;;  %v3671_v1 = vadd.f32 %v3663_v5, %v8538_v59  ;;  %v3543_v56 = vadd.f32 %v9149_v55, %v3467_v25 }
 0xad8   : > { %v3610_v48 = vmul.f32 %v8299_v6, %v3598_v50  ;;  %v3660_v23 = vmul.f32 0.044715, %v3652_v14  ;;  %5033 = vtanh.f32 %v3678_v19  ;;  %v3637_v36 = vmul.f32 0.5, %v8512_v17 }
 0xad9   : > { %v3664_v52 = vmul.f32 0.044715, %v3656_v30  ;;  %v3667_v42 = vadd.f32 %v3659_v43, %v8550_v28  ;;  %v3679_v11 = vmul.f32 0.7978846, %v3671_v1  ;;  %v3619_v40 = vadd.f32 %v8411_v41, %v3543_v56 }
 0xada   : > { %v3618_v15 = vadd.f32 %v3610_v48, %v3542_v20  ;;  %v3668_v21 = vadd.f32 %v3660_v23, %v8557_v22  ;;  %v3638_v27 = vmul.f32 0.5, %v8524_v49  ;;  %v3635_v26 = vmul.f32 0.5, %v8550_v28 }
 0xadb   : > { %v3672_v2 = vadd.f32 %v3664_v52, %v8554_v38  ;;  %v3675_v61 = vmul.f32 0.7978846, %v3667_v42  ;;  %5035 = vtanh.f32 %v3679_v11  ;;  %v3634_v63 = vadd.f32 %v8500_v53, %v3619_v40  ;;  %v9150_v52 = vld [vmem:[#allocation50_spill] sm:$0xff]  ;;  %v9151_v40 = vld [vmem:[#allocation49_spill] sm:$0xff] }
 0xadc   : > { %v3633_v24 = vadd.f32 %v8500_v53, %v3618_v15  ;;  %v3676_v6 = vmul.f32 0.7978846, %v3668_v21  ;;  %v3636_v49 = vmul.f32 0.5, %v8557_v22  ;;  %v3639_v60 = vmul.f32 0.5, %v8538_v59 }
 0xadd   : > { %v3680_v51 = vmul.f32 0.7978846, %v3672_v2  ;;  %5037 = vtanh.f32 %v3675_v61  ;;  %v3650_v54 = vmul.f32 %v3634_v63, %v3634_v63  ;;  %v3640_v12 = vmul.f32 0.5, %v8554_v38  ;;  %v4225_v38 = vld [vmem:[#allocation29] ss:$0 sm:$0xff] }
 0xade   : > { %v3649_v7 = vmul.f32 %v3633_v24, %v3633_v24  ;;  %5039 = vtanh.f32 %v3676_v6  ;;  %v3641_v14 = vmul.f32 0.5, %v3633_v24  ;;  %v3642_v22 = vmul.f32 0.5, %v3634_v63  ;;  %v9153_v61 = vld [vmem:[#allocation52_spill] sm:$0xff] }
 0xadf   : > { %5041 = vtanh.f32 %v3680_v51  ;;  %v3658_v31 = vmul.f32 %v3650_v54, %v3634_v63  ;;  %vm9152_vm14 = vcmask 261120  }
 0xae0   : > { %v5032_v3 = vpop.eup %5031  ;;  %v3657_v37 = vmul.f32 %v3649_v7, %v3633_v24  ;;  %vm9154_vm5 = vmmov %vm9152_vm14 }
 0xae1   : > { %v3693_v41 = vadd.f32 1.0, %v5032_v3  ;;  %v3666_v13 = vmul.f32 0.044715, %v3658_v31  ;;  %vm9156_vm12 = vmmov %vm9154_vm5 }
 0xae2   : > { %v3665_v47 = vmul.f32 0.044715, %v3657_v37  ;;  %v5034_v4 = vpop.eup %5033  ;;  %vm9157_vm10 = vmmov %vm9154_vm5 }
 0xae3   : > { %v3694_v58 = vadd.f32 1.0, %v5034_v4  ;;  %v3701_v53 = vmul.f32 %v3693_v41, %v3637_v36  ;;  %v3674_v35 = vadd.f32 %v3666_v13, %v3634_v63  ;;  %v9155_v63 = vld [vmem:[#allocation51_spill] sm:$0xff]  ;;  %v9158_v41 = vld [vmem:[#allocation54_spill] sm:$0xff]  ;;  %v9159_v4 = vld [vmem:[#allocation53_spill] sm:$0xff] }
 0xae4   : > { %v3673_v0 = vadd.f32 %v3665_v47, %v3633_v24  ;;  %vm9160_vm9 = vmmov %vm9154_vm5 }
 0xae5   : > { %v5036_v32 = vpop.eup %5035  ;;  %v3702_v29 = vmul.f32 %v3694_v58, %v3638_v27  ;;  %v3682_v46 = vmul.f32 0.7978846, %v3674_v35  ;;  %v9161_v58 = vld [vmem:[#allocation56_spill] sm:$0xff]  ;;  %vm9163_vm7 = vmmov %vm9154_vm5 }
 0xae6   : > { %v3681_v33 = vmul.f32 0.7978846, %v3673_v0  ;;  %v3695_v45 = vadd.f32 1.0, %v5036_v32  ;;  %v9164_v0 = vld [vmem:[#allocation55_spill] sm:$0xff]  ;;  %vm9165_vm11 = vmmov %vm9154_vm5 }
 0xae7   : > { %v5038_v57 = vpop.eup %5037  ;;  %v3708_v34 = vpack.c.bf16 %v3702_v29, %v3701_v53  ;;  %vm9166_vm4 = vmmov %vm9154_vm5 }
 0xae8   : > { %5043 = vtanh.f32 %v3681_v33  ;;  %v5040_v18 = vpop.eup %5039  ;;  %v3691_v17 = vadd.f32 1.0, %v5038_v57  ;;  %v3703_v39 = vmul.f32 %v3695_v45, %v3639_v60 }
 0xae9   : > { %5045 = vtanh.f32 %v3682_v46  ;;  %v5042_v10 = vpop.eup %5041  ;;  %v3692_v8 = vadd.f32 1.0, %v5040_v18 }
 0xaea   : > { %v3699_v62 = vmul.f32 %v3691_v17, %v3635_v26  ;;  %v3696_v50 = vadd.f32 1.0, %v5042_v10 }
 0xaeb   : > { %v3700_v9 = vmul.f32 %v3692_v8, %v3636_v49 }
 0xaec   : > { %v3704_v44 = vmul.f32 %v3696_v50, %v3640_v12 }
 0xaed   : > { %v3707_v16 = vpack.c.bf16 %v3700_v9, %v3699_v62 }
 0xaee   : > { %v3709_v5 = vpack.c.bf16 %v3704_v44, %v3703_v39 }
 0xaef   : > { %4551 = vmatprep.mubr.bf16.mxu1 %v3707_v16 }
 0xaf0   : > { %4552 = vmatmul.mubr.bf16.vlgmr.msra.gmra.mrb[32].mxu1 %v3708_v34 }
 0xaf1   : > { %4555 = vmatprep.mubr.bf16.mxu1 %v3709_v5 }
 0xaf2   : > { %v5044_v28 = vpop.eup %5043 }
 0xaf3   : > { %v5046_v25 = vpop.eup %5045  ;;  %v3697_v19 = vadd.f32 1.0, %v5044_v28 }
 0xaf4   : > { %v3698_v30 = vadd.f32 1.0, %v5046_v25 }
 0xaf5   : > { %v3705_v20 = vmul.f32 %v3697_v19, %v3641_v14 }
 0xaf6   : > { %v3706_v59 = vmul.f32 %v3698_v30, %v3642_v22 }
 0xaf8   : > { %v3710_v43 = vpack.c.bf16 %v3706_v59, %v3705_v20 }
 0xafa   : > { %4556 = vmatmul.mubr.bf16.gmra.mrb[36].mxu1 %v3710_v43 }
 0xbc3   : > { %v4553_v1 = vpop.f32.mrb[32].mxu1 }
 0xbc4   : > { %v3825_v55 = vadd.f32 %v4553_v1, %v4225_v38  ;;  %v3816_v56 = vpop.f32.mrb[33].mxu1 }
 0xbc5   : > { %v3817_v48 = vadd.f32 %v4225_v38, %v3816_v56  ;;  %v4554_v23 = vpop.f32.mrb[34].mxu1 }
 0xbc6   : > { %v3849_v42 = vadd.f32 %v3825_v55, %v9150_v52  ;;  %v3828_v11 = vadd.f32 %v4554_v23, %v4225_v38  ;;  %v3819_v15 = vpop.f32.mrb[35].mxu1 }
 0xbc7   : > { %v3847_v21 = vadd.f32 %v3817_v48, %v9151_v40  ;;  %v3820_v2 = vadd.f32 %v4225_v38, %v3819_v15 }
 0xbc8   : > { %3857 = vst.msk [vmem:[%s824_s3 + $0x10] sm:$0xff] %vm9152_vm14, %v3849_v42  ;;  %v3850_v24 = vadd.f32 %v3828_v11, %v9153_v61 }
 0xbc9   : > { %3855 = vst.msk [vmem:[%s824_s3] sm:$0xff] %vm9154_vm5, %v3847_v21  ;;  %v3848_v6 = vadd.f32 %v3820_v2, %v9155_v63 }
 0xbca   : > { %3858 = vst.msk [vmem:[%s824_s3 + $0x18] sm:$0xff] %vm9156_vm12, %v3850_v24 }
 0xbcb   : > { %3856 = vst.msk [vmem:[%s824_s3 + $0x8] sm:$0xff] %vm9157_vm10, %v3848_v6 }
 0xbcd   : > { %v4557_v51 = vpop.f32.mrb[36].mxu1 }
 0xbce   : > { %v3841_v7 = vadd.f32 %v4557_v51, %v4225_v38  ;;  %v3832_v54 = vpop.f32.mrb[37].mxu1 }
 0xbcf   : > { %v3833_v3 = vadd.f32 %v4225_v38, %v3832_v54  ;;  %v4558_v37 = vpop.f32.mrb[38].mxu1 }
 0xbd0   : > { %v3853_v31 = vadd.f32 %v3841_v7, %v9158_v41  ;;  %v3844_v36 = vadd.f32 %v4558_v37, %v4225_v38  ;;  %v3835_v47 = vpop.f32.mrb[39].mxu1 }
 0xbd1   : > { %v3851_v13 = vadd.f32 %v3833_v3, %v9159_v4  ;;  %v3836_v27 = vadd.f32 %v4225_v38, %v3835_v47 }
 0xbd2   : > { %3861 = vst.msk [vmem:[%s824_s3 + $0x30] sm:$0xff] %vm9160_vm9, %v3853_v31  ;;  %v3854_v53 = vadd.f32 %v3844_v36, %v9161_v58 }
 0xbd3   : > { %3859 = vst.msk [vmem:[%s824_s3 + $0x20] sm:$0xff] %vm9163_vm7, %v3851_v13  ;;  %v3852_v35 = vadd.f32 %v3836_v27, %v9164_v0 }
 0xbd4   : > { %3862 = vst.msk [vmem:[%s824_s3 + $0x38] sm:$0xff] %vm9165_vm11, %v3854_v53 }
 0xbd5   : > { %3860 = vst.msk [vmem:[%s824_s3 + $0x28] sm:$0xff] %vm9166_vm4, %v3852_v35 }
 0xbd6   : > { %5574 = shalt.err (!%p5571_p0)
}
 0xbd7   : > { %s5575_s5 = scalar_lea.hbm %s8608_s21, 1024  ;;  %s5579_s2 = scalar_lea.hbm %s9162_s1, 2048 }
 0xbd8   : > { %p5576_p2 = scmp.ne.s32.totalorder %s8608_s21, %s5575_s5  ;;  %p5580_p10 = scmp.lt.u32.totalorder %s8608_s21, %s9162_s1 }
 0xbd9   : > { %p5581_p11 = scmp.lt.u32.totalorder %s5579_s2, %s5575_s5  ;;  %p5583_p5 = scmp.lt.u32.totalorder %s5575_s5, %s8608_s21 }
 0xbda   : > { %p5577_p8 = pnand %p5576_p2, %p9167_p9 }
 0xbdb   : > { %p5582_p3 = por %p5581_p11, %p5580_p10 }
 0xbdc   : > { %p5578_p6 = pneg %p5577_p8 }
 0xbdd   : > { %p5584_p7 = por %p5583_p5, %p5582_p3 }
 0xbdf   : > { %p5585_p4 = pnand %p5584_p7, %p5578_p6 }
 0xbe1   : > { %5588 = shalt.err (!%p5585_p4)
}
 0xbe2   : > { %s5689_s17 = smov 128   ;;  %s5690_s24 = smov 8  }
 0xbe3   : > { %4697 = dma.vmem_to_hbm [thread:$0]  (%p9167_p9), %s8610_s27, 1024, %s8608_s21, %s3864_s4, %s5689_s17, %s5689_s17, %s5690_s24  }
 0xbe4 PF: > { %s9168_s29 = sld [smem:[#allocation43_spill]]  ;;  %s9169_s3 = sld [smem:[#allocation46_spill]] }
 0xbe5   : > { %p9170_p12 = scmp.ne.s32.totalorder %s8841_s19, 0 }
 0xbea   : > { %s3892_s23 = sand.u32 1, %s9168_s29   ;;  %p9171_p1 = scmp.ge.s32.totalorder %s9169_s3, 2 }
 0xbeb   : > { %s3893_s5 = scalar_lea.sflag [#allocation4], %s3892_s23 }
 0xbec   : > { %p4756_p13 = pnand %p9171_p1, %p9170_p12 }
 0xbee   : > { %5646 = dma.done.wait (!%p4756_p13), %s3893_s5, 1024  }
 0xbef   : > { %5648 = vsyncadd (!%p4756_p13), %s3893_s5, 4294966272  ;;  %s9172_s27 = sld [smem:[#allocation44_spill]]  ;;  %s9173_s28 = sld [smem:[#allocation45_spill]] }
 0xbf0   : > { %p40_p0 = scmp.ge.s32.totalorder %s6188_s30, 4   ;;  %s9174_s29 = smov %s6200_s26 }
 0xbf2   :  { %42 = sbr.rel (!%p40_p0) target bundleno = 23 (0x17), region = 205 }
 0xbf9   :  { %3898 = vsyncpa [#allocation3], 1 }
 0xbfa   :  { %3900 = vsyncpa [#allocation3 + $0x1], 1 }
 0xbfb   :  { %3901 = vsyncpa [#allocation6], 1 }
 0xbfc   :  { %3902 = vsyncpa [#allocation9], 1 }
 0xbfd   :  { %3903 = vsyncpa [#allocation12], 1 }
 0xbfe   :  { %3904 = vsyncpa [#allocation15], 1 }
 0xbff   :  { %3905 = vsyncpa [#allocation18], 1 }
 0xc00   :  { %3906 = vsyncpa [#allocation21], 1 }
 0xc01   :  { %3907 = vsyncpa [#allocation24], 1 }
 0xc02   :  { %3908 = vsyncpa [#allocation27], 1 }
 0xc03   :  { %3909 = vsyncpa [#allocation30], 1 }
 0xc04   :  { %3910 = vsyncpa [#allocation4], 1 }
 0xc05   :  { %3912 = vsyncpa [#allocation4 + $0x1], 1 }

</bundles_post_ra>
